<compile_context>
chip_gen: v5e
topology: v5e:2x2
jax: 0.10.0
libtpu: 0.0.40
codegen_flags: <defaults>
</compile_context>

<pallas_src>
import functools
import math

import jax
import jax.numpy as jnp
from jax.experimental import pallas as pl
from jax.experimental.pallas import tpu as pltpu


def _compiler_params(sem, need_bytes):
    # Explicit scoped-VMEM request from the actual block/scratch footprint,
    # clamped to stay within v7x's 64 MiB physical VMEM per TensorCore.
    limit = int(min(max(int(need_bytes), 32 * 1024 * 1024), 64 * 1024 * 1024))
    return pltpu.CompilerParams(dimension_semantics=sem, vmem_limit_bytes=limit)


# ---------------------------------------------------------------------------
# XLA-side im2col for the 3x3 / stride-2 / pad-1 convs with tiny cin (3 / 4).
# Optional "validity" channel = 1 on real pixels, 0 on padding, so a bias row
# in the block-diagonal 1x1 weight reproduces zero-padded conv_stem semantics.
# ---------------------------------------------------------------------------
def _im2col_s2(x_nhwc, with_valid):
    b, h, w, c = x_nhwc.shape
    assert h % 2 == 0 and w % 2 == 0, "stride-2 conv expects even spatial dims"
    ho, wo = h // 2, w // 2
    if with_valid:
        ones = jnp.ones((b, h, w, 1), x_nhwc.dtype)
        x_nhwc = jnp.concatenate([x_nhwc, ones], axis=-1)
        c += 1
    xp = jnp.pad(x_nhwc, ((0, 0), (1, 1), (1, 1), (0, 0)))
    cols = []
    for kh in range(3):
        for kw in range(3):
            cols.append(xp[:, kh:kh + 2 * ho:2, kw:kw + 2 * wo:2, :])
    pat = jnp.concatenate(cols, axis=-1)          # (b, ho, wo, 9*c) tap-major
    return pat.reshape(b * ho * wo, 9 * c)


# ---------------------------------------------------------------------------
# Kernel 1: fused conv_block + conv_stem (single row-tiled pass).
#   xc  = relu( xpatch27 @ Wcb * bn_scale + bn_shift )
#   s   = relu( apatch36 @ block_diag([Ws1; bs1] x9) )          (per-tap 1x1)
#   add = s @ (0.05*Ws2) + 0.05*bs2
# Both outputs stored bf16.
# ---------------------------------------------------------------------------
def _stem_kernel(xp_ref, ap_ref, wcb_ref, bns_ref, bnb_ref, wblk_ref, ws2_ref,
                 bs2_ref, xc_ref, add_ref):
    xc = jnp.dot(xp_ref[...], wcb_ref[...], preferred_element_type=jnp.float32)
    xc = jnp.maximum(xc * bns_ref[...] + bnb_ref[...], 0.0)
    xc_ref[...] = xc.astype(jnp.bfloat16)

    s = jnp.dot(ap_ref[...], wblk_ref[...], preferred_element_type=jnp.float32)
    s = jnp.maximum(s, 0.0).astype(jnp.bfloat16)
    add = jnp.dot(s, ws2_ref[...], preferred_element_type=jnp.float32) + bs2_ref[...]
    add_ref[...] = add.astype(jnp.bfloat16)


def stem_fused(xpatch, apatch, w_cb, bn_s, bn_b, w_blk, w_s2s, b_s2s):
    n, kx = xpatch.shape
    ka = apatch.shape[1]
    km = w_blk.shape[1]
    co = w_cb.shape[1]
    tile = min(1024, max(16, ((n + 15) // 16) * 16))
    tile = (tile // 16) * 16
    n_pad = ((n + tile - 1) // tile) * tile
    if n_pad != n:
        xpatch = jnp.pad(xpatch, ((0, n_pad - n), (0, 0)))
        apatch = jnp.pad(apatch, ((0, n_pad - n), (0, 0)))
    need = (2 * 2 * tile * 128 * 2            # two bf16 input blocks, dbuf, lane-padded
            + 2 * 2 * tile * 128 * 2          # two bf16 output blocks, dbuf
            + tile * (co + km + co) * 4       # f32 temporaries
            + (2 << 20))
    xc, add = pl.pallas_call(
        _stem_kernel,
        out_shape=(jax.ShapeDtypeStruct((n_pad, co), jnp.bfloat16),
                   jax.ShapeDtypeStruct((n_pad, co), jnp.bfloat16)),
        grid=(n_pad // tile,),
        in_specs=[
            pl.BlockSpec((tile, kx), lambda i: (i, 0)),
            pl.BlockSpec((tile, ka), lambda i: (i, 0)),
            pl.BlockSpec((kx, co), lambda i: (0, 0)),
            pl.BlockSpec((1, co), lambda i: (0, 0)),
            pl.BlockSpec((1, co), lambda i: (0, 0)),
            pl.BlockSpec((ka, km), lambda i: (0, 0)),
            pl.BlockSpec((km, co), lambda i: (0, 0)),
            pl.BlockSpec((1, co), lambda i: (0, 0)),
        ],
        out_specs=(pl.BlockSpec((tile, co), lambda i: (i, 0)),
                   pl.BlockSpec((tile, co), lambda i: (i, 0))),
        compiler_params=_compiler_params(("parallel",), need),
    )(xpatch, apatch, w_cb, bn_s.reshape(1, co), bn_b.reshape(1, co),
      w_blk, w_s2s, b_s2s.reshape(1, co))
    return xc[:n], add[:n]


# ---------------------------------------------------------------------------
# Kernel 2: fused channel + spatial perception nodes (with residual adds).
# Whole per-batch (HW, C) slab in VMEM (fine up to ~256^2 inputs).
# TODO(synk): tile the HW axis with online softmax for very large resolutions,
#             and use a lane-dense layout for the 1-wide q-column softmax.
# ---------------------------------------------------------------------------
def _perception_kernel(xc_ref, add_ref, wch_ref, w1_ref, b1_ref, g_ref,
                       beta_ref, w2_ref, b2_ref, wsp_ref, vis_ref, *, ci):
    xc = xc_ref[0].astype(jnp.float32)                               # (HW, C)
    addf = add_ref[0].astype(jnp.float32)
    coarse = xc + addf

    # ---- channel perception node -------------------------------------------
    qp = jnp.dot(coarse.astype(jnp.bfloat16), wch_ref[...],
                 preferred_element_type=jnp.float32)                 # (HW, 128)
    pv = qp[:, :ci]                                                  # (HW, Ci)
    q = qp[:, ci:ci + 1]                                             # (HW, 1)
    q = jnp.exp(q - jnp.max(q, axis=0, keepdims=True))
    q = q / jnp.sum(q, axis=0, keepdims=True)
    pm = jnp.sum(pv * q, axis=0, keepdims=True)                      # (1, Ci)

    u = jnp.dot(pm, w1_ref[...], preferred_element_type=jnp.float32) + b1_ref[...]
    mu = jnp.mean(u, axis=1, keepdims=True)
    var = jnp.mean((u - mu) ** 2, axis=1, keepdims=True)
    u = (u - mu) * jax.lax.rsqrt(var + 1e-5) * g_ref[...] + beta_ref[...]
    u = jnp.maximum(u, 0.0)
    m = jnp.dot(u, w2_ref[...], preferred_element_type=jnp.float32) + b2_ref[...]
    mask_ch = jax.nn.sigmoid(m)                                      # (1, C)
    cli = coarse * mask_ch + addf                                    # (HW, C)

    # ---- spatial perception node -------------------------------------------
    qv = jnp.dot(cli.astype(jnp.bfloat16), wsp_ref[...],
                 preferred_element_type=jnp.float32)                 # (HW, 128)
    qs = qv[:, :ci]
    v = qv[:, ci:2 * ci]
    avg = jnp.mean(qs, axis=0, keepdims=True)                        # (1, Ci)
    # MaxPool1d(kernel=3, stride=1, padding=1) along channels (-inf padding).
    neg = jnp.full((1, 1), -jnp.inf, dtype=avg.dtype)
    left = jnp.concatenate([neg, avg[:, :-1]], axis=1)
    right = jnp.concatenate([avg[:, 1:], neg], axis=1)
    avg2 = avg + jnp.maximum(jnp.maximum(left, right), avg)
    v = jnp.exp(v - jnp.max(v, axis=0, keepdims=True))
    v = v / jnp.sum(v, axis=0, keepdims=True)
    av = jnp.sum(v * avg2, axis=1, keepdims=True)                    # (HW, 1)
    mask_sp = jax.nn.sigmoid(av)

    vis_ref[0] = (xc + cli * mask_sp).astype(jnp.bfloat16)


def perception(xc3, add3, p):
    bsz, hw, c = xc3.shape
    ci = p["wv_ch"].shape[1]
    cm = p["w_up1"].shape[1]
    # Fused, 128-lane zero-padded weights (dense MXU output tiles).
    w_ch = jnp.zeros((c, 128), jnp.float32)
    w_ch = w_ch.at[:, :ci].set(p["wv_ch"]).at[:, ci].set(p["wq_ch"][:, 0])
    w_sp = jnp.zeros((c, 128), jnp.float32)
    w_sp = w_sp.at[:, :ci].set(p["wq_sp"]).at[:, ci:2 * ci].set(p["wv_sp"])
    need = (3 * 2 * hw * 128 * 2              # xc/add/vis bf16 blocks, dbuf, lane-padded
            + 4 * hw * 128 * 4                # qp/qv/cli/coarse f32 temporaries
            + (2 << 20))
    return pl.pallas_call(
        functools.partial(_perception_kernel, ci=ci),
        out_shape=jax.ShapeDtypeStruct((bsz, hw, c), jnp.bfloat16),
        grid=(bsz,),
        in_specs=[
            pl.BlockSpec((1, hw, c), lambda i: (i, 0, 0)),
            pl.BlockSpec((1, hw, c), lambda i: (i, 0, 0)),
            pl.BlockSpec((c, 128), lambda i: (0, 0)),
            pl.BlockSpec((ci, cm), lambda i: (0, 0)),
            pl.BlockSpec((1, cm), lambda i: (0, 0)),
            pl.BlockSpec((1, cm), lambda i: (0, 0)),
            pl.BlockSpec((1, cm), lambda i: (0, 0)),
            pl.BlockSpec((cm, c), lambda i: (0, 0)),
            pl.BlockSpec((1, c), lambda i: (0, 0)),
            pl.BlockSpec((c, 128), lambda i: (0, 0)),
        ],
        out_specs=pl.BlockSpec((1, hw, c), lambda i: (i, 0, 0)),
        compiler_params=_compiler_params(("parallel",), need),
    )(
        xc3, add3, w_ch.astype(jnp.bfloat16), p["w_up1"],
        p["b_up1"].reshape(1, cm), p["ln_g"].reshape(1, cm),
        p["ln_b"].reshape(1, cm), p["w_up2"], p["b_up2"].reshape(1, c),
        w_sp.astype(jnp.bfloat16),
    )


# ---------------------------------------------------------------------------
# Kernel 3: induct_gate = 3x3 / stride-2 / pad-1 conv (64->64) + BN + ReLU.
# Phase-split input, in-kernel im2col gather into a bf16 VMEM scratch, one
# (tile_hw, 576) @ (576, 64) bf16 matmul.  Grid is (batch, output-row tiles);
# the 1-row halo is duplicated XLA-side (~1.03x) so tiles never overlap.
# ---------------------------------------------------------------------------
def _ig_kernel(p00_ref, p01_ref, p10_ref, p11_ref, w_ref, sc_ref, sh_ref,
               o_ref, patch_ref, *, tr, wo):
    phases = ((p00_ref, p01_ref), (p10_ref, p11_ref))

    def fill_row(r):
        parts = []
        for kh in range(3):
            for kw in range(3):
                src = phases[kh % 2][kw % 2]
                parts.append(src[0, 0, r + kh // 2, kw // 2:kw // 2 + wo, :])
        row = jnp.concatenate(parts, axis=-1).astype(patch_ref.dtype)
        off = r * wo
        if (wo % 8 == 0) and (not isinstance(r, int)):
            off = pl.multiple_of(off, 8)
        patch_ref[pl.ds(off, wo), :] = row

    if tr <= 8:                       # tiny maps: fully static gather
        for r in range(tr):
            fill_row(r)
    else:                             # rolled loop keeps vreg live ranges bounded
        @pl.loop(0, tr)
        def _(r):
            fill_row(r)

    acc = jnp.dot(patch_ref[...], w_ref[...], preferred_element_type=jnp.float32)
    acc = jnp.maximum(acc * sc_ref[...] + sh_ref[...], 0.0)
    o_ref[0] = acc


def induct_gate_conv(vis_nhwc, w_flat_bf16, scale, shift, *, tr_cap=32):
    bsz, h, w, c = vis_nhwc.shape
    assert h % 2 == 0 and w % 2 == 0
    ho, wo = h // 2, w // 2
    co = w_flat_bf16.shape[-1]
    tr = ho if ho <= tr_cap else tr_cap
    nt = -(-ho // tr)
    ho_pad = nt * tr

    # phase[a][b][i, j, :] = vis_pad[2i + a, 2j + b, :]
    xp = jnp.pad(vis_nhwc, ((0, 0), (1, 1), (1, 1), (0, 0)))
    xr = xp.reshape(bsz, ho + 1, 2, wo + 1, 2, c)
    phases = [xr[:, :, a, :, bb, :] for a in range(2) for bb in range(2)]

    # Overlapping row tiles (halo of 1 phase row duplicated XLA-side).
    row_idx = jnp.arange(nt)[:, None] * tr + jnp.arange(tr + 1)[None, :]
    def tile_rows(p):
        if ho_pad > ho:
            p = jnp.pad(p, ((0, 0), (0, ho_pad - ho), (0, 0), (0, 0)))
        return p[:, row_idx]                       # (bsz, nt, tr+1, wo+1, c)
    pts = [tile_rows(p) for p in phases]

    hw_tile = tr * wo
    phase_spec = pl.BlockSpec((1, 1, tr + 1, wo + 1, c),
                              lambda bb, t: (bb, t, 0, 0, 0))
    need = (4 * 2 * (tr + 1) * (wo + 1) * 128 * 2    # phase blocks (bf16, lane-padded, dbuf)
            + hw_tile * 9 * c * 2                    # bf16 im2col scratch
            + 2 * hw_tile * 128 * 4                  # f32 output block, dbuf
            + (2 << 20))
    out = pl.pallas_call(
        functools.partial(_ig_kernel, tr=tr, wo=wo),
        out_shape=jax.ShapeDtypeStruct((bsz, ho_pad * wo, co), jnp.float32),
        grid=(bsz, nt),
        in_specs=[phase_spec] * 4 + [
            pl.BlockSpec((9 * c, co), lambda bb, t: (0, 0)),
            pl.BlockSpec((1, co), lambda bb, t: (0, 0)),
            pl.BlockSpec((1, co), lambda bb, t: (0, 0)),
        ],
        out_specs=pl.BlockSpec((1, hw_tile, co), lambda bb, t: (bb, t, 0)),
        scratch_shapes=[pltpu.VMEM((hw_tile, 9 * c), jnp.bfloat16)],
        compiler_params=_compiler_params(("parallel", "parallel"), need),
    )(*pts, w_flat_bf16, scale.reshape(1, co), shift.reshape(1, co))
    if ho_pad != ho:
        out = out[:, :ho * wo]
    return out


# ---------------------------------------------------------------------------
# Full forward pass (XLA glue = transposes, small im2col, halo-tiled views).
# ---------------------------------------------------------------------------
def ccf_forward(params, x_nchw, add_nchw):
    bf = jnp.bfloat16
    x = jnp.transpose(x_nchw, (0, 2, 3, 1))
    add = jnp.transpose(add_nchw, (0, 2, 3, 1))
    b, h, wd, _ = x.shape
    ho, wo = h // 2, wd // 2

    # XLA-side im2col for the tiny-cin convs (a few MiB even at 512^2).
    xpatch = _im2col_s2(x, with_valid=False).astype(bf)        # (N, 27)
    apatch = _im2col_s2(add, with_valid=True).astype(bf)       # (N, 36)

    w_cb = params["w_cb"].reshape(27, 64).astype(bf)
    # block-diag of [w_s1; b_s1] per tap: bias rides on the validity channel,
    # so padded taps contribute exactly 0 (matches zero-padded conv_stem).
    w_aug = jnp.concatenate([params["w_s1"], params["b_s1"][None, :]], axis=0)
    w_blk = jnp.kron(jnp.eye(9, dtype=jnp.float32), w_aug).astype(bf)   # (36, 144)
    w_s2s = (0.05 * params["w_s2"]).reshape(144, 64).astype(bf)
    b_s2s = 0.05 * params["b_s2"]
    w_ig = params["w_ig"].reshape(576, 64).astype(bf)

    # Fused conv_block + conv_stem (one pass, bf16 outputs).
    xc_flat, add_flat = stem_fused(xpatch, apatch, w_cb, params["bn1_scale"],
                                   params["bn1_shift"], w_blk, w_s2s, b_s2s)
    xc3 = xc_flat.reshape(b, ho * wo, 64)
    add3 = add_flat.reshape(b, ho * wo, 64)

    # Fused channel + spatial perception nodes (+ residual adds), bf16 output.
    vis3 = perception(xc3, add3, params)                       # (b, ho*wo, 64)

    # induct_gate: Conv3x3 s2 (64->64, no bias) + BN + ReLU.
    vis = vis3.reshape(b, ho, wo, 64)
    out3 = induct_gate_conv(vis, w_ig, params["bn2_scale"], params["bn2_shift"])
    out = out3.reshape(b, ho // 2, wo // 2, 64)
    return jnp.transpose(out, (0, 3, 1, 2))


# ---------------------------------------------------------------------------
# Pure-JAX reference with the same numeric policy (bf16 MXU operands, f32
# accumulation, bf16 storage of xc / add / vis) so the comparison isolates
# Pallas-vs-XLA correctness rather than precision policy.
# ---------------------------------------------------------------------------
def ccf_reference(params, x_nchw, add_nchw):
    bf = jnp.bfloat16
    f32 = jnp.float32
    x = jnp.transpose(x_nchw, (0, 2, 3, 1))
    add = jnp.transpose(add_nchw, (0, 2, 3, 1))

    def c3s2(t, w):
        return jax.lax.conv_general_dilated(
            t.astype(bf), w.astype(bf), (2, 2), ((1, 1), (1, 1)),
            dimension_numbers=("NHWC", "HWIO", "NHWC"),
            preferred_element_type=f32)

    xc = jax.nn.relu(c3s2(x, params["w_cb"]) * params["bn1_scale"] + params["bn1_shift"])
    xc = xc.astype(bf).astype(f32)

    b_s1 = params["b_s1"].astype(bf).astype(f32)   # kernel adds bias as a bf16 matmul operand
    s1 = jax.nn.relu(
        jnp.einsum("bhwc,cd->bhwd", add.astype(bf), params["w_s1"].astype(bf),
                   preferred_element_type=f32) + b_s1)
    add_f = c3s2(s1, params["w_s2"]) * 0.05 + 0.05 * params["b_s2"]
    add_f = add_f.astype(bf).astype(f32)

    coarse = xc + add_f
    bsz, h2, w2, c = coarse.shape
    hw = h2 * w2
    cf = coarse.reshape(bsz, hw, c)
    cfb = cf.astype(bf)
    q = jax.nn.softmax(jnp.einsum("bnc,co->bno", cfb, params["wq_ch"].astype(bf),
                                  preferred_element_type=f32), axis=1)
    pvals = jnp.einsum("bnc,co->bno", cfb, params["wv_ch"].astype(bf),
                       preferred_element_type=f32)
    pm = jnp.sum(pvals * q, axis=1)
    u = jnp.dot(pm, params["w_up1"]) + params["b_up1"]
    mu = jnp.mean(u, axis=-1, keepdims=True)
    var = jnp.mean((u - mu) ** 2, axis=-1, keepdims=True)
    u = jax.nn.relu((u - mu) * jax.lax.rsqrt(var + 1e-5) * params["ln_g"] + params["ln_b"])
    mask_ch = jax.nn.sigmoid(jnp.dot(u, params["w_up2"]) + params["b_up2"])
    cli = cf * mask_ch[:, None, :] + add_f.reshape(bsz, hw, c)

    clib = cli.astype(bf)
    qs = jnp.einsum("bnc,co->bno", clib, params["wq_sp"].astype(bf),
                    preferred_element_type=f32)
    avg = jnp.mean(qs, axis=1)
    padv = jnp.pad(avg, ((0, 0), (1, 1)), constant_values=-jnp.inf)
    pooled = jnp.maximum(jnp.maximum(padv[:, :-2], padv[:, 1:-1]), padv[:, 2:])
    avg2 = avg + pooled
    v = jax.nn.softmax(jnp.einsum("bnc,co->bno", clib, params["wv_sp"].astype(bf),
                                  preferred_element_type=f32), axis=1)
    mask_sp = jax.nn.sigmoid(jnp.sum(v * avg2[:, None, :], axis=-1))[..., None]
    vis = xc.reshape(bsz, hw, c) + cli * mask_sp
    vis = vis.astype(bf).astype(f32)

    out = jax.nn.relu(c3s2(vis.reshape(bsz, h2, w2, c), params["w_ig"])
                      * params["bn2_scale"] + params["bn2_shift"])
    return jnp.transpose(out, (0, 3, 1, 2))


# ---------------------------------------------------------------------------
# Deterministic synthetic parameter init (inplanes = planes = 64).
# ---------------------------------------------------------------------------
def init_params(key):
    ks = jax.random.split(key, 14)

    def kn(k, shape, fan_in):
        return jax.random.normal(k, shape, jnp.float32) * math.sqrt(2.0 / fan_in)

    def bias(k, shape, fan_in):
        bound = 1.0 / math.sqrt(fan_in)
        return jax.random.uniform(k, shape, jnp.float32, -bound, bound)

    eps = 1e-5
    bn_scale = jnp.full((64,), 1.0 / math.sqrt(1.0 + eps), jnp.float32)
    bn_shift = jnp.zeros((64,), jnp.float32)
    return dict(
        w_cb=kn(ks[0], (3, 3, 3, 64), 27),
        bn1_scale=bn_scale, bn1_shift=bn_shift,
        w_s1=kn(ks[1], (3, 16), 3), b_s1=bias(ks[2], (16,), 3),
        w_s2=kn(ks[3], (3, 3, 16, 64), 144), b_s2=bias(ks[4], (64,), 144),
        wq_ch=kn(ks[5], (64, 1), 64),
        wv_ch=kn(ks[6], (64, 32), 64),
        w_up1=kn(ks[7], (32, 8), 32), b_up1=bias(ks[8], (8,), 32),
        ln_g=jnp.ones((8,), jnp.float32), ln_b=jnp.zeros((8,), jnp.float32),
        w_up2=kn(ks[9], (8, 64), 8), b_up2=bias(ks[10], (64,), 8),
        wq_sp=kn(ks[11], (64, 32), 64),
        wv_sp=kn(ks[12], (64, 32), 64),
        w_ig=kn(ks[13], (3, 3, 64, 64), 576),
        bn2_scale=bn_scale, bn2_shift=bn_shift,
    )


if __name__ == "__main__":
    key = jax.random.PRNGKey(0)
    kx, ka, kp = jax.random.split(key, 3)
    x = jax.random.normal(kx, (2, 3, 16, 16), jnp.float32)
    additional_features = jax.random.normal(ka, (2, 3, 16, 16), jnp.float32)
    params = init_params(kp)

    out = jax.jit(ccf_forward)(params, x, additional_features)
    out = jax.block_until_ready(out)
    assert out.shape == (2, 64, 4, 4), out.shape

    ref = jax.jit(ccf_reference)(params, x, additional_features)
    ref = jax.block_until_ready(ref)
    err = float(jnp.max(jnp.abs(out - ref)))
    # Both paths use bf16 MXU operands / bf16 intermediate storage with f32
    # accumulation; residual error comes from accumulation order and
    # transcendental implementations (~1e-3 expected).
    if not (err < 5e-2):
        raise AssertionError(f"Pallas output mismatch vs JAX reference: max abs err {err}")

    print("KERNEL_OK")
</pallas_src>

<mosaic_0001>
module attributes {stable_mosaic.version = 11 : i64} {
  func.func @_stem_kernel(%arg0: i32, %arg1: memref<128x27xbf16, #tpu.memory_space<vmem>>, %arg2: memref<128x36xbf16, #tpu.memory_space<vmem>>, %arg3: memref<27x64xbf16, #tpu.memory_space<vmem>>, %arg4: memref<1x64xf32, #tpu.memory_space<vmem>>, %arg5: memref<1x64xf32, #tpu.memory_space<vmem>>, %arg6: memref<36x144xbf16, #tpu.memory_space<vmem>>, %arg7: memref<144x64xbf16, #tpu.memory_space<vmem>>, %arg8: memref<1x64xf32, #tpu.memory_space<vmem>>, %arg9: memref<128x64xbf16, #tpu.memory_space<vmem>>, %arg10: memref<128x64xbf16, #tpu.memory_space<vmem>>) attributes {dimension_semantics = [#tpu.dimension_semantics<parallel>], iteration_bounds = array<i64: 1>, scalar_prefetch = 0 : i64, scratch_operands = 0 : i64, tpu.core_type = #tpu.core_type<tc>, window_params = [{transform_indices = @transform_0, window_bounds = array<i64: 128, 27>}, {transform_indices = @transform_1, window_bounds = array<i64: 128, 36>}, {pipeline_mode = #tpu.pipeline_mode<synchronous>, transform_indices = @transform_2, window_bounds = array<i64: 27, 64>}, {pipeline_mode = #tpu.pipeline_mode<synchronous>, transform_indices = @transform_3, window_bounds = array<i64: 1, 64>}, {pipeline_mode = #tpu.pipeline_mode<synchronous>, transform_indices = @transform_4, window_bounds = array<i64: 1, 64>}, {pipeline_mode = #tpu.pipeline_mode<synchronous>, transform_indices = @transform_5, window_bounds = array<i64: 36, 144>}, {pipeline_mode = #tpu.pipeline_mode<synchronous>, transform_indices = @transform_6, window_bounds = array<i64: 144, 64>}, {pipeline_mode = #tpu.pipeline_mode<synchronous>, transform_indices = @transform_7, window_bounds = array<i64: 1, 64>}, {transform_indices = @transform_8, window_bounds = array<i64: 128, 64>}, {transform_indices = @transform_9, window_bounds = array<i64: 128, 64>}]} {
    %c0 = arith.constant 0 : index
    %c0_0 = arith.constant 0 : index
    %0 = vector.load %arg1[%c0, %c0_0] : memref<128x27xbf16, #tpu.memory_space<vmem>>, vector<128x27xbf16>
    %c0_1 = arith.constant 0 : index
    %c0_2 = arith.constant 0 : index
    %1 = vector.load %arg3[%c0_1, %c0_2] : memref<27x64xbf16, #tpu.memory_space<vmem>>, vector<27x64xbf16>
    %cst = arith.constant dense<0.000000e+00> : vector<128x64xf32>
    %2 = tpu.matmul %0, %1, %cst {dimension_numbers = #tpu.dot_dimension_numbers<[1], [0], [0], [1], [0, 0, 1, 1], [], []>} : vector<128x27xbf16>, vector<27x64xbf16>, vector<128x64xf32> -> vector<128x64xf32>
    %c0_3 = arith.constant 0 : index
    %c0_4 = arith.constant 0 : index
    %3 = vector.load %arg4[%c0_3, %c0_4] : memref<1x64xf32, #tpu.memory_space<vmem>>, vector<1x64xf32>
    %4 = vector.broadcast %3 : vector<1x64xf32> to vector<128x64xf32>
    %5 = arith.mulf %2, %4 : vector<128x64xf32>
    %c0_5 = arith.constant 0 : index
    %c0_6 = arith.constant 0 : index
    %6 = vector.load %arg5[%c0_5, %c0_6] : memref<1x64xf32, #tpu.memory_space<vmem>>, vector<1x64xf32>
    %7 = vector.broadcast %6 : vector<1x64xf32> to vector<128x64xf32>
    %8 = arith.addf %5, %7 : vector<128x64xf32>
    %cst_7 = arith.constant 0.000000e+00 : f32
    %9 = vector.broadcast %cst_7 : f32 to vector<128x64xf32>
    %10 = arith.maximumf %8, %9 : vector<128x64xf32>
    %11 = arith.truncf %10 : vector<128x64xf32> to vector<128x64xbf16>
    %c0_8 = arith.constant 0 : index
    %c0_9 = arith.constant 0 : index
    %12 = vector.load %arg9[%c0_8, %c0_9] : memref<128x64xbf16, #tpu.memory_space<vmem>>, vector<128x64xbf16>
    tpu.vector_store %arg9[%c0_8, %c0_9], %11 {strides = array<i32>} : memref<128x64xbf16, #tpu.memory_space<vmem>>, vector<128x64xbf16>,
    %c0_10 = arith.constant 0 : index
    %c0_11 = arith.constant 0 : index
    %13 = vector.load %arg2[%c0_10, %c0_11] : memref<128x36xbf16, #tpu.memory_space<vmem>>, vector<128x36xbf16>
    %c0_12 = arith.constant 0 : index
    %c0_13 = arith.constant 0 : index
    %14 = vector.load %arg6[%c0_12, %c0_13] : memref<36x144xbf16, #tpu.memory_space<vmem>>, vector<36x144xbf16>
    %cst_14 = arith.constant dense<0.000000e+00> : vector<128x144xf32>
    %15 = tpu.matmul %13, %14, %cst_14 {dimension_numbers = #tpu.dot_dimension_numbers<[1], [0], [0], [1], [0, 0, 1, 1], [], []>} : vector<128x36xbf16>, vector<36x144xbf16>, vector<128x144xf32> -> vector<128x144xf32>
    %cst_15 = arith.constant 0.000000e+00 : f32
    %16 = vector.broadcast %cst_15 : f32 to vector<128x144xf32>
    %17 = arith.maximumf %15, %16 : vector<128x144xf32>
    %18 = arith.truncf %17 : vector<128x144xf32> to vector<128x144xbf16>
    %c0_16 = arith.constant 0 : index
    %c0_17 = arith.constant 0 : index
    %19 = vector.load %arg7[%c0_16, %c0_17] : memref<144x64xbf16, #tpu.memory_space<vmem>>, vector<144x64xbf16>
    %cst_18 = arith.constant dense<0.000000e+00> : vector<128x64xf32>
    %20 = tpu.matmul %18, %19, %cst_18 {dimension_numbers = #tpu.dot_dimension_numbers<[1], [0], [0], [1], [0, 0, 1, 1], [], []>} : vector<128x144xbf16>, vector<144x64xbf16>, vector<128x64xf32> -> vector<128x64xf32>
    %c0_19 = arith.constant 0 : index
    %c0_20 = arith.constant 0 : index
    %21 = vector.load %arg8[%c0_19, %c0_20] : memref<1x64xf32, #tpu.memory_space<vmem>>, vector<1x64xf32>
    %22 = vector.broadcast %21 : vector<1x64xf32> to vector<128x64xf32>
    %23 = arith.addf %20, %22 : vector<128x64xf32>
    %24 = arith.truncf %23 : vector<128x64xf32> to vector<128x64xbf16>
    %c0_21 = arith.constant 0 : index
    %c0_22 = arith.constant 0 : index
    %25 = vector.load %arg10[%c0_21, %c0_22] : memref<128x64xbf16, #tpu.memory_space<vmem>>, vector<128x64xbf16>
    tpu.vector_store %arg10[%c0_21, %c0_22], %24 {strides = array<i32>} : memref<128x64xbf16, #tpu.memory_space<vmem>>, vector<128x64xbf16>,
    return
  }
  func.func @transform_0(%arg0: i32) -> (i32, i32) {
    %c0_i32 = arith.constant 0 : i32
    %c0_i32_0 = arith.constant 0 : i32
    return %arg0, %c0_i32 : i32, i32
  }
  func.func @transform_1(%arg0: i32) -> (i32, i32) {
    %c0_i32 = arith.constant 0 : i32
    %c0_i32_0 = arith.constant 0 : i32
    return %arg0, %c0_i32 : i32, i32
  }
  func.func @transform_2(%arg0: i32) -> (i32, i32) {
    %c0_i32 = arith.constant 0 : i32
    %c0_i32_0 = arith.constant 0 : i32
    %c0_i32_1 = arith.constant 0 : i32
    return %c0_i32, %c0_i32_0 : i32, i32
  }
  func.func @transform_3(%arg0: i32) -> (i32, i32) {
    %c0_i32 = arith.constant 0 : i32
    %c0_i32_0 = arith.constant 0 : i32
    %c0_i32_1 = arith.constant 0 : i32
    return %c0_i32, %c0_i32_0 : i32, i32
  }
  func.func @transform_4(%arg0: i32) -> (i32, i32) {
    %c0_i32 = arith.constant 0 : i32
    %c0_i32_0 = arith.constant 0 : i32
    %c0_i32_1 = arith.constant 0 : i32
    return %c0_i32, %c0_i32_0 : i32, i32
  }
  func.func @transform_5(%arg0: i32) -> (i32, i32) {
    %c0_i32 = arith.constant 0 : i32
    %c0_i32_0 = arith.constant 0 : i32
    %c0_i32_1 = arith.constant 0 : i32
    return %c0_i32, %c0_i32_0 : i32, i32
  }
  func.func @transform_6(%arg0: i32) -> (i32, i32) {
    %c0_i32 = arith.constant 0 : i32
    %c0_i32_0 = arith.constant 0 : i32
    %c0_i32_1 = arith.constant 0 : i32
    return %c0_i32, %c0_i32_0 : i32, i32
  }
  func.func @transform_7(%arg0: i32) -> (i32, i32) {
    %c0_i32 = arith.constant 0 : i32
    %c0_i32_0 = arith.constant 0 : i32
    %c0_i32_1 = arith.constant 0 : i32
    return %c0_i32, %c0_i32_0 : i32, i32
  }
  func.func @transform_8(%arg0: i32) -> (i32, i32) {
    %c0_i32 = arith.constant 0 : i32
    %c0_i32_0 = arith.constant 0 : i32
    return %arg0, %c0_i32 : i32, i32
  }
  func.func @transform_9(%arg0: i32) -> (i32, i32) {
    %c0_i32 = arith.constant 0 : i32
    %c0_i32_0 = arith.constant 0 : i32
    return %arg0, %c0_i32 : i32, i32
  }
}

module attributes {stable_mosaic.version = 11 : i64} {
  func.func @_perception_kernel(%arg0: i32, %arg1: memref<1x64x64xbf16, #tpu.memory_space<vmem>>, %arg2: memref<1x64x64xbf16, #tpu.memory_space<vmem>>, %arg3: memref<64x128xbf16, #tpu.memory_space<vmem>>, %arg4: memref<32x8xf32, #tpu.memory_space<vmem>>, %arg5: memref<1x8xf32, #tpu.memory_space<vmem>>, %arg6: memref<1x8xf32, #tpu.memory_space<vmem>>, %arg7: memref<1x8xf32, #tpu.memory_space<vmem>>, %arg8: memref<8x64xf32, #tpu.memory_space<vmem>>, %arg9: memref<1x64xf32, #tpu.memory_space<vmem>>, %arg10: memref<64x128xbf16, #tpu.memory_space<vmem>>, %arg11: memref<1x64x64xbf16, #tpu.memory_space<vmem>>) attributes {dimension_semantics = [#tpu.dimension_semantics<parallel>], iteration_bounds = array<i64: 2>, scalar_prefetch = 0 : i64, scratch_operands = 0 : i64, tpu.core_type = #tpu.core_type<tc>, window_params = [{transform_indices = @transform_0, window_bounds = array<i64: 1, 64, 64>}, {transform_indices = @transform_1, window_bounds = array<i64: 1, 64, 64>}, {pipeline_mode = #tpu.pipeline_mode<synchronous>, transform_indices = @transform_2, window_bounds = array<i64: 64, 128>}, {pipeline_mode = #tpu.pipeline_mode<synchronous>, transform_indices = @transform_3, window_bounds = array<i64: 32, 8>}, {pipeline_mode = #tpu.pipeline_mode<synchronous>, transform_indices = @transform_4, window_bounds = array<i64: 1, 8>}, {pipeline_mode = #tpu.pipeline_mode<synchronous>, transform_indices = @transform_5, window_bounds = array<i64: 1, 8>}, {pipeline_mode = #tpu.pipeline_mode<synchronous>, transform_indices = @transform_6, window_bounds = array<i64: 1, 8>}, {pipeline_mode = #tpu.pipeline_mode<synchronous>, transform_indices = @transform_7, window_bounds = array<i64: 8, 64>}, {pipeline_mode = #tpu.pipeline_mode<synchronous>, transform_indices = @transform_8, window_bounds = array<i64: 1, 64>}, {pipeline_mode = #tpu.pipeline_mode<synchronous>, transform_indices = @transform_9, window_bounds = array<i64: 64, 128>}, {transform_indices = @transform_10, window_bounds = array<i64: 1, 64, 64>}]} {
    %c0 = arith.constant 0 : index
    %c0_0 = arith.constant 0 : index
    %c0_1 = arith.constant 0 : index
    %0 = vector.load %arg1[%c0, %c0_0, %c0_1] : memref<1x64x64xbf16, #tpu.memory_space<vmem>>, vector<1x64x64xbf16>
    %1 = vector.shape_cast %0 : vector<1x64x64xbf16> to vector<64x64xbf16>
    %2 = arith.extf %1 : vector<64x64xbf16> to vector<64x64xf32>
    %c0_2 = arith.constant 0 : index
    %c0_3 = arith.constant 0 : index
    %c0_4 = arith.constant 0 : index
    %3 = vector.load %arg2[%c0_2, %c0_3, %c0_4] : memref<1x64x64xbf16, #tpu.memory_space<vmem>>, vector<1x64x64xbf16>
    %4 = vector.shape_cast %3 : vector<1x64x64xbf16> to vector<64x64xbf16>
    %5 = arith.extf %4 : vector<64x64xbf16> to vector<64x64xf32>
    %6 = arith.addf %2, %5 : vector<64x64xf32>
    %7 = arith.truncf %6 : vector<64x64xf32> to vector<64x64xbf16>
    %c0_5 = arith.constant 0 : index
    %c0_6 = arith.constant 0 : index
    %8 = vector.load %arg3[%c0_5, %c0_6] : memref<64x128xbf16, #tpu.memory_space<vmem>>, vector<64x128xbf16>
    %cst = arith.constant dense<0.000000e+00> : vector<64x128xf32>
    %9 = tpu.matmul %7, %8, %cst {dimension_numbers = #tpu.dot_dimension_numbers<[1], [0], [0], [1], [0, 0, 1, 1], [], []>} : vector<64x64xbf16>, vector<64x128xbf16>, vector<64x128xf32> -> vector<64x128xf32>
    %10 = vector.extract_strided_slice %9 {offsets = [0, 0], sizes = [64, 32], strides = [1, 1]} : vector<64x128xf32> to vector<64x32xf32>
    %11 = vector.extract_strided_slice %9 {offsets = [0, 32], sizes = [64, 1], strides = [1, 1]} : vector<64x128xf32> to vector<64x1xf32>
    %cst_7 = arith.constant dense<0xFF800000> : vector<1xf32>
    %12 = vector.multi_reduction <maximumf>, %11, %cst_7 [0] : vector<64x1xf32> to vector<1xf32>
    %13 = vector.shape_cast %12 : vector<1xf32> to vector<1x1xf32>
    %14 = vector.broadcast %13 : vector<1x1xf32> to vector<64x1xf32>
    %15 = arith.subf %11, %14 : vector<64x1xf32>
    %16 = math.exp %15 : vector<64x1xf32>
    %cst_8 = arith.constant dense<0.000000e+00> : vector<1xf32>
    %17 = vector.multi_reduction <add>, %16, %cst_8 [0] : vector<64x1xf32> to vector<1xf32>
    %18 = vector.shape_cast %17 : vector<1xf32> to vector<1x1xf32>
    %19 = vector.broadcast %18 : vector<1x1xf32> to vector<64x1xf32>
    %20 = arith.divf %16, %19 : vector<64x1xf32>
    %21 = vector.broadcast %20 : vector<64x1xf32> to vector<64x32xf32>
    %22 = arith.mulf %10, %21 : vector<64x32xf32>
    %cst_9 = arith.constant dense<0.000000e+00> : vector<32xf32>
    %23 = vector.multi_reduction <add>, %22, %cst_9 [0] : vector<64x32xf32> to vector<32xf32>
    %24 = vector.shape_cast %23 : vector<32xf32> to vector<1x32xf32>
    %c0_10 = arith.constant 0 : index
    %c0_11 = arith.constant 0 : index
    %25 = vector.load %arg4[%c0_10, %c0_11] : memref<32x8xf32, #tpu.memory_space<vmem>>, vector<32x8xf32>
    %cst_12 = arith.constant dense<0.000000e+00> : vector<1x8xf32>
    %26 = tpu.matmul %24, %25, %cst_12 {dimension_numbers = #tpu.dot_dimension_numbers<[1], [0], [0], [1], [0, 0, 1, 1], [], []>} : vector<1x32xf32>, vector<32x8xf32>, vector<1x8xf32> -> vector<1x8xf32>
    %c0_13 = arith.constant 0 : index
    %c0_14 = arith.constant 0 : index
    %27 = vector.load %arg5[%c0_13, %c0_14] : memref<1x8xf32, #tpu.memory_space<vmem>>, vector<1x8xf32>
    %28 = arith.addf %26, %27 : vector<1x8xf32>
    %cst_15 = arith.constant dense<0.000000e+00> : vector<1xf32>
    %29 = vector.multi_reduction <add>, %28, %cst_15 [1] : vector<1x8xf32> to vector<1xf32>
    %30 = vector.shape_cast %29 : vector<1xf32> to vector<1x1xf32>
    %cst_16 = arith.constant 8.000000e+00 : f32
    %31 = vector.broadcast %cst_16 : f32 to vector<1x1xf32>
    %32 = arith.divf %30, %31 : vector<1x1xf32>
    %33 = vector.broadcast %32 : vector<1x1xf32> to vector<1x8xf32>
    %34 = arith.subf %28, %33 : vector<1x8xf32>
    %35 = arith.mulf %34, %34 : vector<1x8xf32>
    %cst_17 = arith.constant dense<0.000000e+00> : vector<1xf32>
    %36 = vector.multi_reduction <add>, %35, %cst_17 [1] : vector<1x8xf32> to vector<1xf32>
    %37 = vector.shape_cast %36 : vector<1xf32> to vector<1x1xf32>
    %cst_18 = arith.constant 8.000000e+00 : f32
    %38 = vector.broadcast %cst_18 : f32 to vector<1x1xf32>
    %39 = arith.divf %37, %38 : vector<1x1xf32>
    %40 = vector.broadcast %32 : vector<1x1xf32> to vector<1x8xf32>
    %41 = arith.subf %28, %40 : vector<1x8xf32>
    %cst_19 = arith.constant 9.99999974E-6 : f32
    %42 = vector.broadcast %cst_19 : f32 to vector<1x1xf32>
    %43 = arith.addf %39, %42 : vector<1x1xf32>
    %44 = math.rsqrt %43 : vector<1x1xf32>
    %45 = vector.broadcast %44 : vector<1x1xf32> to vector<1x8xf32>
    %46 = arith.mulf %41, %45 : vector<1x8xf32>
    %c0_20 = arith.constant 0 : index
    %c0_21 = arith.constant 0 : index
    %47 = vector.load %arg6[%c0_20, %c0_21] : memref<1x8xf32, #tpu.memory_space<vmem>>, vector<1x8xf32>
    %48 = arith.mulf %46, %47 : vector<1x8xf32>
    %c0_22 = arith.constant 0 : index
    %c0_23 = arith.constant 0 : index
    %49 = vector.load %arg7[%c0_22, %c0_23] : memref<1x8xf32, #tpu.memory_space<vmem>>, vector<1x8xf32>
    %50 = arith.addf %48, %49 : vector<1x8xf32>
    %cst_24 = arith.constant 0.000000e+00 : f32
    %51 = vector.broadcast %cst_24 : f32 to vector<1x8xf32>
    %52 = arith.maximumf %50, %51 : vector<1x8xf32>
    %c0_25 = arith.constant 0 : index
    %c0_26 = arith.constant 0 : index
    %53 = vector.load %arg8[%c0_25, %c0_26] : memref<8x64xf32, #tpu.memory_space<vmem>>, vector<8x64xf32>
    %cst_27 = arith.constant dense<0.000000e+00> : vector<1x64xf32>
    %54 = tpu.matmul %52, %53, %cst_27 {dimension_numbers = #tpu.dot_dimension_numbers<[1], [0], [0], [1], [0, 0, 1, 1], [], []>} : vector<1x8xf32>, vector<8x64xf32>, vector<1x64xf32> -> vector<1x64xf32>
    %c0_28 = arith.constant 0 : index
    %c0_29 = arith.constant 0 : index
    %55 = vector.load %arg9[%c0_28, %c0_29] : memref<1x64xf32, #tpu.memory_space<vmem>>, vector<1x64xf32>
    %56 = arith.addf %54, %55 : vector<1x64xf32>
    %57 = arith.negf %56 : vector<1x64xf32>
    %58 = math.exp %57 : vector<1x64xf32>
    %cst_30 = arith.constant 1.000000e+00 : f32
    %59 = vector.broadcast %cst_30 : f32 to vector<1x64xf32>
    %60 = arith.addf %59, %58 : vector<1x64xf32>
    %61 = arith.divf %59, %60 : vector<1x64xf32>
    %62 = vector.broadcast %61 : vector<1x64xf32> to vector<64x64xf32>
    %63 = arith.mulf %6, %62 : vector<64x64xf32>
    %64 = arith.addf %63, %5 : vector<64x64xf32>
    %65 = arith.truncf %64 : vector<64x64xf32> to vector<64x64xbf16>
    %c0_31 = arith.constant 0 : index
    %c0_32 = arith.constant 0 : index
    %66 = vector.load %arg10[%c0_31, %c0_32] : memref<64x128xbf16, #tpu.memory_space<vmem>>, vector<64x128xbf16>
    %cst_33 = arith.constant dense<0.000000e+00> : vector<64x128xf32>
    %67 = tpu.matmul %65, %66, %cst_33 {dimension_numbers = #tpu.dot_dimension_numbers<[1], [0], [0], [1], [0, 0, 1, 1], [], []>} : vector<64x64xbf16>, vector<64x128xbf16>, vector<64x128xf32> -> vector<64x128xf32>
    %68 = vector.extract_strided_slice %67 {offsets = [0, 0], sizes = [64, 32], strides = [1, 1]} : vector<64x128xf32> to vector<64x32xf32>
    %69 = vector.extract_strided_slice %67 {offsets = [0, 32], sizes = [64, 32], strides = [1, 1]} : vector<64x128xf32> to vector<64x32xf32>
    %cst_34 = arith.constant dense<0.000000e+00> : vector<32xf32>
    %70 = vector.multi_reduction <add>, %68, %cst_34 [0] : vector<64x32xf32> to vector<32xf32>
    %71 = vector.shape_cast %70 : vector<32xf32> to vector<1x32xf32>
    %cst_35 = arith.constant 6.400000e+01 : f32
    %72 = vector.broadcast %cst_35 : f32 to vector<1x32xf32>
    %73 = arith.divf %71, %72 : vector<1x32xf32>
    %cst_36 = arith.constant 0xFF800000 : f32
    %74 = vector.broadcast %cst_36 : f32 to vector<1x1xf32>
    %75 = vector.extract_strided_slice %73 {offsets = [0, 0], sizes = [1, 31], strides = [1, 1]} : vector<1x32xf32> to vector<1x31xf32>
    %76 = tpu.concatenate %74, %75 in 1 : vector<1x1xf32>, vector<1x31xf32> -> vector<1x32xf32>
    %77 = vector.extract_strided_slice %73 {offsets = [0, 1], sizes = [1, 31], strides = [1, 1]} : vector<1x32xf32> to vector<1x31xf32>
    %78 = tpu.concatenate %77, %74 in 1 : vector<1x31xf32>, vector<1x1xf32> -> vector<1x32xf32>
    %79 = arith.maximumf %76, %78 : vector<1x32xf32>
    %80 = arith.maximumf %79, %73 : vector<1x32xf32>
    %81 = arith.addf %73, %80 : vector<1x32xf32>
    %cst_37 = arith.constant dense<0xFF800000> : vector<32xf32>
    %82 = vector.multi_reduction <maximumf>, %69, %cst_37 [0] : vector<64x32xf32> to vector<32xf32>
    %83 = vector.shape_cast %82 : vector<32xf32> to vector<1x32xf32>
    %84 = vector.broadcast %83 : vector<1x32xf32> to vector<64x32xf32>
    %85 = arith.subf %69, %84 : vector<64x32xf32>
    %86 = math.exp %85 : vector<64x32xf32>
    %cst_38 = arith.constant dense<0.000000e+00> : vector<32xf32>
    %87 = vector.multi_reduction <add>, %86, %cst_38 [0] : vector<64x32xf32> to vector<32xf32>
    %88 = vector.shape_cast %87 : vector<32xf32> to vector<1x32xf32>
    %89 = vector.broadcast %88 : vector<1x32xf32> to vector<64x32xf32>
    %90 = arith.divf %86, %89 : vector<64x32xf32>
    %91 = vector.broadcast %81 : vector<1x32xf32> to vector<64x32xf32>
    %92 = arith.mulf %90, %91 : vector<64x32xf32>
    %cst_39 = arith.constant dense<0.000000e+00> : vector<64xf32>
    %93 = vector.multi_reduction <add>, %92, %cst_39 [1] : vector<64x32xf32> to vector<64xf32>
    %94 = vector.shape_cast %93 : vector<64xf32> to vector<64x1xf32>
    %95 = arith.negf %94 : vector<64x1xf32>
    %96 = math.exp %95 : vector<64x1xf32>
    %cst_40 = arith.constant 1.000000e+00 : f32
    %97 = vector.broadcast %cst_40 : f32 to vector<64x1xf32>
    %98 = arith.addf %97, %96 : vector<64x1xf32>
    %99 = arith.divf %97, %98 : vector<64x1xf32>
    %100 = vector.broadcast %99 : vector<64x1xf32> to vector<64x64xf32>
    %101 = arith.mulf %64, %100 : vector<64x64xf32>
    %102 = arith.addf %2, %101 : vector<64x64xf32>
    %103 = arith.truncf %102 : vector<64x64xf32> to vector<64x64xbf16>
    %c0_41 = arith.constant 0 : index
    %c0_42 = arith.constant 0 : index
    %c0_43 = arith.constant 0 : index
    %104 = vector.load %arg11[%c0_41, %c0_42, %c0_43] : memref<1x64x64xbf16, #tpu.memory_space<vmem>>, vector<1x64x64xbf16>
    %105 = vector.shape_cast %104 : vector<1x64x64xbf16> to vector<64x64xbf16>
    %106 = vector.shape_cast %103 : vector<64x64xbf16> to vector<1x64x64xbf16>
    tpu.vector_store %arg11[%c0_41, %c0_42, %c0_43], %106 {strides = array<i32>} : memref<1x64x64xbf16, #tpu.memory_space<vmem>>, vector<1x64x64xbf16>,
    return
  }
  func.func @transform_0(%arg0: i32) -> (i32, i32, i32) {
    %c0_i32 = arith.constant 0 : i32
    %c0_i32_0 = arith.constant 0 : i32
    %c0_i32_1 = arith.constant 0 : i32
    return %arg0, %c0_i32, %c0_i32_0 : i32, i32, i32
  }
  func.func @transform_1(%arg0: i32) -> (i32, i32, i32) {
    %c0_i32 = arith.constant 0 : i32
    %c0_i32_0 = arith.constant 0 : i32
    %c0_i32_1 = arith.constant 0 : i32
    return %arg0, %c0_i32, %c0_i32_0 : i32, i32, i32
  }
  func.func @transform_2(%arg0: i32) -> (i32, i32) {
    %c0_i32 = arith.constant 0 : i32
    %c0_i32_0 = arith.constant 0 : i32
    %c0_i32_1 = arith.constant 0 : i32
    return %c0_i32, %c0_i32_0 : i32, i32
  }
  func.func @transform_3(%arg0: i32) -> (i32, i32) {
    %c0_i32 = arith.constant 0 : i32
    %c0_i32_0 = arith.constant 0 : i32
    %c0_i32_1 = arith.constant 0 : i32
    return %c0_i32, %c0_i32_0 : i32, i32
  }
  func.func @transform_4(%arg0: i32) -> (i32, i32) {
    %c0_i32 = arith.constant 0 : i32
    %c0_i32_0 = arith.constant 0 : i32
    %c0_i32_1 = arith.constant 0 : i32
    return %c0_i32, %c0_i32_0 : i32, i32
  }
  func.func @transform_5(%arg0: i32) -> (i32, i32) {
    %c0_i32 = arith.constant 0 : i32
    %c0_i32_0 = arith.constant 0 : i32
    %c0_i32_1 = arith.constant 0 : i32
    return %c0_i32, %c0_i32_0 : i32, i32
  }
  func.func @transform_6(%arg0: i32) -> (i32, i32) {
    %c0_i32 = arith.constant 0 : i32
    %c0_i32_0 = arith.constant 0 : i32
    %c0_i32_1 = arith.constant 0 : i32
    return %c0_i32, %c0_i32_0 : i32, i32
  }
  func.func @transform_7(%arg0: i32) -> (i32, i32) {
    %c0_i32 = arith.constant 0 : i32
    %c0_i32_0 = arith.constant 0 : i32
    %c0_i32_1 = arith.constant 0 : i32
    return %c0_i32, %c0_i32_0 : i32, i32
  }
  func.func @transform_8(%arg0: i32) -> (i32, i32) {
    %c0_i32 = arith.constant 0 : i32
    %c0_i32_0 = arith.constant 0 : i32
    %c0_i32_1 = arith.constant 0 : i32
    return %c0_i32, %c0_i32_0 : i32, i32
  }
  func.func @transform_9(%arg0: i32) -> (i32, i32) {
    %c0_i32 = arith.constant 0 : i32
    %c0_i32_0 = arith.constant 0 : i32
    %c0_i32_1 = arith.constant 0 : i32
    return %c0_i32, %c0_i32_0 : i32, i32
  }
  func.func @transform_10(%arg0: i32) -> (i32, i32, i32) {
    %c0_i32 = arith.constant 0 : i32
    %c0_i32_0 = arith.constant 0 : i32
    %c0_i32_1 = arith.constant 0 : i32
    return %arg0, %c0_i32, %c0_i32_0 : i32, i32, i32
  }
}

module attributes {stable_mosaic.version = 11 : i64} {
  func.func @_ig_kernel(%arg0: i32, %arg1: i32, %arg2: memref<1x1x5x5x64xbf16, #tpu.memory_space<vmem>>, %arg3: memref<1x1x5x5x64xbf16, #tpu.memory_space<vmem>>, %arg4: memref<1x1x5x5x64xbf16, #tpu.memory_space<vmem>>, %arg5: memref<1x1x5x5x64xbf16, #tpu.memory_space<vmem>>, %arg6: memref<576x64xbf16, #tpu.memory_space<vmem>>, %arg7: memref<1x64xf32, #tpu.memory_space<vmem>>, %arg8: memref<1x64xf32, #tpu.memory_space<vmem>>, %arg9: memref<1x16x64xf32, #tpu.memory_space<vmem>>, %arg10: memref<16x576xbf16, #tpu.memory_space<vmem>>) attributes {dimension_semantics = [#tpu.dimension_semantics<parallel>, #tpu.dimension_semantics<parallel>], iteration_bounds = array<i64: 2, 1>, scalar_prefetch = 0 : i64, scratch_operands = 1 : i64, tpu.core_type = #tpu.core_type<tc>, window_params = [{transform_indices = @transform_0, window_bounds = array<i64: 1, 1, 5, 5, 64>}, {transform_indices = @transform_1, window_bounds = array<i64: 1, 1, 5, 5, 64>}, {transform_indices = @transform_2, window_bounds = array<i64: 1, 1, 5, 5, 64>}, {transform_indices = @transform_3, window_bounds = array<i64: 1, 1, 5, 5, 64>}, {pipeline_mode = #tpu.pipeline_mode<synchronous>, transform_indices = @transform_4, window_bounds = array<i64: 576, 64>}, {pipeline_mode = #tpu.pipeline_mode<synchronous>, transform_indices = @transform_5, window_bounds = array<i64: 1, 64>}, {pipeline_mode = #tpu.pipeline_mode<synchronous>, transform_indices = @transform_6, window_bounds = array<i64: 1, 64>}, {transform_indices = @transform_7, window_bounds = array<i64: 1, 16, 64>}]} {
    %c0 = arith.constant 0 : index
    %c0_0 = arith.constant 0 : index
    %c0_1 = arith.constant 0 : index
    %c0_2 = arith.constant 0 : index
    %c0_3 = arith.constant 0 : index
    %0 = vector.load %arg2[%c0, %c0_0, %c0_1, %c0_2, %c0_3] : memref<1x1x5x5x64xbf16, #tpu.memory_space<vmem>>, vector<1x1x1x4x64xbf16>
    %1 = vector.shape_cast %0 : vector<1x1x1x4x64xbf16> to vector<4x64xbf16>
    %c0_4 = arith.constant 0 : index
    %c0_5 = arith.constant 0 : index
    %c0_6 = arith.constant 0 : index
    %c0_7 = arith.constant 0 : index
    %c0_8 = arith.constant 0 : index
    %2 = vector.load %arg3[%c0_4, %c0_5, %c0_6, %c0_7, %c0_8] : memref<1x1x5x5x64xbf16, #tpu.memory_space<vmem>>, vector<1x1x1x4x64xbf16>
    %3 = vector.shape_cast %2 : vector<1x1x1x4x64xbf16> to vector<4x64xbf16>
    %c0_9 = arith.constant 0 : index
    %c0_10 = arith.constant 0 : index
    %c0_11 = arith.constant 0 : index
    %c1 = arith.constant 1 : index
    %c0_12 = arith.constant 0 : index
    %4 = vector.load %arg2[%c0_9, %c0_10, %c0_11, %c1, %c0_12] : memref<1x1x5x5x64xbf16, #tpu.memory_space<vmem>>, vector<1x1x1x4x64xbf16>
    %5 = vector.shape_cast %4 : vector<1x1x1x4x64xbf16> to vector<4x64xbf16>
    %c0_13 = arith.constant 0 : index
    %c0_14 = arith.constant 0 : index
    %c0_15 = arith.constant 0 : index
    %c0_16 = arith.constant 0 : index
    %c0_17 = arith.constant 0 : index
    %6 = vector.load %arg4[%c0_13, %c0_14, %c0_15, %c0_16, %c0_17] : memref<1x1x5x5x64xbf16, #tpu.memory_space<vmem>>, vector<1x1x1x4x64xbf16>
    %7 = vector.shape_cast %6 : vector<1x1x1x4x64xbf16> to vector<4x64xbf16>
    %c0_18 = arith.constant 0 : index
    %c0_19 = arith.constant 0 : index
    %c0_20 = arith.constant 0 : index
    %c0_21 = arith.constant 0 : index
    %c0_22 = arith.constant 0 : index
    %8 = vector.load %arg5[%c0_18, %c0_19, %c0_20, %c0_21, %c0_22] : memref<1x1x5x5x64xbf16, #tpu.memory_space<vmem>>, vector<1x1x1x4x64xbf16>
    %9 = vector.shape_cast %8 : vector<1x1x1x4x64xbf16> to vector<4x64xbf16>
    %c0_23 = arith.constant 0 : index
    %c0_24 = arith.constant 0 : index
    %c0_25 = arith.constant 0 : index
    %c1_26 = arith.constant 1 : index
    %c0_27 = arith.constant 0 : index
    %10 = vector.load %arg4[%c0_23, %c0_24, %c0_25, %c1_26, %c0_27] : memref<1x1x5x5x64xbf16, #tpu.memory_space<vmem>>, vector<1x1x1x4x64xbf16>
    %11 = vector.shape_cast %10 : vector<1x1x1x4x64xbf16> to vector<4x64xbf16>
    %c0_28 = arith.constant 0 : index
    %c0_29 = arith.constant 0 : index
    %c1_30 = arith.constant 1 : index
    %c0_31 = arith.constant 0 : index
    %c0_32 = arith.constant 0 : index
    %12 = vector.load %arg2[%c0_28, %c0_29, %c1_30, %c0_31, %c0_32] : memref<1x1x5x5x64xbf16, #tpu.memory_space<vmem>>, vector<1x1x1x4x64xbf16>
    %13 = vector.shape_cast %12 : vector<1x1x1x4x64xbf16> to vector<4x64xbf16>
    %c0_33 = arith.constant 0 : index
    %c0_34 = arith.constant 0 : index
    %c1_35 = arith.constant 1 : index
    %c0_36 = arith.constant 0 : index
    %c0_37 = arith.constant 0 : index
    %14 = vector.load %arg3[%c0_33, %c0_34, %c1_35, %c0_36, %c0_37] : memref<1x1x5x5x64xbf16, #tpu.memory_space<vmem>>, vector<1x1x1x4x64xbf16>
    %15 = vector.shape_cast %14 : vector<1x1x1x4x64xbf16> to vector<4x64xbf16>
    %c0_38 = arith.constant 0 : index
    %c0_39 = arith.constant 0 : index
    %c1_40 = arith.constant 1 : index
    %c1_41 = arith.constant 1 : index
    %c0_42 = arith.constant 0 : index
    %16 = vector.load %arg2[%c0_38, %c0_39, %c1_40, %c1_41, %c0_42] : memref<1x1x5x5x64xbf16, #tpu.memory_space<vmem>>, vector<1x1x1x4x64xbf16>
    %17 = vector.shape_cast %16 : vector<1x1x1x4x64xbf16> to vector<4x64xbf16>
    %18 = tpu.concatenate %1, %3, %5, %7, %9, %11, %13, %15, %17 in 1 : vector<4x64xbf16>, vector<4x64xbf16>, vector<4x64xbf16>, vector<4x64xbf16>, vector<4x64xbf16>, vector<4x64xbf16>, vector<4x64xbf16>, vector<4x64xbf16>, vector<4x64xbf16> -> vector<4x576xbf16>
    %c0_43 = arith.constant 0 : index
    %c0_44 = arith.constant 0 : index
    %19 = vector.load %arg10[%c0_43, %c0_44] : memref<16x576xbf16, #tpu.memory_space<vmem>>, vector<4x576xbf16>
    tpu.vector_store %arg10[%c0_43, %c0_44], %18 {strides = array<i32>} : memref<16x576xbf16, #tpu.memory_space<vmem>>, vector<4x576xbf16>,
    %c0_45 = arith.constant 0 : index
    %c0_46 = arith.constant 0 : index
    %c1_47 = arith.constant 1 : index
    %c0_48 = arith.constant 0 : index
    %c0_49 = arith.constant 0 : index
    %20 = vector.load %arg2[%c0_45, %c0_46, %c1_47, %c0_48, %c0_49] : memref<1x1x5x5x64xbf16, #tpu.memory_space<vmem>>, vector<1x1x1x4x64xbf16>
    %21 = vector.shape_cast %20 : vector<1x1x1x4x64xbf16> to vector<4x64xbf16>
    %c0_50 = arith.constant 0 : index
    %c0_51 = arith.constant 0 : index
    %c1_52 = arith.constant 1 : index
    %c0_53 = arith.constant 0 : index
    %c0_54 = arith.constant 0 : index
    %22 = vector.load %arg3[%c0_50, %c0_51, %c1_52, %c0_53, %c0_54] : memref<1x1x5x5x64xbf16, #tpu.memory_space<vmem>>, vector<1x1x1x4x64xbf16>
    %23 = vector.shape_cast %22 : vector<1x1x1x4x64xbf16> to vector<4x64xbf16>
    %c0_55 = arith.constant 0 : index
    %c0_56 = arith.constant 0 : index
    %c1_57 = arith.constant 1 : index
    %c1_58 = arith.constant 1 : index
    %c0_59 = arith.constant 0 : index
    %24 = vector.load %arg2[%c0_55, %c0_56, %c1_57, %c1_58, %c0_59] : memref<1x1x5x5x64xbf16, #tpu.memory_space<vmem>>, vector<1x1x1x4x64xbf16>
    %25 = vector.shape_cast %24 : vector<1x1x1x4x64xbf16> to vector<4x64xbf16>
    %c0_60 = arith.constant 0 : index
    %c0_61 = arith.constant 0 : index
    %c1_62 = arith.constant 1 : index
    %c0_63 = arith.constant 0 : index
    %c0_64 = arith.constant 0 : index
    %26 = vector.load %arg4[%c0_60, %c0_61, %c1_62, %c0_63, %c0_64] : memref<1x1x5x5x64xbf16, #tpu.memory_space<vmem>>, vector<1x1x1x4x64xbf16>
    %27 = vector.shape_cast %26 : vector<1x1x1x4x64xbf16> to vector<4x64xbf16>
    %c0_65 = arith.constant 0 : index
    %c0_66 = arith.constant 0 : index
    %c1_67 = arith.constant 1 : index
    %c0_68 = arith.constant 0 : index
    %c0_69 = arith.constant 0 : index
    %28 = vector.load %arg5[%c0_65, %c0_66, %c1_67, %c0_68, %c0_69] : memref<1x1x5x5x64xbf16, #tpu.memory_space<vmem>>, vector<1x1x1x4x64xbf16>
    %29 = vector.shape_cast %28 : vector<1x1x1x4x64xbf16> to vector<4x64xbf16>
    %c0_70 = arith.constant 0 : index
    %c0_71 = arith.constant 0 : index
    %c1_72 = arith.constant 1 : index
    %c1_73 = arith.constant 1 : index
    %c0_74 = arith.constant 0 : index
    %30 = vector.load %arg4[%c0_70, %c0_71, %c1_72, %c1_73, %c0_74] : memref<1x1x5x5x64xbf16, #tpu.memory_space<vmem>>, vector<1x1x1x4x64xbf16>
    %31 = vector.shape_cast %30 : vector<1x1x1x4x64xbf16> to vector<4x64xbf16>
    %c0_75 = arith.constant 0 : index
    %c0_76 = arith.constant 0 : index
    %c2 = arith.constant 2 : index
    %c0_77 = arith.constant 0 : index
    %c0_78 = arith.constant 0 : index
    %32 = vector.load %arg2[%c0_75, %c0_76, %c2, %c0_77, %c0_78] : memref<1x1x5x5x64xbf16, #tpu.memory_space<vmem>>, vector<1x1x1x4x64xbf16>
    %33 = vector.shape_cast %32 : vector<1x1x1x4x64xbf16> to vector<4x64xbf16>
    %c0_79 = arith.constant 0 : index
    %c0_80 = arith.constant 0 : index
    %c2_81 = arith.constant 2 : index
    %c0_82 = arith.constant 0 : index
    %c0_83 = arith.constant 0 : index
    %34 = vector.load %arg3[%c0_79, %c0_80, %c2_81, %c0_82, %c0_83] : memref<1x1x5x5x64xbf16, #tpu.memory_space<vmem>>, vector<1x1x1x4x64xbf16>
    %35 = vector.shape_cast %34 : vector<1x1x1x4x64xbf16> to vector<4x64xbf16>
    %c0_84 = arith.constant 0 : index
    %c0_85 = arith.constant 0 : index
    %c2_86 = arith.constant 2 : index
    %c1_87 = arith.constant 1 : index
    %c0_88 = arith.constant 0 : index
    %36 = vector.load %arg2[%c0_84, %c0_85, %c2_86, %c1_87, %c0_88] : memref<1x1x5x5x64xbf16, #tpu.memory_space<vmem>>, vector<1x1x1x4x64xbf16>
    %37 = vector.shape_cast %36 : vector<1x1x1x4x64xbf16> to vector<4x64xbf16>
    %38 = tpu.concatenate %21, %23, %25, %27, %29, %31, %33, %35, %37 in 1 : vector<4x64xbf16>, vector<4x64xbf16>, vector<4x64xbf16>, vector<4x64xbf16>, vector<4x64xbf16>, vector<4x64xbf16>, vector<4x64xbf16>, vector<4x64xbf16>, vector<4x64xbf16> -> vector<4x576xbf16>
    %c4 = arith.constant 4 : index
    %c0_89 = arith.constant 0 : index
    %39 = vector.load %arg10[%c4, %c0_89] : memref<16x576xbf16, #tpu.memory_space<vmem>>, vector<4x576xbf16>
    tpu.vector_store %arg10[%c4, %c0_89], %38 {strides = array<i32>} : memref<16x576xbf16, #tpu.memory_space<vmem>>, vector<4x576xbf16>,
    %c0_90 = arith.constant 0 : index
    %c0_91 = arith.constant 0 : index
    %c2_92 = arith.constant 2 : index
    %c0_93 = arith.constant 0 : index
    %c0_94 = arith.constant 0 : index
    %40 = vector.load %arg2[%c0_90, %c0_91, %c2_92, %c0_93, %c0_94] : memref<1x1x5x5x64xbf16, #tpu.memory_space<vmem>>, vector<1x1x1x4x64xbf16>
    %41 = vector.shape_cast %40 : vector<1x1x1x4x64xbf16> to vector<4x64xbf16>
    %c0_95 = arith.constant 0 : index
    %c0_96 = arith.constant 0 : index
    %c2_97 = arith.constant 2 : index
    %c0_98 = arith.constant 0 : index
    %c0_99 = arith.constant 0 : index
    %42 = vector.load %arg3[%c0_95, %c0_96, %c2_97, %c0_98, %c0_99] : memref<1x1x5x5x64xbf16, #tpu.memory_space<vmem>>, vector<1x1x1x4x64xbf16>
    %43 = vector.shape_cast %42 : vector<1x1x1x4x64xbf16> to vector<4x64xbf16>
    %c0_100 = arith.constant 0 : index
    %c0_101 = arith.constant 0 : index
    %c2_102 = arith.constant 2 : index
    %c1_103 = arith.constant 1 : index
    %c0_104 = arith.constant 0 : index
    %44 = vector.load %arg2[%c0_100, %c0_101, %c2_102, %c1_103, %c0_104] : memref<1x1x5x5x64xbf16, #tpu.memory_space<vmem>>, vector<1x1x1x4x64xbf16>
    %45 = vector.shape_cast %44 : vector<1x1x1x4x64xbf16> to vector<4x64xbf16>
    %c0_105 = arith.constant 0 : index
    %c0_106 = arith.constant 0 : index
    %c2_107 = arith.constant 2 : index
    %c0_108 = arith.constant 0 : index
    %c0_109 = arith.constant 0 : index
    %46 = vector.load %arg4[%c0_105, %c0_106, %c2_107, %c0_108, %c0_109] : memref<1x1x5x5x64xbf16, #tpu.memory_space<vmem>>, vector<1x1x1x4x64xbf16>
    %47 = vector.shape_cast %46 : vector<1x1x1x4x64xbf16> to vector<4x64xbf16>
    %c0_110 = arith.constant 0 : index
    %c0_111 = arith.constant 0 : index
    %c2_112 = arith.constant 2 : index
    %c0_113 = arith.constant 0 : index
    %c0_114 = arith.constant 0 : index
    %48 = vector.load %arg5[%c0_110, %c0_111, %c2_112, %c0_113, %c0_114] : memref<1x1x5x5x64xbf16, #tpu.memory_space<vmem>>, vector<1x1x1x4x64xbf16>
    %49 = vector.shape_cast %48 : vector<1x1x1x4x64xbf16> to vector<4x64xbf16>
    %c0_115 = arith.constant 0 : index
    %c0_116 = arith.constant 0 : index
    %c2_117 = arith.constant 2 : index
    %c1_118 = arith.constant 1 : index
    %c0_119 = arith.constant 0 : index
    %50 = vector.load %arg4[%c0_115, %c0_116, %c2_117, %c1_118, %c0_119] : memref<1x1x5x5x64xbf16, #tpu.memory_space<vmem>>, vector<1x1x1x4x64xbf16>
    %51 = vector.shape_cast %50 : vector<1x1x1x4x64xbf16> to vector<4x64xbf16>
    %c0_120 = arith.constant 0 : index
    %c0_121 = arith.constant 0 : index
    %c3 = arith.constant 3 : index
    %c0_122 = arith.constant 0 : index
    %c0_123 = arith.constant 0 : index
    %52 = vector.load %arg2[%c0_120, %c0_121, %c3, %c0_122, %c0_123] : memref<1x1x5x5x64xbf16, #tpu.memory_space<vmem>>, vector<1x1x1x4x64xbf16>
    %53 = vector.shape_cast %52 : vector<1x1x1x4x64xbf16> to vector<4x64xbf16>
    %c0_124 = arith.constant 0 : index
    %c0_125 = arith.constant 0 : index
    %c3_126 = arith.constant 3 : index
    %c0_127 = arith.constant 0 : index
    %c0_128 = arith.constant 0 : index
    %54 = vector.load %arg3[%c0_124, %c0_125, %c3_126, %c0_127, %c0_128] : memref<1x1x5x5x64xbf16, #tpu.memory_space<vmem>>, vector<1x1x1x4x64xbf16>
    %55 = vector.shape_cast %54 : vector<1x1x1x4x64xbf16> to vector<4x64xbf16>
    %c0_129 = arith.constant 0 : index
    %c0_130 = arith.constant 0 : index
    %c3_131 = arith.constant 3 : index
    %c1_132 = arith.constant 1 : index
    %c0_133 = arith.constant 0 : index
    %56 = vector.load %arg2[%c0_129, %c0_130, %c3_131, %c1_132, %c0_133] : memref<1x1x5x5x64xbf16, #tpu.memory_space<vmem>>, vector<1x1x1x4x64xbf16>
    %57 = vector.shape_cast %56 : vector<1x1x1x4x64xbf16> to vector<4x64xbf16>
    %58 = tpu.concatenate %41, %43, %45, %47, %49, %51, %53, %55, %57 in 1 : vector<4x64xbf16>, vector<4x64xbf16>, vector<4x64xbf16>, vector<4x64xbf16>, vector<4x64xbf16>, vector<4x64xbf16>, vector<4x64xbf16>, vector<4x64xbf16>, vector<4x64xbf16> -> vector<4x576xbf16>
    %c8 = arith.constant 8 : index
    %c0_134 = arith.constant 0 : index
    %59 = vector.load %arg10[%c8, %c0_134] : memref<16x576xbf16, #tpu.memory_space<vmem>>, vector<4x576xbf16>
    tpu.vector_store %arg10[%c8, %c0_134], %58 {strides = array<i32>} : memref<16x576xbf16, #tpu.memory_space<vmem>>, vector<4x576xbf16>,
    %c0_135 = arith.constant 0 : index
    %c0_136 = arith.constant 0 : index
    %c3_137 = arith.constant 3 : index
    %c0_138 = arith.constant 0 : index
    %c0_139 = arith.constant 0 : index
    %60 = vector.load %arg2[%c0_135, %c0_136, %c3_137, %c0_138, %c0_139] : memref<1x1x5x5x64xbf16, #tpu.memory_space<vmem>>, vector<1x1x1x4x64xbf16>
    %61 = vector.shape_cast %60 : vector<1x1x1x4x64xbf16> to vector<4x64xbf16>
    %c0_140 = arith.constant 0 : index
    %c0_141 = arith.constant 0 : index
    %c3_142 = arith.constant 3 : index
    %c0_143 = arith.constant 0 : index
    %c0_144 = arith.constant 0 : index
    %62 = vector.load %arg3[%c0_140, %c0_141, %c3_142, %c0_143, %c0_144] : memref<1x1x5x5x64xbf16, #tpu.memory_space<vmem>>, vector<1x1x1x4x64xbf16>
    %63 = vector.shape_cast %62 : vector<1x1x1x4x64xbf16> to vector<4x64xbf16>
    %c0_145 = arith.constant 0 : index
    %c0_146 = arith.constant 0 : index
    %c3_147 = arith.constant 3 : index
    %c1_148 = arith.constant 1 : index
    %c0_149 = arith.constant 0 : index
    %64 = vector.load %arg2[%c0_145, %c0_146, %c3_147, %c1_148, %c0_149] : memref<1x1x5x5x64xbf16, #tpu.memory_space<vmem>>, vector<1x1x1x4x64xbf16>
    %65 = vector.shape_cast %64 : vector<1x1x1x4x64xbf16> to vector<4x64xbf16>
    %c0_150 = arith.constant 0 : index
    %c0_151 = arith.constant 0 : index
    %c3_152 = arith.constant 3 : index
    %c0_153 = arith.constant 0 : index
    %c0_154 = arith.constant 0 : index
    %66 = vector.load %arg4[%c0_150, %c0_151, %c3_152, %c0_153, %c0_154] : memref<1x1x5x5x64xbf16, #tpu.memory_space<vmem>>, vector<1x1x1x4x64xbf16>
    %67 = vector.shape_cast %66 : vector<1x1x1x4x64xbf16> to vector<4x64xbf16>
    %c0_155 = arith.constant 0 : index
    %c0_156 = arith.constant 0 : index
    %c3_157 = arith.constant 3 : index
    %c0_158 = arith.constant 0 : index
    %c0_159 = arith.constant 0 : index
    %68 = vector.load %arg5[%c0_155, %c0_156, %c3_157, %c0_158, %c0_159] : memref<1x1x5x5x64xbf16, #tpu.memory_space<vmem>>, vector<1x1x1x4x64xbf16>
    %69 = vector.shape_cast %68 : vector<1x1x1x4x64xbf16> to vector<4x64xbf16>
    %c0_160 = arith.constant 0 : index
    %c0_161 = arith.constant 0 : index
    %c3_162 = arith.constant 3 : index
    %c1_163 = arith.constant 1 : index
    %c0_164 = arith.constant 0 : index
    %70 = vector.load %arg4[%c0_160, %c0_161, %c3_162, %c1_163, %c0_164] : memref<1x1x5x5x64xbf16, #tpu.memory_space<vmem>>, vector<1x1x1x4x64xbf16>
    %71 = vector.shape_cast %70 : vector<1x1x1x4x64xbf16> to vector<4x64xbf16>
    %c0_165 = arith.constant 0 : index
    %c0_166 = arith.constant 0 : index
    %c4_167 = arith.constant 4 : index
    %c0_168 = arith.constant 0 : index
    %c0_169 = arith.constant 0 : index
    %72 = vector.load %arg2[%c0_165, %c0_166, %c4_167, %c0_168, %c0_169] : memref<1x1x5x5x64xbf16, #tpu.memory_space<vmem>>, vector<1x1x1x4x64xbf16>
    %73 = vector.shape_cast %72 : vector<1x1x1x4x64xbf16> to vector<4x64xbf16>
    %c0_170 = arith.constant 0 : index
    %c0_171 = arith.constant 0 : index
    %c4_172 = arith.constant 4 : index
    %c0_173 = arith.constant 0 : index
    %c0_174 = arith.constant 0 : index
    %74 = vector.load %arg3[%c0_170, %c0_171, %c4_172, %c0_173, %c0_174] : memref<1x1x5x5x64xbf16, #tpu.memory_space<vmem>>, vector<1x1x1x4x64xbf16>
    %75 = vector.shape_cast %74 : vector<1x1x1x4x64xbf16> to vector<4x64xbf16>
    %c0_175 = arith.constant 0 : index
    %c0_176 = arith.constant 0 : index
    %c4_177 = arith.constant 4 : index
    %c1_178 = arith.constant 1 : index
    %c0_179 = arith.constant 0 : index
    %76 = vector.load %arg2[%c0_175, %c0_176, %c4_177, %c1_178, %c0_179] : memref<1x1x5x5x64xbf16, #tpu.memory_space<vmem>>, vector<1x1x1x4x64xbf16>
    %77 = vector.shape_cast %76 : vector<1x1x1x4x64xbf16> to vector<4x64xbf16>
    %78 = tpu.concatenate %61, %63, %65, %67, %69, %71, %73, %75, %77 in 1 : vector<4x64xbf16>, vector<4x64xbf16>, vector<4x64xbf16>, vector<4x64xbf16>, vector<4x64xbf16>, vector<4x64xbf16>, vector<4x64xbf16>, vector<4x64xbf16>, vector<4x64xbf16> -> vector<4x576xbf16>
    %c12 = arith.constant 12 : index
    %c0_180 = arith.constant 0 : index
    %79 = vector.load %arg10[%c12, %c0_180] : memref<16x576xbf16, #tpu.memory_space<vmem>>, vector<4x576xbf16>
    tpu.vector_store %arg10[%c12, %c0_180], %78 {strides = array<i32>} : memref<16x576xbf16, #tpu.memory_space<vmem>>, vector<4x576xbf16>,
    %c0_181 = arith.constant 0 : index
    %c0_182 = arith.constant 0 : index
    %80 = vector.load %arg10[%c0_181, %c0_182] : memref<16x576xbf16, #tpu.memory_space<vmem>>, vector<16x576xbf16>
    %c0_183 = arith.constant 0 : index
    %c0_184 = arith.constant 0 : index
    %81 = vector.load %arg6[%c0_183, %c0_184] : memref<576x64xbf16, #tpu.memory_space<vmem>>, vector<576x64xbf16>
    %cst = arith.constant dense<0.000000e+00> : vector<16x64xf32>
    %82 = tpu.matmul %80, %81, %cst {dimension_numbers = #tpu.dot_dimension_numbers<[1], [0], [0], [1], [0, 0, 1, 1], [], []>} : vector<16x576xbf16>, vector<576x64xbf16>, vector<16x64xf32> -> vector<16x64xf32>
    %c0_185 = arith.constant 0 : index
    %c0_186 = arith.constant 0 : index
    %83 = vector.load %arg7[%c0_185, %c0_186] : memref<1x64xf32, #tpu.memory_space<vmem>>, vector<1x64xf32>
    %84 = vector.broadcast %83 : vector<1x64xf32> to vector<16x64xf32>
    %85 = arith.mulf %82, %84 : vector<16x64xf32>
    %c0_187 = arith.constant 0 : index
    %c0_188 = arith.constant 0 : index
    %86 = vector.load %arg8[%c0_187, %c0_188] : memref<1x64xf32, #tpu.memory_space<vmem>>, vector<1x64xf32>
    %87 = vector.broadcast %86 : vector<1x64xf32> to vector<16x64xf32>
    %88 = arith.addf %85, %87 : vector<16x64xf32>
    %cst_189 = arith.constant 0.000000e+00 : f32
    %89 = vector.broadcast %cst_189 : f32 to vector<16x64xf32>
    %90 = arith.maximumf %88, %89 : vector<16x64xf32>
    %c0_190 = arith.constant 0 : index
    %c0_191 = arith.constant 0 : index
    %c0_192 = arith.constant 0 : index
    %91 = vector.load %arg9[%c0_190, %c0_191, %c0_192] : memref<1x16x64xf32, #tpu.memory_space<vmem>>, vector<1x16x64xf32>
    %92 = vector.shape_cast %91 : vector<1x16x64xf32> to vector<16x64xf32>
    %93 = vector.shape_cast %90 : vector<16x64xf32> to vector<1x16x64xf32>
    tpu.vector_store %arg9[%c0_190, %c0_191, %c0_192], %93 {strides = array<i32>} : memref<1x16x64xf32, #tpu.memory_space<vmem>>, vector<1x16x64xf32>,
    return
  }
  func.func @transform_0(%arg0: i32, %arg1: i32) -> (i32, i32, i32, i32, i32) {
    %c0_i32 = arith.constant 0 : i32
    %c0_i32_0 = arith.constant 0 : i32
    %c0_i32_1 = arith.constant 0 : i32
    %c0_i32_2 = arith.constant 0 : i32
    return %arg0, %arg1, %c0_i32, %c0_i32_0, %c0_i32_1 : i32, i32, i32, i32, i32
  }
  func.func @transform_1(%arg0: i32, %arg1: i32) -> (i32, i32, i32, i32, i32) {
    %c0_i32 = arith.constant 0 : i32
    %c0_i32_0 = arith.constant 0 : i32
    %c0_i32_1 = arith.constant 0 : i32
    %c0_i32_2 = arith.constant 0 : i32
    return %arg0, %arg1, %c0_i32, %c0_i32_0, %c0_i32_1 : i32, i32, i32, i32, i32
  }
  func.func @transform_2(%arg0: i32, %arg1: i32) -> (i32, i32, i32, i32, i32) {
    %c0_i32 = arith.constant 0 : i32
    %c0_i32_0 = arith.constant 0 : i32
    %c0_i32_1 = arith.constant 0 : i32
    %c0_i32_2 = arith.constant 0 : i32
    return %arg0, %arg1, %c0_i32, %c0_i32_0, %c0_i32_1 : i32, i32, i32, i32, i32
  }
  func.func @transform_3(%arg0: i32, %arg1: i32) -> (i32, i32, i32, i32, i32) {
    %c0_i32 = arith.constant 0 : i32
    %c0_i32_0 = arith.constant 0 : i32
    %c0_i32_1 = arith.constant 0 : i32
    %c0_i32_2 = arith.constant 0 : i32
    return %arg0, %arg1, %c0_i32, %c0_i32_0, %c0_i32_1 : i32, i32, i32, i32, i32
  }
  func.func @transform_4(%arg0: i32, %arg1: i32) -> (i32, i32) {
    %c0_i32 = arith.constant 0 : i32
    %c0_i32_0 = arith.constant 0 : i32
    %c0_i32_1 = arith.constant 0 : i32
    return %c0_i32, %c0_i32_0 : i32, i32
  }
  func.func @transform_5(%arg0: i32, %arg1: i32) -> (i32, i32) {
    %c0_i32 = arith.constant 0 : i32
    %c0_i32_0 = arith.constant 0 : i32
    %c0_i32_1 = arith.constant 0 : i32
    return %c0_i32, %c0_i32_0 : i32, i32
  }
  func.func @transform_6(%arg0: i32, %arg1: i32) -> (i32, i32) {
    %c0_i32 = arith.constant 0 : i32
    %c0_i32_0 = arith.constant 0 : i32
    %c0_i32_1 = arith.constant 0 : i32
    return %c0_i32, %c0_i32_0 : i32, i32
  }
  func.func @transform_7(%arg0: i32, %arg1: i32) -> (i32, i32, i32) {
    %c0_i32 = arith.constant 0 : i32
    %c0_i32_0 = arith.constant 0 : i32
    return %arg0, %arg1, %c0_i32 : i32, i32, i32
  }
}

</mosaic_0001>

<bundles_post_ra>
// kernel: ccf_forward.3
= control target key start
LH: loop header
LB: loop body
LE: loop exit
PB: predicated region body
PF: predicated region fallthrough
CT: control target
= control target key end

     0   :  { %vm128_vm0 = vcmask 1044480   ;;  %vm129_vm1 = vcmask 1045504   ;;  %v973_v2 = vmov 65535   ;;  %vm384_vm2 = vcmask 1041408   ;;  %s1358_s2 = inlined_call_operand.vmem [shape: bf16[27,64], index: 2, kind: input, shape index: {}]   ;;  %s1359_s5 = inlined_call_operand.vmem [shape: bf16[36,144], index: 5, kind: input, shape index: {}]   ;;  %s1360_s3 = inlined_call_operand.vmem [shape: f32[1,64], index: 3, kind: input, shape index: {}]   ;;  %s1361_s0 = inlined_call_operand.vmem [shape: bf16[128,27], index: 0, kind: input, shape index: {}]   ;;  %s1362_s4 = inlined_call_operand.vmem [shape: f32[1,64], index: 4, kind: input, shape index: {}]   ;;  %s1363_s1 = inlined_call_operand.vmem [shape: bf16[128,36], index: 1, kind: input, shape index: {}]   ;;  %s1364_s6 = inlined_call_operand.vmem [shape: bf16[144,64], index: 6, kind: input, shape index: {}]   ;;  %s1365_s8 = inlined_call_operand.vmem [shape: bf16[128,64], index: 8, kind: output, shape index: {0}]   ;;  %s1366_s7 = inlined_call_operand.vmem [shape: f32[1,64], index: 7, kind: input, shape index: {}]   ;;  %s1367_s9 = inlined_call_operand.vmem [shape: bf16[128,64], index: 9, kind: output, shape index: {1}]  }
   0x1   :  { %v814_v0 = vld [vmem:[%s1358_s2 + $0x8] sm:$0xf]  ;;  %v941_v1 = vld [vmem:[%s1358_s2 + $0x8] sm:$0x30]  ;;  %v130_v3 = vsel %vm128_vm0, 4294967295, %v973_v2  ;;  %v940_v12 = vld [vmem:[%s1358_s2] sm:$0xff] }
   0x2   :  { %v815_v4 = vor.u32 %v941_v1, %v814_v0  ;;  %v131_v5 = vsel %vm129_vm1, %v130_v3, 0  ;;  %v293_v6 = vld [vmem:[%s1359_s5 + $0x20] sm:$0x33]  ;;  %v866_v13 = vld [vmem:[%s1359_s5 + $0x10] sm:$0xf]  ;;  %vm103_vm3 = vcmask 220160  }
   0x3   :  { %v347_v7 = vunpack.c.l.b16 %v293_v6  ;;  %v348_v8 = vunpack.c.h.b16 %v293_v6  ;;  %v953_v14 = vld [vmem:[%s1359_s5 + $0x14] sm:$0xf0]  ;;  %v952_v17 = vld [vmem:[%s1359_s5 + $0x14] sm:$0xf]  ;;  %v868_v18 = vld [vmem:[%s1359_s5 + $0x18] sm:$0xf0] }
   0x4   :  { %v133_v9 = vand.u32 %v815_v4, %v131_v5  ;;  %v934_v19 = vld [vmem:[%s1361_s0 + $0x10] sm:$0xff]  ;;  %v936_v20 = vld [vmem:[%s1361_s0 + $0x20] sm:$0xff]  ;;  %v867_v21 = vor.u32 %v953_v14, %v866_v13  ;;  %v871_v22 = vor.u32 %v952_v17, %v868_v18  ;;  %v951_v24 = vld [vmem:[%s1359_s5 + $0x4] sm:$0xf0]  ;;  %vm359_vm4 = vcmask 293888  }
   0x5   :  { %v353_v10 = vpack.c.b16 %v347_v7, %v347_v7  ;;  %v354_v11 = vpack.c.b16 %v348_v8, %v348_v8  ;;  %v858_v23 = vld [vmem:[%s1359_s5] sm:$0xf]  ;;  %v950_v25 = vld [vmem:[%s1359_s5 + $0x4] sm:$0xf]  ;;  %v860_v26 = vld [vmem:[%s1359_s5 + $0x8] sm:$0xf0] }
   0x6   :  { %963 = vmatpush.bf16.msra.mxu1 %v133_v9  ;;  %964 = vmatpush.bf16.msra.mxu2 %v133_v9  ;;  %v859_v27 = vor.u32 %v951_v24, %v858_v23  ;;  %v863_v28 = vor.u32 %v950_v25, %v860_v26  ;;  %v935_v29 = vld [vmem:[%s1361_s0 + $0x18] sm:$0xff]  ;;  %v937_v30 = vld [vmem:[%s1361_s0 + $0x28] sm:$0xff]  ;;  %v942_v31 = vld [vmem:[%s1363_s1] sm:$0xff]  ;;  %vm256_vm5 = vcmask 519168   ;;  %vm613_vm6 = vcmask 130048  }
   0x7   :  { %965 = vmatpush.bf16.msra.mxu3 %v133_v9  ;;  %141 = vmatpush.bf16.msra.mxu0 %v133_v9  ;;  %v386_v15 = vsel %vm384_vm2, %v353_v10, 0  ;;  %v389_v16 = vsel %vm384_vm2, %v354_v11, 0  ;;  %v943_v32 = vld [vmem:[%s1363_s1 + $0x8] sm:$0xff]  ;;  %v944_v33 = vld [vmem:[%s1363_s1 + $0x10] sm:$0xff]  ;;  %v945_v34 = vld [vmem:[%s1363_s1 + $0x18] sm:$0xff] }
   0x8   :  { %v946_v35 = vld [vmem:[%s1363_s1 + $0x20] sm:$0xff]  ;;  %v938_v36 = vld [vmem:[%s1361_s0 + $0x30] sm:$0xff]  ;;  %v961_v38 = vld [vmem:[%s1364_s6 + $0x38] sm:$0xff] }
   0x9   :  { %v932_v37 = vld [vmem:[%s1361_s0] sm:$0xff]  ;;  %v947_v39 = vld [vmem:[%s1363_s1 + $0x28] sm:$0xff]  ;;  %v960_v40 = vld [vmem:[%s1364_s6 + $0x30] sm:$0xff] }
   0xa   :  { %966 = vmatpush.bf16.msra.mxu1 %v940_v12  ;;  %967 = vmatpush.bf16.msra.mxu2 %v940_v12  ;;  %v939_v41 = vld [vmem:[%s1361_s0 + $0x38] sm:$0xff]  ;;  %v959_v42 = vld [vmem:[%s1364_s6 + $0x28] sm:$0xff]  ;;  %v958_v43 = vld [vmem:[%s1364_s6 + $0x20] sm:$0xff] }
   0xb   :  { %968 = vmatpush.bf16.msra.mxu3 %v940_v12  ;;  %142 = vmatpush.bf16.msra.mxu0 %v940_v12  ;;  %v962_v44 = vld [vmem:[%s1364_s6 + $0x40] sm:$0xff]  ;;  %v933_v45 = vld [vmem:[%s1361_s0 + $0x8] sm:$0xff]  ;;  %v957_v46 = vld [vmem:[%s1364_s6 + $0x18] sm:$0xff] }
   0xc   :  { %v1142_v47 = vld [vmem:[%s1360_s3] ss:$0 sm:$0xff]  ;;  %v948_v49 = vld [vmem:[%s1363_s1 + $0x30] sm:$0xff]  ;;  %v955_v54 = vld [vmem:[%s1364_s6 + $0x8] sm:$0xff] }
   0xd   :  { %818 = vmatmul.msk.bf16.vlgmr.msra.gmra.mxu1 %vm103_vm3, %v934_v19  ;;  %820 = vmatmul.msk.bf16.vlgmr.msra.gmra.mxu2 %vm103_vm3, %v936_v20  ;;  %v1148_v48 = vld [vmem:[%s1362_s4] ss:$0 sm:$0xff]  ;;  %v956_v51 = vld [vmem:[%s1364_s6 + $0x10] sm:$0xff]  ;;  %v949_v6 = vld [vmem:[%s1363_s1 + $0x38] sm:$0xff] }
   0xe   :  { %396 = vmatpush.bf16.msrb.mxu1 %v386_v15  ;;  %445 = vmatpush.bf16.msrb.mxu2 %v389_v16  ;;  %v954_v60 = vld [vmem:[%s1364_s6] sm:$0xff] }
   0xf   :  { %822 = vmatmul.msk.bf16.vlgmr.msra.gmra.mxu3 %vm103_vm3, %v938_v36  ;;  %816 = vmatmul.msk.bf16.vlgmr.msra.gmra.mxu0 %vm103_vm3, %v932_v37 }
  0x10   :  { %638 = vmatpush.bf16.msrb.mxu3 %v961_v38  ;;  %694 = vmatpush.bf16.msrb.mxu0 %v962_v44 }
  0x12   :  { %397 = vmatpush.bf16.msrb.mxu1 %v867_v21  ;;  %446 = vmatpush.bf16.msrb.mxu2 %v871_v22 }
  0x14   :  { %639 = vmatpush.bf16.msrb.mxu3 %v960_v40 }
  0x16   :  { %398 = vmatpush.bf16.msrb.mxu1 %v859_v27  ;;  %447 = vmatpush.bf16.msrb.mxu2 %v863_v28 }
  0x18   :  { %640 = vmatpush.bf16.msrb.mxu3 %v959_v42 }
  0x1c   :  { %641 = vmatpush.bf16.msrb.mxu3 %v958_v43 }
  0x1d   :  { %819 = vmatmul.msk.bf16.gmra.mxu1 %vm103_vm3, %v935_v29  ;;  %821 = vmatmul.msk.bf16.gmra.mxu2 %vm103_vm3, %v937_v30 }
  0x1f   :  { %823 = vmatmul.msk.bf16.gmra.mxu3 %vm103_vm3, %v939_v41  ;;  %817 = vmatmul.msk.bf16.gmra.mxu0 %vm103_vm3, %v933_v45 }
  0x20   :  { %642 = vmatpush.bf16.msrb.mxu3 %v957_v46 }
  0x24   :  { %643 = vmatpush.bf16.msrb.mxu3 %v956_v51 }
  0x28   :  { %644 = vmatpush.bf16.msrb.mxu3 %v955_v54 }
  0x2c   :  { %645 = vmatpush.bf16.msrb.mxu3 %v954_v60 }
  0x2d   :  { %872 = vmatmul.msk.bf16.vlgmr.msrb.gmra.mxu1 %vm359_vm4, %v942_v31  ;;  %880 = vmatmul.msk.bf16.vlgmr.msrb.gmra.mxu2 %vm359_vm4, %v942_v31 }
  0x3d   :  { %873 = vmatmul.msk.bf16.gmra.mxu1 %vm359_vm4, %v943_v32  ;;  %881 = vmatmul.msk.bf16.gmra.mxu2 %vm359_vm4, %v943_v32 }
  0x4d   :  { %874 = vmatmul.msk.bf16.gmra.mxu1 %vm359_vm4, %v944_v33  ;;  %882 = vmatmul.msk.bf16.gmra.mxu2 %vm359_vm4, %v944_v33 }
  0x5d   :  { %875 = vmatmul.msk.bf16.gmra.mxu1 %vm359_vm4, %v945_v34  ;;  %883 = vmatmul.msk.bf16.gmra.mxu2 %vm359_vm4, %v945_v34 }
  0x6d   :  { %876 = vmatmul.msk.bf16.gmra.mxu1 %vm359_vm4, %v946_v35  ;;  %884 = vmatmul.msk.bf16.gmra.mxu2 %vm359_vm4, %v946_v35 }
  0x7d   :  { %877 = vmatmul.msk.bf16.gmra.mxu1 %vm359_vm4, %v947_v39  ;;  %885 = vmatmul.msk.bf16.gmra.mxu2 %vm359_vm4, %v947_v39 }
  0x8a   :  { %v154_v50 = vpop.f32.mrf.mxu1 }
  0x8b   :  { %v192_v52 = vmul.f32 %v1142_v47, %v154_v50 }
  0x8d   :  { %v212_v53 = vadd.f32 %v1148_v48, %v192_v52  ;;  %878 = vmatmul.msk.bf16.gmra.mxu1 %vm359_vm4, %v948_v49  ;;  %886 = vmatmul.msk.bf16.gmra.mxu2 %vm359_vm4, %v948_v49 }
  0x8f   :  { %v228_v55 = vmax.f32 %v212_v53, 0.0 }
  0x90   :  { %v164_v56 = vpop.f32.mrf.mxu2 }
  0x91   :  { %v244_v57 = vpack.c.bf16 %v228_v55, %v228_v55  ;;  %v196_v58 = vmul.f32 %v1142_v47, %v164_v56 }
  0x92   :  { %v156_v59 = vpop.f32.mrf.mxu1 }
  0x93   :  { %261 = vst.msk [vmem:[%s1365_s8 + $0x10] sm:$0xf] %vm256_vm5, %v244_v57  ;;  %v216_v61 = vadd.f32 %v1148_v48, %v196_v58  ;;  %v193_v62 = vmul.f32 %v1142_v47, %v156_v59 }
  0x95   :  { %v232_v63 = vmax.f32 %v216_v61, 0.0  ;;  %v213_v0 = vadd.f32 %v1148_v48, %v193_v62 }
  0x97   :  { %v248_v1 = vpack.c.bf16 %v232_v63, %v232_v63  ;;  %v229_v2 = vmax.f32 %v213_v0, 0.0 }
  0x98   :  { %v166_v3 = vpop.f32.mrf.mxu2 }
  0x99   :  { %265 = vst.msk [vmem:[%s1365_s8 + $0x20] sm:$0xf] %vm256_vm5, %v248_v1  ;;  %v245_v4 = vpack.c.bf16 %v229_v2, %v229_v2  ;;  %v197_v5 = vmul.f32 %v1142_v47, %v166_v3 }
  0x9a   :  { %v159_v7 = vpop.f32.mrf.mxu1 }
  0x9b   :  { %262 = vst.msk [vmem:[%s1365_s8 + $0x14] sm:$0xf] %vm256_vm5, %v245_v4  ;;  %v217_v8 = vadd.f32 %v1148_v48, %v197_v5  ;;  %v194_v9 = vmul.f32 %v1142_v47, %v159_v7 }
  0x9d   :  { %v233_v10 = vmax.f32 %v217_v8, 0.0  ;;  %v214_v11 = vadd.f32 %v1148_v48, %v194_v9  ;;  %879 = vmatmul.msk.bf16.gmra.mxu1 %vm359_vm4, %v949_v6  ;;  %887 = vmatmul.msk.bf16.gmra.mxu2 %vm359_vm4, %v949_v6 }
  0x9f   :  { %v249_v12 = vpack.c.bf16 %v233_v10, %v233_v10  ;;  %v230_v13 = vmax.f32 %v214_v11, 0.0  ;;  %v174_v11 = vpop.f32.mrf.mxu3 }
  0xa0   :  { %v169_v14 = vpop.f32.mrf.mxu2 }
  0xa1   :  { %266 = vst.msk [vmem:[%s1365_s8 + $0x24] sm:$0xf] %vm256_vm5, %v249_v12  ;;  %v246_v15 = vpack.c.bf16 %v230_v13, %v230_v13  ;;  %v198_v16 = vmul.f32 %v1142_v47, %v169_v14  ;;  %v200_v14 = vmul.f32 %v1142_v47, %v174_v11 }
  0xa2   :  { %v161_v17 = vpop.f32.mrf.mxu1 }
  0xa3   :  { %263 = vst.msk [vmem:[%s1365_s8 + $0x18] sm:$0xf] %vm256_vm5, %v246_v15  ;;  %v218_v18 = vadd.f32 %v1148_v48, %v198_v16  ;;  %v195_v19 = vmul.f32 %v1142_v47, %v161_v17  ;;  %v144_v15 = vpop.f32.mrf.mxu0  ;;  %v220_v17 = vadd.f32 %v1148_v48, %v200_v14 }
  0xa5   :  { %v234_v20 = vmax.f32 %v218_v18, 0.0  ;;  %v215_v21 = vadd.f32 %v1148_v48, %v195_v19  ;;  %v188_v18 = vmul.f32 %v1142_v47, %v144_v15  ;;  %v236_v19 = vmax.f32 %v220_v17, 0.0 }
  0xa7   :  { %v250_v22 = vpack.c.bf16 %v234_v20, %v234_v20  ;;  %v231_v23 = vmax.f32 %v215_v21, 0.0  ;;  %v208_v20 = vadd.f32 %v1148_v48, %v188_v18 }
  0xa8   :  { %v171_v24 = vpop.f32.mrf.mxu2 }
  0xa9   :  { %267 = vst.msk [vmem:[%s1365_s8 + $0x28] sm:$0xf] %vm256_vm5, %v250_v22  ;;  %v247_v25 = vpack.c.bf16 %v231_v23, %v231_v23  ;;  %v199_v26 = vmul.f32 %v1142_v47, %v171_v24  ;;  %v252_v24 = vpack.c.bf16 %v236_v19, %v236_v19 }
  0xaa   :  { %v400_v27 = vpop.f32.mrf.mxu1 }
  0xab   :  { %264 = vst.msk [vmem:[%s1365_s8 + $0x1c] sm:$0xf] %vm256_vm5, %v247_v25  ;;  %v219_v28 = vadd.f32 %v1148_v48, %v199_v26  ;;  %v489_v33 = vmax.f32 %v400_v27, 0.0  ;;  %v224_v25 = vmax.f32 %v208_v20, 0.0  ;;  %v176_v27 = vpop.f32.mrf.mxu3 }
  0xac   :  { %269 = vst.msk [vmem:[%s1365_s8 + $0x30] sm:$0xf] %vm256_vm5, %v252_v24  ;;  %v1276_v24 = vld [vmem:[%s1366_s7] ss:$0 sm:$0xff] }
  0xad   :  { %v235_v29 = vmax.f32 %v219_v28, 0.0 }
  0xaf   :  { %v251_v30 = vpack.c.bf16 %v235_v29, %v235_v29  ;;  %v240_v29 = vpack.c.bf16 %v224_v25, %v224_v25 }
  0xb0   :  { %v449_v31 = vpop.f32.mrf.mxu2 }
  0xb1   :  { %268 = vst.msk [vmem:[%s1365_s8 + $0x2c] sm:$0xf] %vm256_vm5, %v251_v30  ;;  %v490_v37 = vmax.f32 %v449_v31, 0.0  ;;  %v201_v30 = vmul.f32 %v1142_v47, %v176_v27  ;;  %v146_v31 = vpop.f32.mrf.mxu0 }
  0xb2   :  { %v402_v32 = vpop.f32.mrf.mxu1  ;;  %257 = vst.msk [vmem:[%s1365_s8] sm:$0xf] %vm256_vm5, %v240_v29 }
  0xb3   :  { %v491_v34 = vmax.f32 %v402_v32, 0.0  ;;  %v221_v32 = vadd.f32 %v1148_v48, %v201_v30 }
  0xb5   :  { %v521_v35 = vpack.c.bf16 %v491_v34, %v489_v33  ;;  %v189_v33 = vmul.f32 %v1142_v47, %v146_v31  ;;  %v237_v34 = vmax.f32 %v221_v32, 0.0 }
  0xb7   :  { %646 = vmatmul.bf16.vlgmr.msrb.gmra.mxu3 %v521_v35  ;;  %v209_v35 = vadd.f32 %v1148_v48, %v189_v33 }
  0xb8   :  { %v451_v36 = vpop.f32.mrf.mxu2 }
  0xb9   :  { %v492_v38 = vmax.f32 %v451_v36, 0.0 }
  0xba   :  { %v405_v39 = vpop.f32.mrf.mxu1 }
  0xbb   :  { %v522_v40 = vpack.c.bf16 %v492_v38, %v490_v37  ;;  %v493_v43 = vmax.f32 %v405_v39, 0.0  ;;  %v253_v37 = vpack.c.bf16 %v237_v34, %v237_v34  ;;  %v225_v38 = vmax.f32 %v209_v35, 0.0 }
  0xbd   :  { %924 = vmatmul.msk.bf16.vlgmr.msrb.gmra.mxu0 %vm613_vm6, %v522_v40  ;;  %v179_v40 = vpop.f32.mrf.mxu3  ;;  %270 = vst.msk [vmem:[%s1365_s8 + $0x34] sm:$0xf] %vm256_vm5, %v253_v37 }
  0xc0   :  { %v454_v41 = vpop.f32.mrf.mxu2 }
  0xc1   :  { %v494_v49 = vmax.f32 %v454_v41, 0.0 }
  0xc2   :  { %v407_v42 = vpop.f32.mrf.mxu1 }
  0xc3   :  { %v495_v44 = vmax.f32 %v407_v42, 0.0 }
  0xc5   :  { %v523_v45 = vpack.c.bf16 %v495_v44, %v493_v43  ;;  %v241_v43 = vpack.c.bf16 %v225_v38, %v225_v38  ;;  %v202_v44 = vmul.f32 %v1142_v47, %v179_v40 }
  0xc7   :  { %651 = vmatmul.bf16.gmra.mxu3 %v523_v45  ;;  %v149_v45 = vpop.f32.mrf.mxu0  ;;  %258 = vst.msk [vmem:[%s1365_s8 + $0x4] sm:$0xf] %vm256_vm5, %v241_v43 }
  0xc8   :  { %v456_v46 = vpop.f32.mrf.mxu2 }
  0xc9   :  { %v496_v50 = vmax.f32 %v456_v46, 0.0 }
  0xca   :  { %v410_v51 = vpop.f32.mrf.mxu1 }
  0xcb   :  { %v524_v52 = vpack.c.bf16 %v496_v50, %v494_v49  ;;  %v497_v55 = vmax.f32 %v410_v51, 0.0  ;;  %v222_v49 = vadd.f32 %v1148_v48, %v202_v44  ;;  %v190_v50 = vmul.f32 %v1142_v47, %v149_v45 }
  0xcd   :  { %925 = vmatmul.msk.bf16.gmra.mxu0 %vm613_vm6, %v524_v52  ;;  %v238_v51 = vmax.f32 %v222_v49, 0.0  ;;  %v210_v52 = vadd.f32 %v1148_v48, %v190_v50 }
  0xd0   :  { %v459_v53 = vpop.f32.mrf.mxu2 }
  0xd1   :  { %v498_v59 = vmax.f32 %v459_v53, 0.0 }
  0xd2   :  { %v412_v54 = vpop.f32.mrf.mxu1 }
  0xd3   :  { %v499_v56 = vmax.f32 %v412_v54, 0.0 }
  0xd5   :  { %v525_v57 = vpack.c.bf16 %v499_v56, %v497_v55  ;;  %v254_v56 = vpack.c.bf16 %v238_v51, %v238_v51 }
  0xd7   :  { %656 = vmatmul.bf16.gmra.mxu3 %v525_v57  ;;  %v226_v57 = vmax.f32 %v210_v52, 0.0  ;;  %271 = vst.msk [vmem:[%s1365_s8 + $0x38] sm:$0xf] %vm256_vm5, %v254_v56 }
  0xd8   :  { %v461_v58 = vpop.f32.mrf.mxu2 }
  0xd9   :  { %v500_v60 = vmax.f32 %v461_v58, 0.0 }
  0xda   :  { %v415_v61 = vpop.f32.mrf.mxu1 }
  0xdb   :  { %v526_v62 = vpack.c.bf16 %v500_v60, %v498_v59  ;;  %v501_v1 = vmax.f32 %v415_v61, 0.0  ;;  %v181_v59 = vpop.f32.mrf.mxu3  ;;  %v242_v61 = vpack.c.bf16 %v226_v57, %v226_v57 }
  0xdd   :  { %926 = vmatmul.msk.bf16.gmra.mxu0 %vm613_vm6, %v526_v62  ;;  %v203_v62 = vmul.f32 %v1142_v47, %v181_v59  ;;  %259 = vst.msk [vmem:[%s1365_s8 + $0x8] sm:$0xf] %vm256_vm5, %v242_v61 }
  0xe0   :  { %v464_v63 = vpop.f32.mrf.mxu2 }
  0xe1   :  { %v502_v5 = vmax.f32 %v464_v63, 0.0  ;;  %v151_v63 = vpop.f32.mrf.mxu0 }
  0xe2   :  { %v417_v0 = vpop.f32.mrf.mxu1 }
  0xe3   :  { %v503_v2 = vmax.f32 %v417_v0, 0.0  ;;  %v223_v0 = vadd.f32 %v1148_v48, %v203_v62 }
  0xe5   :  { %v527_v3 = vpack.c.bf16 %v503_v2, %v501_v1  ;;  %v191_v1 = vmul.f32 %v1142_v47, %v151_v63  ;;  %v239_v2 = vmax.f32 %v223_v0, 0.0 }
  0xe7   :  { %661 = vmatmul.bf16.gmra.mxu3 %v527_v3  ;;  %v211_v3 = vadd.f32 %v1148_v48, %v191_v1 }
  0xe8   :  { %v466_v4 = vpop.f32.mrf.mxu2 }
  0xe9   :  { %v504_v6 = vmax.f32 %v466_v4, 0.0 }
  0xea   :  { %v420_v7 = vpop.f32.mrf.mxu1 }
  0xeb   :  { %v528_v8 = vpack.c.bf16 %v504_v6, %v502_v5  ;;  %v505_v12 = vmax.f32 %v420_v7, 0.0  ;;  %v255_v5 = vpack.c.bf16 %v239_v2, %v239_v2  ;;  %v227_v6 = vmax.f32 %v211_v3, 0.0 }
  0xed   :  { %927 = vmatmul.msk.bf16.gmra.mxu0 %vm613_vm6, %v528_v8  ;;  %272 = vst.msk [vmem:[%s1365_s8 + $0x3c] sm:$0xf] %vm256_vm5, %v255_v5 }
  0xf0   :  { %v469_v9 = vpop.f32.mrf.mxu2 }
  0xf1   :  { %v506_v22 = vmax.f32 %v469_v9, 0.0 }
  0xf2   :  { %v422_v10 = vpop.f32.mrf.mxu1 }
  0xf3   :  { %v507_v13 = vmax.f32 %v422_v10, 0.0  ;;  %v243_v10 = vpack.c.bf16 %v227_v6, %v227_v6 }
  0xf5   :  { %v529_v16 = vpack.c.bf16 %v507_v13, %v505_v12  ;;  %260 = vst.msk [vmem:[%s1365_s8 + $0xc] sm:$0xf] %vm256_vm5, %v243_v10 }
  0xf7   :  { %666 = vmatmul.bf16.gmra.mxu3 %v529_v16 }
  0xf8   :  { %v471_v21 = vpop.f32.mrf.mxu2 }
  0xf9   :  { %v508_v23 = vmax.f32 %v471_v21, 0.0 }
  0xfa   :  { %v425_v26 = vpop.f32.mrf.mxu1 }
  0xfb   :  { %v530_v28 = vpack.c.bf16 %v508_v23, %v506_v22  ;;  %v509_v41 = vmax.f32 %v425_v26, 0.0 }
  0xfd   :  { %928 = vmatmul.msk.bf16.gmra.mxu0 %vm613_vm6, %v530_v28 }
 0x100   :  { %v474_v36 = vpop.f32.mrf.mxu2 }
 0x101   :  { %v510_v54 = vmax.f32 %v474_v36, 0.0 }
 0x102   :  { %v427_v39 = vpop.f32.mrf.mxu1 }
 0x103   :  { %v511_v42 = vmax.f32 %v427_v39, 0.0 }
 0x105   :  { %v531_v46 = vpack.c.bf16 %v511_v42, %v509_v41 }
 0x107   :  { %671 = vmatmul.bf16.gmra.mxu3 %v531_v46 }
 0x108   :  { %v476_v53 = vpop.f32.mrf.mxu2 }
 0x109   :  { %v512_v55 = vmax.f32 %v476_v53, 0.0 }
 0x10a   :  { %v430_v58 = vpop.f32.mrf.mxu1 }
 0x10b   :  { %v532_v60 = vpack.c.bf16 %v512_v55, %v510_v54  ;;  %v513_v8 = vmax.f32 %v430_v58, 0.0 }
 0x10d   :  { %929 = vmatmul.msk.bf16.gmra.mxu0 %vm613_vm6, %v532_v60 }
 0x110   :  { %v479_v4 = vpop.f32.mrf.mxu2 }
 0x111   :  { %v514_v48 = vmax.f32 %v479_v4, 0.0 }
 0x112   :  { %v432_v7 = vpop.f32.mrf.mxu1 }
 0x113   :  { %v515_v9 = vmax.f32 %v432_v7, 0.0 }
 0x115   :  { %v533_v11 = vpack.c.bf16 %v515_v9, %v513_v8 }
 0x117   :  { %676 = vmatmul.bf16.gmra.mxu3 %v533_v11 }
 0x118   :  { %v481_v47 = vpop.f32.mrf.mxu2 }
 0x119   :  { %v516_v12 = vmax.f32 %v481_v47, 0.0 }
 0x11a   :  { %v435_v13 = vpop.f32.mrf.mxu1 }
 0x11b   :  { %v534_v14 = vpack.c.bf16 %v516_v12, %v514_v48  ;;  %v517_v17 = vmax.f32 %v435_v13, 0.0 }
 0x11d   :  { %930 = vmatmul.msk.bf16.gmra.mxu0 %vm613_vm6, %v534_v14 }
 0x120   :  { %v484_v15 = vpop.f32.mrf.mxu2 }
 0x121   :  { %v518_v21 = vmax.f32 %v484_v15, 0.0 }
 0x122   :  { %v437_v16 = vpop.f32.mrf.mxu1 }
 0x123   :  { %v519_v18 = vmax.f32 %v437_v16, 0.0 }
 0x125   :  { %v535_v19 = vpack.c.bf16 %v519_v18, %v517_v17 }
 0x127   :  { %681 = vmatmul.bf16.gmra.mxu3 %v535_v19 }
 0x128   :  { %v486_v20 = vpop.f32.mrf.mxu2 }
 0x129   :  { %v520_v22 = vmax.f32 %v486_v20, 0.0 }
 0x12b   :  { %v536_v23 = vpack.c.bf16 %v520_v22, %v518_v21 }
 0x12d   :  { %931 = vmatmul.msk.bf16.gmra.mxu0 %vm613_vm6, %v536_v23 }
 0x13a   :  { %v647_v25 = vpop.f32.mrf.mxu3  ;;  %v696_v26 = vpop.f32.mrf.mxu0 }
 0x13b   :  { %v648_v27 = vadd.f32 %v1276_v24, %v647_v25 }
 0x13d   :  { %v697_v28 = vadd.f32 %v696_v26, %v648_v27 }
 0x13f   :  { %v736_v29 = vpack.c.bf16 %v697_v28, %v697_v28 }
 0x141   :  { %752 = vst.msk [vmem:[%s1367_s9] sm:$0xf] %vm256_vm5, %v736_v29 }
 0x142   :  { %v649_v30 = vpop.f32.mrf.mxu3  ;;  %v698_v31 = vpop.f32.mrf.mxu0 }
 0x143   :  { %v650_v32 = vadd.f32 %v1276_v24, %v649_v30 }
 0x145   :  { %v699_v33 = vadd.f32 %v698_v31, %v650_v32 }
 0x147   :  { %v737_v34 = vpack.c.bf16 %v699_v33, %v699_v33 }
 0x149   :  { %753 = vst.msk [vmem:[%s1367_s9 + $0x4] sm:$0xf] %vm256_vm5, %v737_v34 }
 0x14a   :  { %v652_v35 = vpop.f32.mrf.mxu3  ;;  %v701_v36 = vpop.f32.mrf.mxu0 }
 0x14b   :  { %v653_v37 = vadd.f32 %v1276_v24, %v652_v35 }
 0x14d   :  { %v702_v38 = vadd.f32 %v701_v36, %v653_v37 }
 0x14f   :  { %v738_v39 = vpack.c.bf16 %v702_v38, %v702_v38 }
 0x151   :  { %754 = vst.msk [vmem:[%s1367_s9 + $0x8] sm:$0xf] %vm256_vm5, %v738_v39 }
 0x152   :  { %v654_v40 = vpop.f32.mrf.mxu3  ;;  %v703_v41 = vpop.f32.mrf.mxu0 }
 0x153   :  { %v655_v42 = vadd.f32 %v1276_v24, %v654_v40 }
 0x155   :  { %v704_v43 = vadd.f32 %v703_v41, %v655_v42 }
 0x157   :  { %v739_v44 = vpack.c.bf16 %v704_v43, %v704_v43 }
 0x159   :  { %755 = vst.msk [vmem:[%s1367_s9 + $0xc] sm:$0xf] %vm256_vm5, %v739_v44 }
 0x15a   :  { %v657_v45 = vpop.f32.mrf.mxu3  ;;  %v706_v46 = vpop.f32.mrf.mxu0 }
 0x15b   :  { %v658_v49 = vadd.f32 %v1276_v24, %v657_v45 }
 0x15d   :  { %v707_v50 = vadd.f32 %v706_v46, %v658_v49 }
 0x15f   :  { %v740_v51 = vpack.c.bf16 %v707_v50, %v707_v50 }
 0x161   :  { %756 = vst.msk [vmem:[%s1367_s9 + $0x10] sm:$0xf] %vm256_vm5, %v740_v51 }
 0x162   :  { %v659_v52 = vpop.f32.mrf.mxu3  ;;  %v708_v53 = vpop.f32.mrf.mxu0 }
 0x163   :  { %v660_v54 = vadd.f32 %v1276_v24, %v659_v52 }
 0x165   :  { %v709_v55 = vadd.f32 %v708_v53, %v660_v54 }
 0x167   :  { %v741_v56 = vpack.c.bf16 %v709_v55, %v709_v55 }
 0x169   :  { %757 = vst.msk [vmem:[%s1367_s9 + $0x14] sm:$0xf] %vm256_vm5, %v741_v56 }
 0x16a   :  { %v662_v57 = vpop.f32.mrf.mxu3  ;;  %v711_v58 = vpop.f32.mrf.mxu0 }
 0x16b   :  { %v663_v59 = vadd.f32 %v1276_v24, %v662_v57 }
 0x16d   :  { %v712_v60 = vadd.f32 %v711_v58, %v663_v59 }
 0x16f   :  { %v742_v61 = vpack.c.bf16 %v712_v60, %v712_v60 }
 0x171   :  { %758 = vst.msk [vmem:[%s1367_s9 + $0x18] sm:$0xf] %vm256_vm5, %v742_v61 }
 0x172   :  { %v664_v62 = vpop.f32.mrf.mxu3  ;;  %v713_v63 = vpop.f32.mrf.mxu0 }
 0x173   :  { %v665_v0 = vadd.f32 %v1276_v24, %v664_v62 }
 0x175   :  { %v714_v1 = vadd.f32 %v713_v63, %v665_v0 }
 0x177   :  { %v743_v2 = vpack.c.bf16 %v714_v1, %v714_v1 }
 0x179   :  { %759 = vst.msk [vmem:[%s1367_s9 + $0x1c] sm:$0xf] %vm256_vm5, %v743_v2 }
 0x17a   :  { %v667_v3 = vpop.f32.mrf.mxu3  ;;  %v716_v4 = vpop.f32.mrf.mxu0 }
 0x17b   :  { %v668_v5 = vadd.f32 %v1276_v24, %v667_v3 }
 0x17d   :  { %v717_v6 = vadd.f32 %v716_v4, %v668_v5 }
 0x17f   :  { %v744_v7 = vpack.c.bf16 %v717_v6, %v717_v6 }
 0x181   :  { %760 = vst.msk [vmem:[%s1367_s9 + $0x20] sm:$0xf] %vm256_vm5, %v744_v7 }
 0x182   :  { %v669_v8 = vpop.f32.mrf.mxu3  ;;  %v718_v9 = vpop.f32.mrf.mxu0 }
 0x183   :  { %v670_v10 = vadd.f32 %v1276_v24, %v669_v8 }
 0x185   :  { %v719_v11 = vadd.f32 %v718_v9, %v670_v10 }
 0x187   :  { %v745_v47 = vpack.c.bf16 %v719_v11, %v719_v11 }
 0x189   :  { %761 = vst.msk [vmem:[%s1367_s9 + $0x24] sm:$0xf] %vm256_vm5, %v745_v47 }
 0x18a   :  { %v672_v48 = vpop.f32.mrf.mxu3  ;;  %v721_v12 = vpop.f32.mrf.mxu0 }
 0x18b   :  { %v673_v13 = vadd.f32 %v1276_v24, %v672_v48 }
 0x18d   :  { %v722_v14 = vadd.f32 %v721_v12, %v673_v13 }
 0x18f   :  { %v746_v15 = vpack.c.bf16 %v722_v14, %v722_v14 }
 0x191   :  { %762 = vst.msk [vmem:[%s1367_s9 + $0x28] sm:$0xf] %vm256_vm5, %v746_v15 }
 0x192   :  { %v674_v16 = vpop.f32.mrf.mxu3  ;;  %v723_v17 = vpop.f32.mrf.mxu0 }
 0x193   :  { %v675_v18 = vadd.f32 %v1276_v24, %v674_v16 }
 0x195   :  { %v724_v19 = vadd.f32 %v723_v17, %v675_v18 }
 0x197   :  { %v747_v20 = vpack.c.bf16 %v724_v19, %v724_v19 }
 0x199   :  { %763 = vst.msk [vmem:[%s1367_s9 + $0x2c] sm:$0xf] %vm256_vm5, %v747_v20 }
 0x19a   :  { %v677_v21 = vpop.f32.mrf.mxu3  ;;  %v726_v22 = vpop.f32.mrf.mxu0 }
 0x19b   :  { %v678_v23 = vadd.f32 %v1276_v24, %v677_v21 }
 0x19d   :  { %v727_v25 = vadd.f32 %v726_v22, %v678_v23 }
 0x19f   :  { %v748_v26 = vpack.c.bf16 %v727_v25, %v727_v25 }
 0x1a1   :  { %764 = vst.msk [vmem:[%s1367_s9 + $0x30] sm:$0xf] %vm256_vm5, %v748_v26 }
 0x1a2   :  { %v679_v27 = vpop.f32.mrf.mxu3  ;;  %v728_v28 = vpop.f32.mrf.mxu0 }
 0x1a3   :  { %v680_v29 = vadd.f32 %v1276_v24, %v679_v27 }
 0x1a5   :  { %v729_v30 = vadd.f32 %v728_v28, %v680_v29 }
 0x1a7   :  { %v749_v31 = vpack.c.bf16 %v729_v30, %v729_v30 }
 0x1a9   :  { %765 = vst.msk [vmem:[%s1367_s9 + $0x34] sm:$0xf] %vm256_vm5, %v749_v31 }
 0x1aa   :  { %v682_v32 = vpop.f32.mrf.mxu3  ;;  %v731_v33 = vpop.f32.mrf.mxu0 }
 0x1ab   :  { %v683_v34 = vadd.f32 %v1276_v24, %v682_v32 }
 0x1ad   :  { %v732_v35 = vadd.f32 %v731_v33, %v683_v34 }
 0x1af   :  { %v750_v36 = vpack.c.bf16 %v732_v35, %v732_v35 }
 0x1b1   :  { %766 = vst.msk [vmem:[%s1367_s9 + $0x38] sm:$0xf] %vm256_vm5, %v750_v36 }
 0x1b2   :  { %v684_v37 = vpop.f32.mrf.mxu3  ;;  %v733_v39 = vpop.f32.mrf.mxu0 }
 0x1b3   :  { %v685_v38 = vadd.f32 %v1276_v24, %v684_v37 }
 0x1b5   :  { %v734_v40 = vadd.f32 %v733_v39, %v685_v38 }
 0x1b7   :  { %v751_v41 = vpack.c.bf16 %v734_v40, %v734_v40 }
 0x1b9   :  { %767 = vst.msk [vmem:[%s1367_s9 + $0x3c] sm:$0xf] %vm256_vm5, %v751_v41 }

// kernel: ccf_forward.4
= control target key start
LH: loop header
LB: loop body
LE: loop exit
PB: predicated region body
PF: predicated region fallthrough
CT: control target
= control target key end

     0   :  { %s1600_s13 = smov 0   ;;  %s2044_s0 = inlined_call_operand.vmem [shape: bf16[2,64,64], index: 0, kind: input, shape index: {}]   ;;  %s2045_s1 = inlined_call_operand.vmem [shape: bf16[2,64,64], index: 1, kind: input, shape index: {}]   ;;  %s2046_s2 = inlined_call_operand.vmem [shape: bf16[64,128], index: 2, kind: input, shape index: {}]   ;;  %s2047_s3 = inlined_call_operand.vmem [shape: f32[32,8], index: 3, kind: input, shape index: {}]   ;;  %s2048_s4 = inlined_call_operand.vmem [shape: f32[1,8], index: 4, kind: input, shape index: {}]   ;;  %s2049_s5 = inlined_call_operand.vmem [shape: f32[1,8], index: 5, kind: input, shape index: {}]   ;;  %s2050_s6 = inlined_call_operand.vmem [shape: f32[1,8], index: 6, kind: input, shape index: {}]   ;;  %s2051_s7 = inlined_call_operand.vmem [shape: f32[8,64], index: 7, kind: input, shape index: {}]   ;;  %s2052_s8 = inlined_call_operand.vmem [shape: f32[1,64], index: 8, kind: input, shape index: {}]   ;;  %s2053_s9 = inlined_call_operand.vmem [shape: bf16[64,128], index: 9, kind: input, shape index: {}]   ;;  %s2054_s10 = inlined_call_operand.vmem [shape: bf16[2,64,64], index: 10, kind: output, shape index: {}]  }
   0x1 LB: > { %s1313_s14 = sadd.s32 4294967295, %s1536_s13   ;;  %p1317_p0 = scmp.ge.s32.totalorder %s1536_s13, 1  ;;  %s1536_s13 = sphi %s1600_s13, %s20_s13  }
   0x2   : > { %p322_p1 = scmp.lt.s32.totalorder %s1536_s13, 3 }
   0x4   : > { %p323_p2 = pnand %p1317_p0, %p322_p1 }
   0x5   : > { %p365_p3 = scmp.lt.s32.totalorder (!%p323_p2), %s1313_s14, 1  ;;  %s1541_s20 = smov (!%p323_p2), 1  }
   0x6   : > { %326 = sbr.rel (%p323_p2) target bundleno = 1729 (0x6c1), region = 60  ;;  %s1542_s21 = smov (!%p323_p2), 127  }
   0x7   : > { %s1543_s22 = smov (!%p323_p2), 32   ;;  %s1544_s23 = smov (!%p323_p2), 96  }
   0xb   : > { %v1383_v0 = vld [vmem:[%s2046_s2 + $0x18] sm:$0xff]  ;;  %v1382_v1 = vld [vmem:[%s2046_s2 + $0x10] sm:$0xff]  ;;  %s2060_s14 = smov (!%p365_p3, %s1313_s14), 1  ;;  %v1381_v2 = vld [vmem:[%s2046_s2 + $0x8] sm:$0xff]  ;;  %vm457_vm0 = vcmask 523264   ;;  %vm499_vm1 = vcmask 269568  }
   0xc   : > { %474 = vmatpush.bf16.msra.mxu0 %v1383_v0  ;;  %1426 = vmatpush.bf16.msra.mxu2 %v1383_v0  ;;  %s1614_s19 = sshll.u32 %s2060_s14, 5  ;;  %v1380_v17 = vld [vmem:[%s2046_s2] sm:$0xff]  ;;  %v1538_v54 = vmov 32   ;;  %vm636_vm6 = vcmask 261120   ;;  %vm686_vm7 = vcmask 57344   ;;  %vm723_vm12 = vcmask 64512  }
   0xd   : > { %s1623_s24 = scalar_lea.vmem %s2044_s0, %s1614_s19  ;;  %s1629_s27 = scalar_lea.vmem %s2045_s1, %s1614_s19  ;;  %1451 = vset.pattern.permute.xlu2 %v1538_v54  ;;  %1450 = vset.pattern.permute.xlu1 %v1538_v54 }
   0xe   : > { %v1632_v3 = vld [vmem:[%s1623_s24] sm:$0xff]   ;;  %v1638_v5 = vld [vmem:[%s1623_s24 + $0x18] sm:$0xff]   ;;  %v1685_v22 = vld [vmem:[%s1623_s24 + $0x8] sm:$0xff]   ;;  %1449 = vset.pattern.permute.xlu0 %v1538_v54  ;;  %s1967_s26 = scalar_lea.vmem %s2054_s10, %s1614_s19 }
   0xf   : > { %v1635_v4 = vld [vmem:[%s1629_s27] sm:$0xff]   ;;  %v1390_v6 = vunpack.c.l.bf16 %v1632_v3  ;;  %v1391_v7 = vunpack.c.h.bf16 %v1632_v3  ;;  %v1645_v10 = vld [vmem:[%s1629_s27 + $0x18] sm:$0xff]   ;;  %v2055_v11 = vunpack.c.l.bf16 %v1638_v5  ;;  %v2056_v12 = vunpack.c.h.bf16 %v1638_v5  ;;  %v1688_v23 = vld [vmem:[%s1629_s27 + $0x8] sm:$0xff]  }
  0x10   : > { %475 = vmatpush.bf16.msra.mxu0 %v1382_v1  ;;  %1427 = vmatpush.bf16.msra.mxu2 %v1382_v1  ;;  %v1406_v8 = vunpack.c.l.bf16 %v1635_v4  ;;  %v1407_v9 = vunpack.c.h.bf16 %v1635_v4  ;;  %v1418_v13 = vunpack.c.l.bf16 %v1645_v10  ;;  %v1419_v14 = vunpack.c.h.bf16 %v1645_v10  ;;  %v1710_v31 = vld [vmem:[%s1623_s24 + $0x10] sm:$0xff]  }
  0x11   : > { %v1394_v24 = vunpack.c.l.bf16 %v1685_v22  ;;  %v1395_v25 = vunpack.c.h.bf16 %v1685_v22  ;;  %v1410_v26 = vunpack.c.l.bf16 %v1688_v23  ;;  %v1411_v27 = vunpack.c.h.bf16 %v1688_v23  ;;  %v1713_v32 = vld [vmem:[%s1629_s27 + $0x10] sm:$0xff]  }
  0x12   : > { %v1655_v15 = vadd.f32 %v1406_v8, %v1390_v6  ;;  %v1661_v16 = vadd.f32 %v1407_v9, %v1391_v7  ;;  %v1670_v18 = vadd.f32 %v1418_v13, %v2055_v11  ;;  %v1676_v19 = vadd.f32 %v1419_v14, %v2056_v12 }
  0x13   : > { %v1698_v28 = vadd.f32 %v1410_v26, %v1394_v24  ;;  %v1704_v29 = vadd.f32 %v1411_v27, %v1395_v25  ;;  %v1398_v33 = vunpack.c.l.bf16 %v1710_v31  ;;  %v1399_v34 = vunpack.c.h.bf16 %v1710_v31 }
  0x14   : > { %476 = vmatpush.bf16.msra.mxu0 %v1381_v2  ;;  %1428 = vmatpush.bf16.msra.mxu2 %v1381_v2  ;;  %v421_v20 = vpack.c.bf16 %v1661_v16, %v1655_v15  ;;  %v424_v21 = vpack.c.bf16 %v1676_v19, %v1670_v18  ;;  %v1414_v35 = vunpack.c.l.bf16 %v1713_v32  ;;  %v1415_v36 = vunpack.c.h.bf16 %v1713_v32 }
  0x15   : > { %v422_v30 = vpack.c.bf16 %v1704_v29, %v1698_v28 }
  0x16   : > { %v1723_v37 = vadd.f32 %v1414_v35, %v1398_v33  ;;  %v1729_v38 = vadd.f32 %v1415_v36, %v1399_v34 }
  0x18   : > { %477 = vmatpush.bf16.msra.mxu0 %v1380_v17  ;;  %1429 = vmatpush.bf16.msra.mxu2 %v1380_v17  ;;  %v423_v39 = vpack.c.bf16 %v1729_v38, %v1723_v37 }
  0x1b   : > { %1340 = vmatmul.msk.bf16.vlgmr.msra.gmra.mxu0 %vm457_vm0, %v421_v20  ;;  %1343 = vmatmul.msk.bf16.vlgmr.msra.gmra.mxu2 %vm457_vm0, %v424_v21 }
  0x2b   : > { %1341 = vmatmul.msk.bf16.gmra.mxu0 %vm457_vm0, %v422_v30 }
  0x3b   : > { %1342 = vmatmul.msk.bf16.gmra.mxu0 %vm457_vm0, %v423_v39 }
  0x98   : > { %v1734_v40 = vpop.f32.mrf.mxu0 }
  0x99   : > { %v500_v55 = vsel %vm499_vm1, %v1734_v40, -inf }
  0x9e   : > { %v1740_v43 = vpop.f32.mrf.mxu2 }
  0x9f   : > { %v508_v50 = vsel %vm499_vm1, %v1740_v43, -inf }
  0xa0   : > { %v1736_v41 = vpop.f32.mrf.mxu0 }
  0xa1   : > { %v501_v56 = vsel %vm499_vm1, %v1736_v41, -inf }
  0xa6   : > { %v1746_v46 = vpop.f32.mrf.mxu2 }
  0xa7   : > { %v510_v48 = vsel %vm499_vm1, %v1746_v46, -inf }
  0xa8   : > { %v1738_v42 = vpop.f32.mrf.mxu0 }
  0xa9   : > { %v502_v49 = vsel %vm499_vm1, %v1738_v42, -inf }
  0xaa   : > { %v509_v58 = vmax.f32 %v502_v49, %v508_v50 }
  0xb0   : > { %v1742_v44 = vpop.f32.mrf.mxu0 }
  0xb1   : > { %v503_v47 = vsel %vm499_vm1, %v1742_v44, -inf }
  0xb2   : > { %v511_v52 = vmax.f32 %v503_v47, %v510_v48 }
  0xb4   : > { %v513_v61 = vmax.f32 %v509_v58, %v511_v52 }
  0xb8   : > { %v1744_v45 = vpop.f32.mrf.mxu0 }
  0xb9   : > { %v504_v51 = vsel %vm499_vm1, %v1744_v45, -inf }
  0xba   : > { %v505_v59 = vmax.f32 %v500_v55, %v504_v51 }
  0xc0   : > { %v1758_v53 = vpop.f32.mrf.mxu0 }
  0xc1   : > { %v506_v57 = vsel %vm499_vm1, %v1758_v53, -inf }
  0xc2   : > { %v507_v60 = vmax.f32 %v501_v56, %v506_v57 }
  0xc4   : > { %v512_v62 = vmax.f32 %v505_v59, %v507_v60 }
  0xc6   : > { %v514_v63 = vmax.f32 %v512_v62, %v513_v61 }
  0xc8   : > { %v515_v0 = vrot.slane %v514_v63, 4 }
  0xca   : > { %v516_v1 = vmax.f32 %v514_v63, %v515_v0 }
  0xcc   : > { %v517_v2 = vrot.slane %v516_v1, 2 }
  0xce   : > { %v518_v17 = vmax.f32 %v516_v1, %v517_v2 }
  0xd0   : > { %v519_v20 = vrot.slane %v518_v17, 1 }
  0xd2   : > { %v520_v21 = vmax.f32 %v518_v17, %v519_v20 }
  0xd4   : > { %v521_v30 = vsub.f32 %v1734_v40, %v520_v21  ;;  %v522_v39 = vsub.f32 %v1736_v41, %v520_v21  ;;  %v523_v47 = vsub.f32 %v1738_v42, %v520_v21  ;;  %v524_v48 = vsub.f32 %v1742_v44, %v520_v21 }
  0xd5   : > { %v525_v49 = vsub.f32 %v1744_v45, %v520_v21  ;;  %v526_v54 = vsub.f32 %v1758_v53, %v520_v21  ;;  %v527_v56 = vsub.f32 %v1740_v43, %v520_v21  ;;  %v528_v59 = vsub.f32 %v1746_v46, %v520_v21 }
  0xd6   : > { %v529_v50 = vmul.f32 1.442695, %v521_v30  ;;  %v531_v51 = vmul.f32 1.442695, %v522_v39  ;;  %v533_v52 = vmul.f32 1.442695, %v523_v47 }
  0xd7   : > { %v535_v55 = vmul.f32 1.442695, %v524_v48  ;;  %v537_v57 = vmul.f32 1.442695, %v525_v49  ;;  %v539_v58 = vmul.f32 1.442695, %v526_v54 }
  0xd8   : > { %1452 = vpow2.f32 %v529_v50  ;;  %v541_v60 = vmul.f32 1.442695, %v527_v56  ;;  %v543_v63 = vmul.f32 1.442695, %v528_v59 }
  0xd9   : > { %1454 = vpow2.f32 %v531_v51 }
  0xda   : > { %1456 = vpow2.f32 %v533_v52 }
  0xdb   : > { %1458 = vpow2.f32 %v535_v55 }
  0xdc   : > { %1460 = vpow2.f32 %v537_v57 }
  0xdd   : > { %1462 = vpow2.f32 %v539_v58 }
  0xde   : > { %v1453_v61 = vpop.eup %1452  ;;  %1464 = vpow2.f32 %v541_v60 }
  0xdf   : > { %v1455_v62 = vpop.eup %1454  ;;  %v545_v0 = vsel %vm499_vm1, %v1453_v61, 0.0  ;;  %1466 = vpow2.f32 %v543_v63 }
  0xe0   : > { %v1457_v1 = vpop.eup %1456  ;;  %v546_v2 = vsel %vm499_vm1, %v1455_v62, 0.0 }
  0xe1   : > { %v1459_v17 = vpop.eup %1458  ;;  %v547_v20 = vadd.f32 %v546_v2, %v545_v0  ;;  %v548_v30 = vsel %vm499_vm1, %v1457_v1, 0.0 }
  0xe2   : > { %v1461_v39 = vpop.eup %1460  ;;  %v550_v47 = vsel %vm499_vm1, %v1459_v17, 0.0 }
  0xe3   : > { %v549_v21 = vadd.f32 %v548_v30, %v547_v20  ;;  %v1463_v48 = vpop.eup %1462  ;;  %v552_v50 = vsel %vm499_vm1, %v1461_v39, 0.0 }
  0xe4   : > { %v1465_v51 = vpop.eup %1464  ;;  %v554_v54 = vsel %vm499_vm1, %v1463_v48, 0.0 }
  0xe5   : > { %v551_v49 = vadd.f32 %v550_v47, %v549_v21  ;;  %v1467_v55 = vpop.eup %1466  ;;  %v556_v57 = vsel %vm499_vm1, %v1465_v51, 0.0 }
  0xe6   : > { %v558_v59 = vsel %vm499_vm1, %v1467_v55, 0.0 }
  0xe7   : > { %v553_v52 = vadd.f32 %v552_v50, %v551_v49 }
  0xe9   : > { %v555_v56 = vadd.f32 %v554_v54, %v553_v52 }
  0xeb   : > { %v557_v58 = vadd.f32 %v556_v57, %v555_v56 }
  0xed   : > { %v559_v60 = vadd.f32 %v558_v59, %v557_v58 }
  0xef   : > { %v560_v63 = vrot.slane %v559_v60, 4 }
  0xf1   : > { %v561_v0 = vadd.f32 %v560_v63, %v559_v60 }
  0xf3   : > { %v562_v2 = vrot.slane %v561_v0, 2 }
  0xf5   : > { %v563_v20 = vadd.f32 %v562_v2, %v561_v0 }
  0xf7   : > { %v564_v30 = vrot.slane %v563_v20, 1 }
  0xf9   : > { %v565_v21 = vadd.f32 %v564_v30, %v563_v20  ;;  %v661_v30 = vld [vmem:[%s2047_s3 + $0x18] sm:$0xff] }
  0xfa   : > { %678 = vmatpush.msra.mxu1 %v661_v30 }
  0xfb   : > { %1468 = vrcp.f32 %v565_v21  ;;  %v577_v50 = vand.u32 2147483648, %v565_v21  ;;  %v575_v52 = vand.u32 2147483647, %v565_v21  ;;  %vm571_vm3 = vweird.f32 %v565_v21 }
  0xfd   : > { %v578_v56 = vor.u32 1.1754944e-38, %v577_v50  ;;  %vm576_vm5 = vcmp.eq.f32.partialorder %v575_v52, 8.507059e+37 }
 0x101   : > { %v1469_v47 = vpop.eup %1468 }
 0x102   : > { %v567_v11 = vmul.f32 %v1469_v47, %v565_v21  ;;  %vm572_vm2 = vweird.f32 %v1469_v47 }
 0x103   : > { %vm573_vm4 = vmor %vm571_vm3, %vm572_vm2  ;;  %vm903_vm2 = vcmask 523520  }
 0x104   : > { %v568_v49 = vsub.f32 1.0, %v567_v11 }
 0x106   : > { %v569_v12 = vmul.f32 %v1469_v47, %v568_v49 }
 0x108   : > { %v570_v54 = vadd.f32 %v1469_v47, %v569_v12 }
 0x10a   : > { %v574_v57 = vsel %vm573_vm4, %v1469_v47, %v570_v54 }
 0x10b   : > { %v579_v58 = vsel %vm576_vm5, %v578_v56, %v574_v57 }
 0x10c   : > { %v584_v59 = vmul.f32 %v1461_v39, %v579_v58  ;;  %v582_v60 = vmul.f32 %v1457_v1, %v579_v58  ;;  %v580_v63 = vmul.f32 %v1453_v61, %v579_v58  ;;  %v585_v0 = vmul.f32 %v1463_v48, %v579_v58  ;;  %v660_v61 = vld [vmem:[%s2047_s3 + $0x10] sm:$0xff]  ;;  %v658_v39 = vld [vmem:[%s2047_s3] sm:$0xff] }
 0x10d   : > { %v583_v2 = vmul.f32 %v1459_v17, %v579_v58  ;;  %v581_v11 = vmul.f32 %v1455_v62, %v579_v58  ;;  %v587_v20 = vmul.f32 %v1467_v55, %v579_v58  ;;  %v586_v12 = vmul.f32 %v1465_v51, %v579_v58  ;;  %v659_v62 = vld [vmem:[%s2047_s3 + $0x8] sm:$0xff]  ;;  %679 = vmatpush.msra.mxu1 %v660_v61 }
 0x10e   : > { %610 = vperm.xlu2 %1451, %v584_v59   ;;  %600 = vperm.xlu1 %1450, %v582_v60  }
 0x10f   : > { %590 = vperm.xlu0 %1449, %v580_v63   ;;  %680 = vmatpush.msra.mxu1 %v659_v62 }
 0x111   : > { %681 = vmatpush.msra.mxu1 %v658_v39 }
 0x116   : > { %615 = vperm.xlu2 %1451, %v585_v0   ;;  %605 = vperm.xlu1 %1450, %v583_v2  }
 0x117   : > { %595 = vperm.xlu0 %1449, %v581_v11  }
 0x11e   : > { %625 = vperm.xlu1 %1450, %v587_v20  }
 0x11f   : > { %620 = vperm.xlu0 %1449, %v586_v12  }
 0x168   : > { %v611_v48 = vpop.permute.xlu2 %610 }
 0x169   : > { %v632_v58 = vmul.f32 %v611_v48, %v1744_v45 }
 0x16b   : > { %v644_v2 = vsel %vm636_vm6, %v632_v58, 0.0 }
 0x170   : > { %v616_v56 = vpop.permute.xlu2 %615 }
 0x171   : > { %v633_v60 = vmul.f32 %v616_v56, %v1758_v53 }
 0x173   : > { %v646_v20 = vsel %vm636_vm6, %v633_v60, 0.0 }
 0x180   : > { %v601_v1 = vpop.permute.xlu1 %600 }
 0x181   : > { %v591_v17 = vpop.permute.xlu0 %590  ;;  %v630_v47 = vmul.f32 %v601_v1, %v1738_v42 }
 0x182   : > { %v628_v51 = vmul.f32 %v591_v17, %v1734_v40 }
 0x183   : > { %v640_v59 = vsel %vm636_vm6, %v630_v47, 0.0 }
 0x184   : > { %v637_v50 = vsel %vm636_vm6, %v628_v51, 0.0 }
 0x188   : > { %v606_v55 = vpop.permute.xlu1 %605 }
 0x189   : > { %v596_v21 = vpop.permute.xlu0 %595  ;;  %v631_v52 = vmul.f32 %v606_v55, %v1742_v44 }
 0x18a   : > { %v629_v49 = vmul.f32 %v596_v21, %v1736_v41 }
 0x18b   : > { %v642_v42 = vsel %vm636_vm6, %v631_v52, 0.0 }
 0x18c   : > { %v638_v54 = vsel %vm636_vm6, %v629_v49, 0.0  ;;  %v1539_v49 = vmov 8.0  }
 0x18d   : > { %v639_v57 = vadd.f32 %v638_v54, %v637_v50  ;;  %1470 = vrcp.f32 %v1539_v49 }
 0x18f   : > { %v641_v40 = vadd.f32 %v640_v59, %v639_v57 }
 0x190   : > { %v626_v41 = vpop.permute.xlu1 %625 }
 0x191   : > { %v643_v63 = vadd.f32 %v642_v42, %v641_v40  ;;  %v621_v0 = vpop.permute.xlu0 %620  ;;  %v635_v12 = vmul.f32 %v626_v41, %v1746_v46  ;;  %v721_v41 = vld [vmem:[%s2051_s7] sm:$0xff] }
 0x192   : > { %v634_v44 = vmul.f32 %v621_v0, %v1740_v43  ;;  %v662_v43 = vld [vmem:[%s2048_s4] sm:$0x1]  ;;  %742 = vmatpush.msrb.mxu2 %v721_v41 }
 0x193   : > { %v645_v11 = vadd.f32 %v644_v2, %v643_v63  ;;  %v650_v53 = vsel %vm636_vm6, %v635_v12, 0.0  ;;  %v1471_v50 = vpop.eup %1470 }
 0x194   : > { %v648_v30 = vsel %vm636_vm6, %v634_v44, 0.0  ;;  %v691_v52 = vmul.f32 8.0, %v1471_v50  ;;  %vm695_vm8 = vweird.f32 %v1471_v50 }
 0x195   : > { %v647_v45 = vadd.f32 %v646_v20, %v645_v11 }
 0x196   : > { %v692_v54 = vsub.f32 1.0, %v691_v52  ;;  %v1384_v52 = vld [vmem:[%s2053_s9] sm:$0xff] }
 0x197   : > { %v649_v61 = vadd.f32 %v648_v30, %v647_v45 }
 0x198   : > { %v693_v56 = vmul.f32 %v1471_v50, %v692_v54 }
 0x199   : > { %v651_v62 = vadd.f32 %v650_v53, %v649_v61 }
 0x19a   : > { %v694_v57 = vadd.f32 %v1471_v50, %v693_v56 }
 0x19b   : > { %v652_v1 = vrot.slane %v651_v62, 4 }
 0x19c   : > { %v696_v58 = vsel %vm695_vm8, %v1471_v50, %v694_v57  ;;  %vm893_vm8 = vcmask 7168  }
 0x19d   : > { %v653_v17 = vadd.f32 %v652_v1, %v651_v62  ;;  %v716_v62 = vld [vmem:[%s2049_s5] sm:$0x1] }
 0x19f   : > { %v654_v39 = vrot.slane %v653_v17, 2 }
 0x1a1   : > { %v655_v48 = vadd.f32 %v654_v39, %v653_v17  ;;  %v718_v17 = vld [vmem:[%s2050_s6] sm:$0x1] }
 0x1a3   : > { %v656_v51 = vrot.slane %v655_v48, 1 }
 0x1a5   : > { %v657_v55 = vadd.f32 %v656_v51, %v655_v48 }
 0x1a7   : > { %1344 = vmatmul.msk.f32.vlgmr.msra.gmra.mxu1 %vm636_vm6, %v657_v55  ;;  %v1387_v55 = vld [vmem:[%s2053_s9 + $0x18] sm:$0xff] }
 0x1a8   : > { %835 = vmatpush.bf16.msrb.mxu1 %v1387_v55  ;;  %1430 = vmatpush.bf16.msra.mxu3 %v1387_v55 }
 0x224   : > { %v683_v46 = vpop.f32.mrf.mxu1 }
 0x225   : > { %v684_v21 = vadd.f32 %v683_v46, %v662_v43  ;;  %v722_v43 = vld [vmem:[%s2052_s8] sm:$0x1]  ;;  %v1386_v46 = vld [vmem:[%s2053_s9 + $0x10] sm:$0xff] }
 0x226   : > { %836 = vmatpush.bf16.msrb.mxu1 %v1386_v46  ;;  %1431 = vmatpush.bf16.msra.mxu3 %v1386_v46 }
 0x227   : > { %v687_v47 = vsel %vm686_vm7, %v684_v21, 0.0 }
 0x228   : > { %688 = vadd.xlane.f32.xlu2 %v687_v47  ;;  %v1385_v47 = vld [vmem:[%s2053_s9 + $0x8] sm:$0xff] }
 0x22a   : > { %837 = vmatpush.bf16.msrb.mxu1 %v1385_v47  ;;  %1432 = vmatpush.bf16.msra.mxu3 %v1385_v47 }
 0x22e   : > { %838 = vmatpush.bf16.msrb.mxu1 %v1384_v52  ;;  %1433 = vmatpush.bf16.msra.mxu3 %v1384_v52 }
 0x29b   : > { %v689_v59 = vpop.xlane.xlu2 %688 }
 0x29c   : > { %v697_v40 = vmul.f32 %v696_v58, %v689_v59 }
 0x29e   : > { %v698_v60 = vsub.f32 %v684_v21, %v697_v40 }
 0x2a0   : > { %v699_v42 = vmul.f32 %v698_v60, %v698_v60 }
 0x2a2   : > { %v700_v63 = vsel %vm686_vm7, %v699_v42, 0.0 }
 0x2a3   : > { %701 = vadd.xlane.f32.xlu0 %v700_v63 }
 0x316   : > { %v702_v0 = vpop.xlane.xlu0 %701 }
 0x317   : > { %v703_v2 = vmul.f32 %v702_v0, %v696_v58 }
 0x319   : > { %v704_v44 = vadd.f32 1e-05, %v703_v2 }
 0x31b   : > { %1472 = vrsqrt.f32 %v704_v44  ;;  %vm711_vm10 = vweird.f32 %v704_v44 }
 0x321   : > { %v1473_v11 = vpop.eup %1472 }
 0x322   : > { %v706_v20 = vmul.f32 %v1473_v11, %v704_v44  ;;  %vm712_vm9 = vweird.f32 %v1473_v11 }
 0x323   : > { %vm713_vm11 = vmor %vm711_vm10, %vm712_vm9  ;;  %vm898_vm9 = vcmask 252928  }
 0x324   : > { %v707_v12 = vmul.f32 %v1473_v11, %v706_v20 }
 0x326   : > { %v708_v45 = vmul.f32 0.5, %v707_v12 }
 0x328   : > { %v709_v30 = vsub.f32 1.5, %v708_v45 }
 0x32a   : > { %v710_v61 = vmul.f32 %v1473_v11, %v709_v30 }
 0x32c   : > { %v714_v53 = vsel %vm713_vm11, %v1473_v11, %v710_v61 }
 0x32d   : > { %v715_v1 = vmul.f32 %v714_v53, %v698_v60 }
 0x32f   : > { %v717_v39 = vmul.f32 %v716_v62, %v715_v1 }
 0x331   : > { %v719_v48 = vadd.f32 %v718_v17, %v717_v39 }
 0x333   : > { %v720_v51 = vmax.f32 %v719_v48, 0.0 }
 0x335   : > { %1345 = vmatmul.msk.f32.vlgmr.msrb.gmra.mxu2 %vm723_vm12, %v720_v51 }
 0x3b8   : > { %v744_v21 = vpop.f32.mrf.mxu2 }
 0x3b9   : > { %v745_v49 = vadd.f32 %v744_v21, %v722_v43  ;;  %v1540_v21 = vmov 64.0  }
 0x3bb   : > { %v1346_v50 = vmul.f32 -1.442695, %v745_v49 }
 0x3bd   : > { %1474 = vpow2.f32 %v1346_v50 }
 0x3c3   : > { %v1475_v54 = vpop.eup %1474 }
 0x3c4   : > { %v750_v56 = vadd.f32 1.0, %v1475_v54 }
 0x3c6   : > { %1476 = vrcp.f32 %v750_v56  ;;  %v762_v40 = vand.u32 2147483648, %v750_v56  ;;  %v760_v42 = vand.u32 2147483647, %v750_v56  ;;  %vm756_vm14 = vweird.f32 %v750_v56 }
 0x3c7   : > { %1478 = vrcp.f32 %v1540_v21 }
 0x3c8   : > { %v763_v41 = vor.u32 1.1754944e-38, %v762_v40  ;;  %vm761_vm1 = vcmp.eq.f32.partialorder %v760_v42, 8.507059e+37 }
 0x3cc   : > { %v1477_v57 = vpop.eup %1476 }
 0x3cd   : > { %v752_v58 = vmul.f32 %v1477_v57, %v750_v56  ;;  %vm757_vm13 = vweird.f32 %v1477_v57 }
 0x3ce   : > { %vm758_vm15 = vmor %vm756_vm14, %vm757_vm13  ;;  %vm1237_vm13 = vcmask 519168  }
 0x3cf   : > { %v753_v59 = vsub.f32 1.0, %v752_v58  ;;  %v1479_v58 = vpop.eup %1478 }
 0x3d1   : > { %v754_v60 = vmul.f32 %v1477_v57, %v753_v59 }
 0x3d3   : > { %v755_v63 = vadd.f32 %v1477_v57, %v754_v60 }
 0x3d5   : > { %v759_v0 = vsel %vm758_vm15, %v1477_v57, %v755_v63 }
 0x3d6   : > { %v764_v2 = vsel %vm761_vm1, %v763_v41, %v759_v0  ;;  %v882_v41 = vmul.f32 64.0, %v1479_v58 }
 0x3d7   : > { %v766_v44 = vperm.slane %v764_v2, 0 }
 0x3d9   : > { %v767_v11 = vmul.f32 %v766_v44, %v1655_v15  ;;  %v768_v20 = vmul.f32 %v766_v44, %v1661_v16  ;;  %v769_v12 = vmul.f32 %v766_v44, %v1698_v28  ;;  %v770_v45 = vmul.f32 %v766_v44, %v1704_v29 }
 0x3da   : > { %v771_v4 = vmul.f32 %v766_v44, %v1723_v37  ;;  %v774_v29 = vmul.f32 %v766_v44, %v1676_v19 }
 0x3db   : > { %v1846_v30 = vadd.f32 %v1406_v8, %v767_v11  ;;  %v1850_v61 = vadd.f32 %v1407_v9, %v768_v20  ;;  %v1854_v53 = vadd.f32 %v1410_v26, %v769_v12  ;;  %v1858_v15 = vadd.f32 %v1411_v27, %v770_v45 }
 0x3dc   : > { %v772_v8 = vmul.f32 %v766_v44, %v1729_v38  ;;  %v1870_v9 = vadd.f32 %v1414_v35, %v771_v4  ;;  %v773_v27 = vmul.f32 %v766_v44, %v1670_v18  ;;  %v1887_v35 = vadd.f32 %v1419_v14, %v774_v29 }
 0x3dd   : > { %v783_v16 = vpack.c.bf16 %v1850_v61, %v1846_v30  ;;  %v784_v28 = vpack.c.bf16 %v1858_v15, %v1854_v53  ;;  %v883_v45 = vsub.f32 1.0, %v882_v41 }
 0x3de   : > { %v1874_v23 = vadd.f32 %v1415_v36, %v772_v8  ;;  %v1883_v37 = vadd.f32 %v1418_v13, %v773_v27 }
 0x3df   : > { %1363 = vmatmul.msk.bf16.vlgmr.msrb.gmra.mxu1 %vm457_vm0, %v783_v16  ;;  %1364 = vmatmul.msk.bf16.vlgmr.msra.gmra.mxu3 %vm457_vm0, %v784_v28 }
 0x3e0   : > { %v785_v26 = vpack.c.bf16 %v1874_v23, %v1870_v9  ;;  %v786_v32 = vpack.c.bf16 %v1887_v35, %v1883_v37 }
 0x3ef   : > { %1365 = vmatmul.msk.bf16.gmra.mxu3 %vm457_vm0, %v785_v26  ;;  %v884_v26 = vmul.f32 %v1479_v58, %v883_v45 }
 0x3ff   : > { %1366 = vmatmul.msk.bf16.gmra.mxu3 %vm457_vm0, %v786_v32  ;;  %vm886_vm0 = vweird.f32 %v1479_v58 }
 0x45c   : > { %v1896_v18 = vpop.f32.mrf.mxu1 }
 0x45d   : > { %v904_v14 = vsel %vm903_vm2, %v1896_v18, -inf  ;;  %v860_v55 = vsel %vm636_vm6, %v1896_v18, 0.0 }
 0x462   : > { %v1892_v36 = vpop.f32.mrf.mxu3 }
 0x463   : > { %v863_v47 = vsel %vm636_vm6, %v1892_v36, 0.0  ;;  %v906_v54 = vsel %vm903_vm2, %v1892_v36, -inf }
 0x464   : > { %v1900_v13 = vpop.f32.mrf.mxu1 }
 0x465   : > { %v861_v1 = vsel %vm636_vm6, %v1900_v13, 0.0  ;;  %v905_v17 = vsel %vm903_vm2, %v1900_v13, -inf }
 0x466   : > { %v862_v43 = vadd.f32 %v861_v1, %v860_v55 }
 0x468   : > { %v864_v50 = vadd.f32 %v863_v47, %v862_v43 }
 0x46a   : > { %v1894_v38 = vpop.f32.mrf.mxu3 }
 0x46b   : > { %v865_v49 = vsel %vm636_vm6, %v1894_v38, 0.0  ;;  %v907_v11 = vsel %vm903_vm2, %v1894_v38, -inf }
 0x46c   : > { %v866_v59 = vadd.f32 %v865_v49, %v864_v50 }
 0x472   : > { %v1898_v19 = vpop.f32.mrf.mxu3 }
 0x473   : > { %v908_v10 = vsel %vm903_vm2, %v1898_v19, -inf  ;;  %v867_v56 = vsel %vm636_vm6, %v1898_v19, 0.0 }
 0x474   : > { %v909_v48 = vmax.f32 %v904_v14, %v908_v10  ;;  %v868_v42 = vadd.f32 %v867_v56, %v866_v59  ;;  %v885_v14 = vadd.f32 %v1479_v58, %v884_v26 }
 0x47a   : > { %v1906_v62 = vpop.f32.mrf.mxu3 }
 0x47b   : > { %v910_v39 = vsel %vm903_vm2, %v1906_v62, -inf  ;;  %v869_v60 = vsel %vm636_vm6, %v1906_v62, 0.0 }
 0x47c   : > { %v911_v51 = vmax.f32 %v905_v17, %v910_v39  ;;  %v870_v0 = vadd.f32 %v869_v60, %v868_v42 }
 0x47e   : > { %v916_v46 = vmax.f32 %v909_v48, %v911_v51  ;;  %v887_v51 = vsel %vm886_vm0, %v1479_v58, %v885_v14 }
 0x482   : > { %v855_v52 = vpop.f32.mrf.mxu3 }
 0x483   : > { %v912_v57 = vsel %vm903_vm2, %v855_v52, -inf  ;;  %v871_v63 = vsel %vm636_vm6, %v855_v52, 0.0 }
 0x484   : > { %v913_v40 = vmax.f32 %v906_v54, %v912_v57  ;;  %v872_v2 = vadd.f32 %v871_v63, %v870_v0 }
 0x48a   : > { %v857_v44 = vpop.f32.mrf.mxu3 }
 0x48b   : > { %v873_v20 = vsel %vm636_vm6, %v857_v44, 0.0  ;;  %v914_v12 = vsel %vm903_vm2, %v857_v44, -inf }
 0x48c   : > { %v874_v16 = vadd.f32 %v873_v20, %v872_v2  ;;  %v915_v28 = vmax.f32 %v907_v11, %v914_v12 }
 0x48e   : > { %v875_v4 = vrot.slane %v874_v16, 4  ;;  %v917_v8 = vmax.f32 %v913_v40, %v915_v28 }
 0x490   : > { %v876_v27 = vadd.f32 %v875_v4, %v874_v16  ;;  %v918_v29 = vmax.f32 %v916_v46, %v917_v8 }
 0x492   : > { %v877_v32 = vrot.slane %v876_v27, 2  ;;  %v919_v10 = vrot.slane %v918_v29, 4 }
 0x494   : > { %v878_v1 = vadd.f32 %v877_v32, %v876_v27  ;;  %v920_v17 = vmax.f32 %v918_v29, %v919_v10 }
 0x496   : > { %v879_v39 = vrot.slane %v878_v1, 1  ;;  %v921_v48 = vrot.slane %v920_v17, 2 }
 0x498   : > { %v880_v55 = vadd.f32 %v879_v39, %v878_v1  ;;  %v922_v43 = vmax.f32 %v920_v17, %v921_v48 }
 0x49a   : > { %v923_v21 = vrot.slane %v922_v43, 1  ;;  %v1932_v47 = vmul.f32 %v887_v51, %v880_v55 }
 0x49c   : > { %v924_v49 = vmax.f32 %v922_v43, %v923_v21  ;;  %890 = vrot.lane.b32.xlu1 %v1932_v47, %s1541_s20 }
 0x49e   : > { %v925_v46 = vsub.f32 %v1896_v18, %v924_v49  ;;  %v926_v50 = vsub.f32 %v1900_v13, %v924_v49  ;;  %v927_v54 = vsub.f32 %v1892_v36, %v924_v49  ;;  %v928_v56 = vsub.f32 %v1894_v38, %v924_v49 }
 0x49f   : > { %v929_v57 = vsub.f32 %v1898_v19, %v924_v49  ;;  %v930_v58 = vsub.f32 %v1906_v62, %v924_v49  ;;  %v931_v59 = vsub.f32 %v855_v52, %v924_v49  ;;  %v932_v40 = vsub.f32 %v857_v44, %v924_v49 }
 0x4a0   : > { %v933_v60 = vmul.f32 1.442695, %v925_v46  ;;  %v935_v42 = vmul.f32 1.442695, %v926_v50  ;;  %v937_v63 = vmul.f32 1.442695, %v927_v54 }
 0x4a1   : > { %v939_v41 = vmul.f32 1.442695, %v928_v56  ;;  %v941_v0 = vmul.f32 1.442695, %v929_v57  ;;  %v943_v36 = vmul.f32 1.442695, %v930_v58 }
 0x4a2   : > { %1480 = vpow2.f32 %v933_v60  ;;  %v945_v38 = vmul.f32 1.442695, %v931_v59  ;;  %v947_v13 = vmul.f32 1.442695, %v932_v40 }
 0x4a3   : > { %1482 = vpow2.f32 %v935_v42 }
 0x4a4   : > { %1484 = vpow2.f32 %v937_v63  ;;  %895 = vrot.lane.b32.xlu1 %v1932_v47, %s1542_s21 }
 0x4a5   : > { %1486 = vpow2.f32 %v939_v41 }
 0x4a6   : > { %1488 = vpow2.f32 %v941_v0 }
 0x4a7   : > { %1490 = vpow2.f32 %v943_v36 }
 0x4a8   : > { %v1481_v18 = vpop.eup %1480  ;;  %1492 = vpow2.f32 %v945_v38 }
 0x4a9   : > { %v1483_v19 = vpop.eup %1482  ;;  %v949_v62 = vsel %vm903_vm2, %v1481_v18, 0.0  ;;  %1494 = vpow2.f32 %v947_v13 }
 0x4aa   : > { %v1485_v52 = vpop.eup %1484  ;;  %v950_v2 = vsel %vm903_vm2, %v1483_v19, 0.0 }
 0x4ab   : > { %v1487_v44 = vpop.eup %1486  ;;  %v951_v11 = vadd.f32 %v950_v2, %v949_v62  ;;  %v952_v20 = vsel %vm903_vm2, %v1485_v52, 0.0 }
 0x4ac   : > { %v1489_v12 = vpop.eup %1488  ;;  %v954_v16 = vsel %vm903_vm2, %v1487_v44, 0.0 }
 0x4ad   : > { %v953_v45 = vadd.f32 %v952_v20, %v951_v11  ;;  %v1491_v28 = vpop.eup %1490  ;;  %v956_v8 = vsel %vm903_vm2, %v1489_v12, 0.0 }
 0x4ae   : > { %v1493_v26 = vpop.eup %1492  ;;  %v958_v29 = vsel %vm903_vm2, %v1491_v28, 0.0 }
 0x4af   : > { %v955_v4 = vadd.f32 %v954_v16, %v953_v45  ;;  %v1495_v32 = vpop.eup %1494  ;;  %v960_v14 = vsel %vm903_vm2, %v1493_v26, 0.0 }
 0x4b0   : > { %v962_v17 = vsel %vm903_vm2, %v1495_v32, 0.0 }
 0x4b1   : > { %v957_v27 = vadd.f32 %v956_v8, %v955_v4 }
 0x4b3   : > { %v959_v10 = vadd.f32 %v958_v29, %v957_v27 }
 0x4b5   : > { %v961_v1 = vadd.f32 %v960_v14, %v959_v10 }
 0x4b7   : > { %v963_v39 = vadd.f32 %v962_v17, %v961_v1 }
 0x4b9   : > { %v964_v48 = vrot.slane %v963_v39, 4 }
 0x4bb   : > { %v965_v51 = vadd.f32 %v964_v48, %v963_v39 }
 0x4bd   : > { %v966_v55 = vrot.slane %v965_v51, 2 }
 0x4bf   : > { %v967_v43 = vadd.f32 %v966_v55, %v965_v51 }
 0x4c1   : > { %v968_v21 = vrot.slane %v967_v43, 1 }
 0x4c3   : > { %v969_v49 = vadd.f32 %v968_v21, %v967_v43 }
 0x4c5   : > { %1496 = vrcp.f32 %v969_v49  ;;  %v981_v56 = vand.u32 2147483648, %v969_v49  ;;  %v979_v58 = vand.u32 2147483647, %v969_v49  ;;  %vm975_vm4 = vweird.f32 %v969_v49 }
 0x4c7   : > { %v982_v40 = vor.u32 1.1754944e-38, %v981_v56  ;;  %vm980_vm7 = vcmp.eq.f32.partialorder %v979_v58, 8.507059e+37 }
 0x4cb   : > { %v1497_v46 = vpop.eup %1496 }
 0x4cc   : > { %v971_v50 = vmul.f32 %v1497_v46, %v969_v49  ;;  %vm976_vm3 = vweird.f32 %v1497_v46 }
 0x4cd   : > { %vm977_vm5 = vmor %vm975_vm4, %vm976_vm3 }
 0x4ce   : > { %v972_v54 = vsub.f32 1.0, %v971_v50 }
 0x4d0   : > { %v973_v57 = vmul.f32 %v1497_v46, %v972_v54 }
 0x4d2   : > { %v974_v59 = vadd.f32 %v1497_v46, %v973_v57 }
 0x4d4   : > { %v978_v60 = vsel %vm977_vm5, %v1497_v46, %v974_v59 }
 0x4d5   : > { %v983_v42 = vsel %vm980_vm7, %v982_v40, %v978_v60 }
 0x4d6   : > { %v988_v63 = vmul.f32 %v1489_v12, %v983_v42  ;;  %v986_v41 = vmul.f32 %v1485_v52, %v983_v42  ;;  %v984_v0 = vmul.f32 %v1481_v18, %v983_v42  ;;  %v991_v36 = vmul.f32 %v1495_v32, %v983_v42 }
 0x4d7   : > { %v985_v38 = vmul.f32 %v1483_v19, %v983_v42  ;;  %v987_v13 = vmul.f32 %v1487_v44, %v983_v42  ;;  %v989_v62 = vmul.f32 %v1491_v28, %v983_v42  ;;  %v990_v2 = vmul.f32 %v1493_v26, %v983_v42 }
 0x50e   : > { %v891_v11 = vpop.permute.xlu1 %890 }
 0x50f   : > { %v894_v45 = vsel %vm893_vm8, -inf, %v891_v11 }
 0x516   : > { %v896_v20 = vpop.permute.xlu1 %895 }
 0x517   : > { %v899_v16 = vsel %vm898_vm9, %v896_v20, -inf }
 0x518   : > { %v900_v4 = vmax.f32 %v894_v45, %v899_v16 }
 0x51a   : > { %v901_v8 = vmax.f32 %v900_v4, %v1932_v47 }
 0x51c   : > { %v902_v27 = vadd.f32 %v901_v8, %v1932_v47 }
 0x51e   : > { %v992_v29 = vperm.slane %v902_v27, 0 }
 0x520   : > { %994 = vrot.lane.b32.xlu1 %v992_v29, %s1543_s22 }
 0x592   : > { %v995_v18 = vpop.permute.xlu1 %994 }
 0x593   : > { %v1001_v52 = vmul.f32 %v995_v18, %v988_v63  ;;  %v999_v19 = vmul.f32 %v995_v18, %v986_v41  ;;  %v997_v44 = vmul.f32 %v995_v18, %v984_v0  ;;  %v1004_v12 = vmul.f32 %v995_v18, %v991_v36 }
 0x594   : > { %v998_v28 = vmul.f32 %v995_v18, %v985_v38  ;;  %v1000_v26 = vmul.f32 %v995_v18, %v987_v13  ;;  %v1002_v32 = vmul.f32 %v995_v18, %v989_v62  ;;  %v1003_v47 = vmul.f32 %v995_v18, %v990_v2 }
 0x595   : > { %1021 = vrot.lane.b32.xlu0 %v1001_v52, %s1544_s23  ;;  %1017 = vrot.lane.b32.xlu2 %v999_v19, %s1544_s23 }
 0x596   : > { %1013 = vrot.lane.b32.xlu1 %v997_v44, %s1544_s23 }
 0x59d   : > { %1027 = vrot.lane.b32.xlu2 %v1004_v12, %s1544_s23 }
 0x59e   : > { %1015 = vrot.lane.b32.xlu1 %v998_v28, %s1544_s23 }
 0x5a6   : > { %1019 = vrot.lane.b32.xlu1 %v1000_v26, %s1544_s23 }
 0x5ae   : > { %1023 = vrot.lane.b32.xlu1 %v1002_v32, %s1544_s23 }
 0x5b6   : > { %1025 = vrot.lane.b32.xlu1 %v1003_v47, %s1544_s23 }
 0x5ef   : > { %v1018_v10 = vpop.permute.xlu2 %1017 }
 0x5f0   : > { %v1043_v14 = vsel %vm636_vm6, %v1018_v10, 0.0 }
 0x5f1   : > { %1044 = vadd.xlane.f32.xlu2 %v1043_v14 }
 0x5f7   : > { %v1028_v49 = vpop.permute.xlu2 %1027 }
 0x5f8   : > { %v1058_v50 = vsel %vm636_vm6, %v1028_v49, 0.0 }
 0x607   : > { %v1022_v51 = vpop.permute.xlu0 %1021 }
 0x608   : > { %v1014_v1 = vpop.permute.xlu1 %1013  ;;  %v1049_v43 = vsel %vm636_vm6, %v1022_v51, 0.0 }
 0x609   : > { %v1037_v17 = vsel %vm636_vm6, %v1014_v1, 0.0 }
 0x60a   : > { %1038 = vadd.xlane.f32.xlu0 %v1037_v17 }
 0x610   : > { %v1016_v39 = vpop.permute.xlu1 %1015 }
 0x611   : > { %v1040_v48 = vsel %vm636_vm6, %v1016_v39, 0.0 }
 0x612   : > { %1041 = vadd.xlane.f32.xlu1 %v1040_v48 }
 0x618   : > { %v1020_v55 = vpop.permute.xlu1 %1019 }
 0x619   : > { %v1046_v21 = vsel %vm636_vm6, %v1020_v55, 0.0 }
 0x61a   : > { %1050 = vadd.xlane.f32.xlu1 %v1049_v43  ;;  %1047 = vadd.xlane.f32.xlu0 %v1046_v21 }
 0x620   : > { %v1024_v46 = vpop.permute.xlu1 %1023 }
 0x621   : > { %v1052_v54 = vsel %vm636_vm6, %v1024_v46, 0.0 }
 0x622   : > { %1059 = vadd.xlane.f32.xlu1 %v1058_v50  ;;  %1053 = vadd.xlane.f32.xlu2 %v1052_v54 }
 0x628   : > { %v1026_v56 = vpop.permute.xlu1 %1025 }
 0x629   : > { %v1055_v57 = vsel %vm636_vm6, %v1026_v56, 0.0 }
 0x62a   : > { %1056 = vadd.xlane.f32.xlu0 %v1055_v57 }
 0x664   : > { %v1045_v58 = vpop.xlane.xlu2 %1044 }
 0x665   : > { %v1369_v59 = vmul.f32 -1.442695, %v1045_v58 }
 0x667   : > { %1498 = vpow2.f32 %v1369_v59 }
 0x66d   : > { %v1499_v40 = vpop.eup %1498 }
 0x66e   : > { %v1087_v60 = vadd.f32 1.0, %v1499_v40 }
 0x670   : > { %1500 = vrcp.f32 %v1087_v60  ;;  %v1134_v0 = vand.u32 2147483648, %v1087_v60  ;;  %v1132_v38 = vand.u32 2147483647, %v1087_v60  ;;  %vm1128_vm11 = vweird.f32 %v1087_v60 }
 0x672   : > { %v1135_v2 = vor.u32 1.1754944e-38, %v1134_v0  ;;  %vm1133_vm6 = vcmp.eq.f32.partialorder %v1132_v38, 8.507059e+37 }
 0x676   : > { %v1501_v42 = vpop.eup %1500 }
 0x677   : > { %v1124_v63 = vmul.f32 %v1501_v42, %v1087_v60  ;;  %vm1129_vm10 = vweird.f32 %v1501_v42 }
 0x678   : > { %vm1130_vm12 = vmor %vm1128_vm11, %vm1129_vm10 }
 0x679   : > { %v1125_v41 = vsub.f32 1.0, %v1124_v63 }
 0x67b   : > { %v1126_v36 = vmul.f32 %v1501_v42, %v1125_v41 }
 0x67d   : > { %v1127_v13 = vadd.f32 %v1501_v42, %v1126_v36  ;;  %v1039_v62 = vpop.xlane.xlu0 %1038 }
 0x67e   : > { %v1367_v11 = vmul.f32 -1.442695, %v1039_v62 }
 0x67f   : > { %v1131_v20 = vsel %vm1130_vm12, %v1501_v42, %v1127_v13 }
 0x680   : > { %v1136_v45 = vsel %vm1133_vm6, %v1135_v2, %v1131_v20  ;;  %1502 = vpow2.f32 %v1367_v11 }
 0x681   : > { %v1215_v16 = vmul.f32 %v1136_v45, %v1854_v53 }
 0x683   : > { %v1223_v4 = vadd.f32 %v1394_v24, %v1215_v16 }
 0x685   : > { %v1231_v8 = vpack.c.bf16 %v1223_v4, %v1223_v4  ;;  %v1042_v27 = vpop.xlane.xlu1 %1041 }
 0x686   : > { %v1503_v29 = vpop.eup %1502  ;;  %v1368_v18 = vmul.f32 -1.442695, %v1042_v27 }
 0x687   : > { %1240 = vst.msk [vmem:[%s1967_s26 + $0x8] sm:$0xf] %vm1237_vm13, %v1231_v8  ;;  %v1085_v52 = vadd.f32 1.0, %v1503_v29 }
 0x688   : > { %1504 = vpow2.f32 %v1368_v18 }
 0x689   : > { %1506 = vrcp.f32 %v1085_v52  ;;  %v1104_v10 = vand.u32 2147483648, %v1085_v52  ;;  %v1102_v1 = vand.u32 2147483647, %v1085_v52  ;;  %vm1098_vm15 = vweird.f32 %v1085_v52 }
 0x68b   : > { %v1105_v21 = vor.u32 1.1754944e-38, %v1104_v10  ;;  %vm1103_vm2 = vcmp.eq.f32.partialorder %v1102_v1, 8.507059e+37 }
 0x68d   : > { %v1048_v53 = vpop.xlane.xlu0 %1047  ;;  %v1051_v19 = vpop.xlane.xlu1 %1050 }
 0x68e   : > { %v1505_v44 = vpop.eup %1504  ;;  %v1370_v24 = vmul.f32 -1.442695, %v1048_v53  ;;  %v1371_v12 = vmul.f32 -1.442695, %v1051_v19 }
 0x68f   : > { %v1507_v28 = vpop.eup %1506  ;;  %v1086_v26 = vadd.f32 1.0, %v1505_v44 }
 0x690   : > { %v1094_v32 = vmul.f32 %v1507_v28, %v1085_v52  ;;  %1508 = vpow2.f32 %v1370_v24  ;;  %vm1099_vm14 = vweird.f32 %v1507_v28 }
 0x691   : > { %1510 = vrcp.f32 %v1086_v26  ;;  %vm1100_vm1 = vmor %vm1098_vm15, %vm1099_vm14  ;;  %v1117_v60 = vand.u32 2147483647, %v1086_v26  ;;  %v1119_v42 = vand.u32 2147483648, %v1086_v26  ;;  %vm1113_vm3 = vweird.f32 %v1086_v26 }
 0x692   : > { %v1095_v47 = vsub.f32 1.0, %v1094_v32  ;;  %1512 = vpow2.f32 %v1371_v12 }
 0x693   : > { %v1120_v2 = vor.u32 1.1754944e-38, %v1119_v42  ;;  %vm1118_vm5 = vcmp.eq.f32.partialorder %v1117_v60, 8.507059e+37 }
 0x694   : > { %v1096_v14 = vmul.f32 %v1507_v28, %v1095_v47 }
 0x695   : > { %v1054_v17 = vpop.xlane.xlu2 %1053  ;;  %v1060_v39 = vpop.xlane.xlu1 %1059 }
 0x696   : > { %v1509_v48 = vpop.eup %1508  ;;  %v1097_v51 = vadd.f32 %v1507_v28, %v1096_v14  ;;  %v1372_v55 = vmul.f32 -1.442695, %v1054_v17  ;;  %v1374_v46 = vmul.f32 -1.442695, %v1060_v39 }
 0x697   : > { %v1511_v43 = vpop.eup %1510  ;;  %v1971_v49 = vadd.f32 1.0, %v1509_v48 }
 0x698   : > { %v1513_v50 = vpop.eup %1512  ;;  %v1101_v54 = vsel %vm1100_vm1, %v1507_v28, %v1097_v51  ;;  %v1109_v56 = vmul.f32 %v1511_v43, %v1086_v26  ;;  %1514 = vpow2.f32 %v1372_v55  ;;  %vm1114_vm0 = vweird.f32 %v1511_v43 }
 0x699   : > { %v1106_v57 = vsel %vm1103_vm2, %v1105_v21, %v1101_v54  ;;  %1516 = vrcp.f32 %v1971_v49  ;;  %v1975_v40 = vadd.f32 1.0, %v1513_v50  ;;  %vm1115_vm4 = vmor %vm1113_vm3, %vm1114_vm0  ;;  %v1149_v29 = vand.u32 2147483648, %v1971_v49 }
 0x69a   : > { %v1213_v58 = vmul.f32 %v1106_v57, %v1846_v30  ;;  %v1110_v59 = vsub.f32 1.0, %v1109_v56  ;;  %1518 = vpow2.f32 %v1374_v46  ;;  %v1147_v52 = vand.u32 2147483647, %v1971_v49 }
 0x69b   : > { %1520 = vrcp.f32 %v1975_v40  ;;  %vm1143_vm8 = vweird.f32 %v1971_v49  ;;  %v1150_v26 = vor.u32 1.1754944e-38, %v1149_v29  ;;  %v1164_v32 = vand.u32 2147483648, %v1975_v40 }
 0x69c   : > { %v1221_v63 = vadd.f32 %v1390_v6, %v1213_v58  ;;  %v1111_v41 = vmul.f32 %v1511_v43, %v1110_v59  ;;  %v1162_v3 = vand.u32 2147483647, %v1975_v40  ;;  %vm1148_vm11 = vcmp.eq.f32.partialorder %v1147_v52, 8.507059e+37 }
 0x69d   : > { %v1057_v0 = vpop.xlane.xlu0 %1056  ;;  %vm1158_vm12 = vweird.f32 %v1975_v40  ;;  %v1165_v55 = vor.u32 1.1754944e-38, %v1164_v32 }
 0x69e   : > { %v1515_v36 = vpop.eup %1514  ;;  %v1229_v38 = vpack.c.bf16 %v1221_v63, %v1221_v63  ;;  %v1112_v13 = vadd.f32 %v1511_v43, %v1111_v41  ;;  %v1373_v30 = vmul.f32 -1.442695, %v1057_v0  ;;  %vm1163_vm14 = vcmp.eq.f32.partialorder %v1162_v3, 8.507059e+37 }
 0x69f   : > { %v1517_v62 = vpop.eup %1516  ;;  %v1980_v11 = vadd.f32 1.0, %v1515_v36 }
 0x6a0   : > { %1238 = vst.msk [vmem:[%s1967_s26] sm:$0xf] %vm1237_vm13, %v1229_v38  ;;  %v1116_v20 = vsel %vm1115_vm4, %v1511_v43, %v1112_v13  ;;  %v1139_v6 = vmul.f32 %v1517_v62, %v1971_v49  ;;  %1522 = vpow2.f32 %v1373_v30  ;;  %v1519_v45 = vpop.eup %1518  ;;  %vm1144_vm7 = vweird.f32 %v1517_v62 }
 0x6a1   : > { %v1121_v16 = vsel %vm1118_vm5, %v1120_v2, %v1116_v20  ;;  %1524 = vrcp.f32 %v1980_v11  ;;  %v1521_v4 = vpop.eup %1520  ;;  %v1988_v18 = vadd.f32 1.0, %v1519_v45  ;;  %vm1145_vm9 = vmor %vm1143_vm8, %vm1144_vm7  ;;  %v1179_v21 = vand.u32 2147483648, %v1980_v11 }
 0x6a2   : > { %v1214_v8 = vmul.f32 %v1121_v16, %v1850_v61  ;;  %v1140_v27 = vsub.f32 1.0, %v1139_v6  ;;  %v1154_v53 = vmul.f32 %v1521_v4, %v1975_v40  ;;  %vm1159_vm10 = vweird.f32 %v1521_v4 }
 0x6a3   : > { %1526 = vrcp.f32 %v1988_v18  ;;  %vm1160_vm6 = vmor %vm1158_vm12, %vm1159_vm10  ;;  %v1177_v46 = vand.u32 2147483647, %v1980_v11  ;;  %vm1173_vm1 = vweird.f32 %v1980_v11  ;;  %v1180_v60 = vor.u32 1.1754944e-38, %v1179_v21 }
 0x6a4   : > { %v1222_v19 = vadd.f32 %v1391_v7, %v1214_v8  ;;  %v1141_v44 = vmul.f32 %v1517_v62, %v1140_v27  ;;  %v1155_v61 = vsub.f32 1.0, %v1154_v53  ;;  %v1209_v42 = vand.u32 2147483648, %v1988_v18 }
 0x6a5   : > { %vm1178_vm3 = vcmp.eq.f32.partialorder %v1177_v46, 8.507059e+37  ;;  %vm1203_vm4 = vweird.f32 %v1988_v18  ;;  %v2057_v27 = vunpack.c.h.bf16 %v1638_v5 }
 0x6a6   : > { %v1523_v24 = vpop.eup %1522  ;;  %v1230_v12 = vpack.c.bf16 %v1222_v19, %v1222_v19  ;;  %v1142_v28 = vadd.f32 %v1517_v62, %v1141_v44  ;;  %v1156_v10 = vmul.f32 %v1521_v4, %v1155_v61 }
 0x6a7   : > { %v1525_v47 = vpop.eup %1524  ;;  %v1998_v7 = vadd.f32 1.0, %v1523_v24 }
 0x6a8   : > { %1239 = vst.msk [vmem:[%s1967_s26 + $0x4] sm:$0xf] %vm1237_vm13, %v1230_v12  ;;  %v1146_v14 = vsel %vm1145_vm9, %v1517_v62, %v1142_v28  ;;  %v1169_v1 = vmul.f32 %v1525_v47, %v1980_v11  ;;  %v1157_v39 = vadd.f32 %v1521_v4, %v1156_v10  ;;  %vm1174_vm15 = vweird.f32 %v1525_v47 }
 0x6a9   : > { %v1151_v17 = vsel %vm1148_vm11, %v1150_v26, %v1146_v14  ;;  %1528 = vrcp.f32 %v1998_v7  ;;  %v1527_v48 = vpop.eup %1526  ;;  %vm1175_vm2 = vmor %vm1173_vm1, %vm1174_vm15  ;;  %v1192_v11 = vand.u32 2147483647, %v1998_v7  ;;  %v1194_v20 = vand.u32 2147483648, %v1998_v7 }
 0x6aa   : > { %v1216_v51 = vmul.f32 %v1151_v17, %v1858_v15  ;;  %v1170_v43 = vsub.f32 1.0, %v1169_v1  ;;  %v1161_v49 = vsel %vm1160_vm6, %v1521_v4, %v1157_v39  ;;  %v1199_v50 = vmul.f32 %v1527_v48, %v1988_v18 }
 0x6ab   : > { %v1166_v56 = vsel %vm1163_vm14, %v1165_v55, %v1161_v49  ;;  %vm1204_vm0 = vweird.f32 %v1527_v48  ;;  %vm1188_vm9 = vweird.f32 %v1998_v7  ;;  %vm1193_vm11 = vcmp.eq.f32.partialorder %v1192_v11, 8.507059e+37 }
 0x6ac   : > { %v1224_v54 = vadd.f32 %v1395_v25, %v1216_v51  ;;  %v1171_v57 = vmul.f32 %v1525_v47, %v1170_v43  ;;  %v1217_v15 = vmul.f32 %v1166_v56, %v1870_v9  ;;  %v1200_v58 = vsub.f32 1.0, %v1199_v50  ;;  %vm1205_vm5 = vmor %vm1203_vm4, %vm1204_vm0 }
 0x6ad   : > { %v1207_v25 = vand.u32 2147483647, %v1988_v18  ;;  %v1195_v18 = vor.u32 1.1754944e-38, %v1194_v20 }
 0x6ae   : > { %v1232_v59 = vpack.c.bf16 %v1224_v54, %v1224_v54  ;;  %v1172_v40 = vadd.f32 %v1525_v47, %v1171_v57  ;;  %v1225_v41 = vadd.f32 %v1398_v33, %v1217_v15  ;;  %v1201_v22 = vmul.f32 %v1527_v48, %v1200_v58 }
 0x6af   : > { %v1529_v63 = vpop.eup %1528  ;;  %v1210_v33 = vor.u32 1.1754944e-38, %v1209_v42  ;;  %vm1208_vm7 = vcmp.eq.f32.partialorder %v1207_v25, 8.507059e+37 }
 0x6b0   : > { %1241 = vst.msk [vmem:[%s1967_s26 + $0xc] sm:$0xf] %vm1237_vm13, %v1232_v59  ;;  %v1176_v9 = vsel %vm1175_vm2, %v1525_v47, %v1172_v40  ;;  %v1184_v0 = vmul.f32 %v1529_v63, %v1998_v7  ;;  %v1233_v36 = vpack.c.bf16 %v1225_v41, %v1225_v41  ;;  %v1202_v13 = vadd.f32 %v1527_v48, %v1201_v22 }
 0x6b1   : > { %v1181_v38 = vsel %vm1178_vm3, %v1180_v60, %v1176_v9  ;;  %vm1189_vm8 = vweird.f32 %v1529_v63 }
 0x6b2   : > { %v1218_v30 = vmul.f32 %v1181_v38, %v1874_v23  ;;  %v1185_v62 = vsub.f32 1.0, %v1184_v0  ;;  %1242 = vst.msk [vmem:[%s1967_s26 + $0x10] sm:$0xf] %vm1237_vm13, %v1233_v36  ;;  %v1206_v2 = vsel %vm1205_vm5, %v1527_v48, %v1202_v13  ;;  %vm1190_vm10 = vmor %vm1188_vm9, %vm1189_vm8 }
 0x6b3   : > { %v1211_v45 = vsel %vm1208_vm7, %v1210_v33, %v1206_v2 }
 0x6b4   : > { %v1226_v6 = vadd.f32 %v1399_v34, %v1218_v30  ;;  %v1186_v16 = vmul.f32 %v1529_v63, %v1185_v62  ;;  %v1220_v23 = vmul.f32 %v1211_v45, %v1887_v35  ;;  %v2058_v35 = vunpack.c.l.bf16 %v1638_v5 }
 0x6b6   : > { %v1234_v4 = vpack.c.bf16 %v1226_v6, %v1226_v6  ;;  %v1187_v8 = vadd.f32 %v1529_v63, %v1186_v16  ;;  %v1228_v29 = vadd.f32 %v2057_v27, %v1220_v23 }
 0x6b8   : > { %1243 = vst.msk [vmem:[%s1967_s26 + $0x14] sm:$0xf] %vm1237_vm13, %v1234_v4  ;;  %v1191_v31 = vsel %vm1190_vm10, %v1529_v63, %v1187_v8  ;;  %v1236_v34 = vpack.c.bf16 %v1228_v29, %v1228_v29 }
 0x6b9   : > { %v1196_v52 = vsel %vm1193_vm11, %v1195_v18, %v1191_v31 }
 0x6ba   : > { %v1219_v53 = vmul.f32 %v1196_v52, %v1883_v37  ;;  %1245 = vst.msk [vmem:[%s1967_s26 + $0x1c] sm:$0xf] %vm1237_vm13, %v1236_v34 }
 0x6bc   : > { %v1227_v19 = vadd.f32 %v2058_v35, %v1219_v53 }
 0x6be   : > { %v1235_v44 = vpack.c.bf16 %v1227_v19, %v1227_v19 }
 0x6c0   : > { %1244 = vst.msk [vmem:[%s1967_s26 + $0x18] sm:$0xf] %vm1237_vm13, %v1235_v44 }
 0x6c1 PF: > { %s20_s13 = sadd.s32 1, %s1536_s13  }
 0x6c2   : > { %p17_p4 = scmp.ge.s32.totalorder %s20_s13, 4  }
 0x6c4   :  { %19 = sbr.rel (!%p17_p4) target bundleno = 1 (0x1), region = 93 }

// kernel: ccf_forward.5
= control target key start
LH: loop header
LB: loop body
LE: loop exit
PB: predicated region body
PF: predicated region fallthrough
CT: control target
= control target key end

     0   :  { %12 = vsyncpa [#allocation4], 0  ;;  %s2099_s0 = inlined_call_operand.vmem [shape: bf16[2,1,5,5,64], index: 0, kind: input, shape index: {}]   ;;  %s2100_s1 = inlined_call_operand.vmem [shape: bf16[2,1,5,5,64], index: 1, kind: input, shape index: {}]   ;;  %s2101_s2 = inlined_call_operand.vmem [shape: bf16[2,1,5,5,64], index: 2, kind: input, shape index: {}]   ;;  %s2102_s3 = inlined_call_operand.vmem [shape: bf16[2,1,5,5,64], index: 3, kind: input, shape index: {}]   ;;  %s2103_s4 = inlined_call_operand.vmem [shape: bf16[576,64], index: 4, kind: input, shape index: {}]   ;;  %s2104_s5 = inlined_call_operand.vmem [shape: f32[1,64], index: 5, kind: input, shape index: {}]   ;;  %s2105_s6 = inlined_call_operand.vmem [shape: f32[1,64], index: 6, kind: input, shape index: {}]   ;;  %s2106_s7 = inlined_call_operand.hbm [shape: f32[2,16,64], index: 7, kind: output, shape index: {}]  }
   0x1   :  { %14 = vsyncpa [#allocation4 + $0x1], 0  ;;  %s1783_s24 = smov 0   ;;  %s1785_s25 = smov 0  }
   0x2   :  { %s1787_s26 = smov 0   ;;  %s1789_s27 = smov 0  }
   0x3   :  { %s1791_s28 = smov 0   ;;  %s1793_s29 = smov 0  }
   0x4 LB: > { %s1347_s30 = sadd.s32 4294967295, %s1738_s29   ;;  %s1348_s8 = sadd.s32 4294967294, %s1738_s29   ;;  %s1738_s29 = sphi %s1793_s29, %s20_s29   ;;  %s1734_s28 = sphi %s1791_s28, %s2113_s28   ;;  %s1730_s27 = sphi %s1789_s27, %s2112_s27   ;;  %s1726_s26 = sphi %s1787_s26, %s2111_s26   ;;  %s1722_s25 = sphi %s1785_s25, %s2110_s25   ;;  %s1718_s24 = sphi %s1783_s24, %s2109_s24  }
   0x5   : > { %s32_s9 = sadd.s32 1, %s1734_s28  ;;  %s216_s10 = sadd.s32 1, %s1726_s26 }
   0x6   : > { %p34_p0 = scmp.ge.s32.totalorder %s32_s9, 2  ;;  %p226_p1 = scmp.ne.s32.totalorder %s1726_s26, %s1722_s25 }
   0x7   : > { %p227_p2 = scmp.eq.s32.totalorder %s1347_s30, 1  ;;  %p232_p3 = scmp.ne.s32.totalorder %s1722_s25, %s1718_s24 }
   0x8   : > { %s2115_s9 = smov (%p34_p0, %s32_s9), 0  ;;  %p233_p5 = scmp.eq.s32.totalorder %s1348_s8, 1 }
   0x9   : > { %p1823_p4 = por %p227_p2, %p226_p1  ;;  %s211_s12 = ssub.s32 %s1734_s28, %s2115_s9 }
   0xa   : > { %p1351_p6 = scmp.ge.s32.totalorder %s1738_s29, 1  ;;  %p214_p7 = scmp.eq.s32.totalorder %s211_s12, 0 }
   0xb   : > { %p1830_p8 = por %p233_p5, %p232_p3  ;;  %p308_p9 = scmp.lt.s32.totalorder %s1738_s29, 3 }
   0xc   : > { %s1836_s14 = scalar_select %p214_p7, %s1726_s26, %s216_s10  }
   0xd   : > { %p309_p10 = pnand %p1351_p6, %p308_p9 }
   0xe   : > { %p371_p11 = scmp.lt.s32.totalorder (!%p309_p10), %s1730_s27, 1  ;;  %s1740_s23 = smov (!%p309_p10), 64  }
   0xf   : > { %312 = sbr.rel (%p309_p10) target bundleno = 356 (0x164), region = 48  ;;  %s368_s30 = sand.u32 (!%p309_p10), 1, %s1722_s25  }
  0x14   : > { %s372_s15 = scalar_select %p371_p11, %s1730_s27, 1  ;;  %vm467_vm0 = vcmask 523264   ;;  %vm497_vm1 = vcmask 517120   ;;  %vm591_vm2 = vcmask 519170  }
  0x16   : > { %s1840_s16 = smul.u32 20, %s372_s15  ;;  %s1598_s15 = sshll.u32 %s1730_s27, 4 }
  0x17   : > { %s1185_s27 = scalar_lea.sflag [#allocation4], %s368_s30 }
  0x18   : > { %s1846_s19 = scalar_lea.vmem %s2100_s1, %s1840_s16  ;;  %s1854_s22 = scalar_lea.vmem %s2101_s2, %s1840_s16 }
  0x19   : > { %v1379_v0 = vld [vmem:[%s1846_s19 + $0xc] sm:$0x3]  ;;  %v1361_v1 = vld [vmem:[%s1846_s19 + $0x4] sm:$0x3]  ;;  %v410_v6 = vld [vmem:[%s1846_s19] sm:$0x3]  ;;  %s1890_s10 = scalar_lea.vmem %s2099_s0, %s1840_s16 }
  0x1a   : > { %v697_v2 = vunpack.c.l.b16 %v1379_v0  ;;  %v513_v3 = vunpack.c.l.b16 %v1361_v1  ;;  %v1381_v4 = vld [vmem:[%s1854_s22 + $0xc] sm:$0x3]  ;;  %v1363_v5 = vld [vmem:[%s1854_s22 + $0x4] sm:$0x3]  ;;  %v421_v11 = vunpack.c.l.b16 %v410_v6  ;;  %v412_v13 = vld [vmem:[%s1854_s22] sm:$0x3] }
  0x1b   : > { %v712_v9 = vunpack.c.l.b16 %v1381_v4  ;;  %v528_v10 = vunpack.c.l.b16 %v1363_v5  ;;  %v1383_v12 = vld [vmem:[%s1854_s22 + $0xc] sm:$0x7]  ;;  %v1372_v17 = vld [vmem:[%s1854_s22 + $0x8] sm:$0x3]  ;;  %v436_v20 = vunpack.c.l.b16 %v412_v13  ;;  %v1365_v21 = vld [vmem:[%s1854_s22 + $0x4] sm:$0x7] }
  0x1c   : > { %v698_v7 = vpack.c.b16 %v697_v2, %v697_v2  ;;  %v514_v8 = vpack.c.b16 %v513_v3, %v513_v3  ;;  %v422_v14 = vpack.c.b16 %v421_v11, %v421_v11  ;;  %v1370_v18 = vld [vmem:[%s1846_s19 + $0x8] sm:$0x3]  ;;  %v717_v19 = vunpack.c.l.b16 %v1383_v12  ;;  %v414_v28 = vld [vmem:[%s1854_s22] sm:$0x7]  ;;  %v1385_v44 = vld [vmem:[%s1846_s19 + $0x10] sm:$0x3] }
  0x1d   : > { %v713_v15 = vpack.c.b16 %v712_v9, %v712_v9  ;;  %v529_v16 = vpack.c.b16 %v528_v10, %v528_v10  ;;  %v533_v22 = vunpack.c.l.b16 %v1365_v21  ;;  %v622_v23 = vunpack.c.l.b16 %v1372_v17  ;;  %v1367_v33 = vld [vmem:[%s1846_s19 + $0x8] sm:$0x3]  ;;  %v1358_v48 = vld [vmem:[%s1846_s19 + $0x4] sm:$0x3]  ;;  %v1376_v60 = vld [vmem:[%s1846_s19 + $0xc] sm:$0x3]  ;;  %s1198_s19 = scalar_lea.hbm %s2106_s7, %s1598_s15 }
  0x1e   : > { %699 = vrot.lane.b32.xlu1 %v698_v7, %s1740_s23  ;;  %515 = vrot.lane.b32.xlu0 %v514_v8, %s1740_s23  ;;  %v607_v24 = vunpack.c.l.b16 %v1370_v18  ;;  %v718_v25 = vpack.c.b16 %v717_v19, %v717_v19  ;;  %v437_v26 = vpack.c.b16 %v436_v20, %v436_v20  ;;  %v441_v34 = vunpack.c.l.b16 %v414_v28  ;;  %v1374_v37 = vld [vmem:[%s1854_s22 + $0x8] sm:$0x7]  ;;  %v1569_v0 = vld [vmem:[%s2103_s4 + $0x38] sm:$0xff]  ;;  %s2010_s22 = scalar_lea.vmem %s2102_s3, %s1840_s16  ;;  %s1352_s16 = sshll.u32 %s368_s30, 4 }
  0x1f   : > { %423 = vrot.lane.b32.xlu2 %v422_v14, %s1740_s23  ;;  %v534_v27 = vpack.c.b16 %v533_v22, %v533_v22  ;;  %v623_v30 = vpack.c.b16 %v622_v23, %v622_v23  ;;  %v545_v39 = vunpack.c.l.b16 %v1367_v33  ;;  %v627_v43 = vunpack.c.l.b16 %v1374_v37  ;;  %v1577_v1 = vld [vmem:[%s2103_s4 + $0x78] sm:$0xff]  ;;  %v411_v2 = vld [vmem:[%s1890_s10] sm:$0x7]  ;;  %1098 = vmatpush.bf16.msra.mxu0 %v1569_v0  ;;  %v1568_v4 = vld [vmem:[%s2103_s4 + $0x30] sm:$0xff]  ;;  %s370_s20 = scalar_lea.vmem [#allocation3], %s1352_s16  ;;  %s1680_s16 = scalar_lea.hbm %s2106_s7, 32 }
  0x20   : > { %v608_v31 = vpack.c.b16 %v607_v24, %v607_v24  ;;  %v722_v32 = vshll.u32 %v718_v25, 16  ;;  %v720_v38 = vshrl.u32 %v718_v25, 16  ;;  %v442_v41 = vpack.c.b16 %v441_v34, %v441_v34  ;;  %1112 = vmatpush.bf16.msra.mxu1 %v1577_v1  ;;  %v1576_v5 = vld [vmem:[%s2103_s4 + $0x70] sm:$0xff]  ;;  %v1567_v7 = vld [vmem:[%s2103_s4 + $0x28] sm:$0xff]  ;;  %v1566_v11 = vld [vmem:[%s2103_s4 + $0x20] sm:$0xff]  ;;  %s1199_s21 = sshll.u32 %s370_s20, 4  ;;  %s1200_s21 = int_to_ptr.vmem [resolvable:$true] %s1199_s21 }
  0x21   : > { %v538_v29 = vshll.u32 %v534_v27, 16  ;;  %v536_v35 = vshrl.u32 %v534_v27, 16  ;;  %v546_v45 = vpack.c.b16 %v545_v39, %v545_v39  ;;  %v729_v49 = vunpack.c.l.b16 %v1385_v44  ;;  %v1575_v8 = vld [vmem:[%s2103_s4 + $0x68] sm:$0xff]  ;;  %v1574_v12 = vld [vmem:[%s2103_s4 + $0x60] sm:$0xff]  ;;  %v1573_v17 = vld [vmem:[%s2103_s4 + $0x58] sm:$0xff] }
  0x22   : > { %v724_v40 = vrot.slane %v722_v32, 1  ;;  %v446_v47 = vshll.u32 %v442_v41, 16  ;;  %v628_v50 = vpack.c.b16 %v627_v43, %v627_v43  ;;  %v453_v51 = vunpack.c.l.b16 %v1358_v48  ;;  %v1380_v19 = vld [vmem:[%s1890_s10 + $0xc] sm:$0x7]  ;;  %v1362_v20 = vld [vmem:[%s1890_s10 + $0x4] sm:$0x7] }
  0x23   : > { %v540_v36 = vrot.slane %v538_v29, 1  ;;  %v444_v52 = vshrl.u32 %v442_v41, 16  ;;  %v730_v54 = vpack.c.b16 %v729_v49, %v729_v49  ;;  %v639_v61 = vunpack.c.l.b16 %v1376_v60  ;;  %1099 = vmatpush.bf16.msra.mxu0 %v1568_v4  ;;  %v1572_v27 = vld [vmem:[%s2103_s4 + $0x50] sm:$0xff]  ;;  %v1563_v34 = vld [vmem:[%s2103_s4 + $0x8] sm:$0xff]  ;;  %v1562_v41 = vld [vmem:[%s2103_s4] sm:$0xff] }
  0x24   : > { %v725_v46 = vor.u32 %v724_v40, %v720_v38  ;;  %v448_v53 = vrot.slane %v446_v47, 1  ;;  %v632_v55 = vshll.u32 %v628_v50, 16  ;;  %v454_v57 = vpack.c.b16 %v453_v51, %v453_v51  ;;  %1113 = vmatpush.bf16.msra.mxu1 %v1576_v5  ;;  %v1593_v38 = vld [vmem:[%s2103_s4 + $0xf8] sm:$0xff]  ;;  %v1584_v43 = vld [vmem:[%s2103_s4 + $0xb0] sm:$0xff]  ;;  %v1377_v60 = vld [vmem:[%s1890_s10 + $0xc] sm:$0x7] }
  0x25   : > { %v541_v42 = vor.u32 %v540_v36, %v536_v35  ;;  %v630_v58 = vshrl.u32 %v628_v50, 16  ;;  %v640_v63 = vpack.c.b16 %v639_v61, %v639_v61  ;;  %v426_v3 = vunpack.c.l.b16 %v411_v2  ;;  %v1571_v35 = vld [vmem:[%s2103_s4 + $0x48] sm:$0xff]  ;;  %v1585_v36 = vld [vmem:[%s2103_s4 + $0xb8] sm:$0xff]  ;;  %1140 = vmatpush.bf16.msra.mxu3 %v1593_v38  ;;  %v1386_v61 = vld [vmem:[%s1890_s10 + $0x10] sm:$0x7] }
  0x26   : > { %714 = vrot.lane.b32.xlu1 %v713_v15, %s1740_s23  ;;  %530 = vrot.lane.b32.xlu0 %v529_v16, %s1740_s23  ;;  %v449_v56 = vor.u32 %v448_v53, %v444_v52  ;;  %v634_v59 = vrot.slane %v632_v55, 1  ;;  %v409_v15 = vld [vmem:[%s1890_s10] sm:$0x3]  ;;  %v1565_v16 = vld [vmem:[%s2103_s4 + $0x18] sm:$0xff]  ;;  %v702_v23 = vunpack.c.l.b16 %v1380_v19  ;;  %v518_v24 = vunpack.c.l.b16 %v1362_v20 }
  0x27   : > { %438 = vrot.lane.b32.xlu2 %v437_v26, %s1740_s23  ;;  %v427_v6 = vpack.c.b16 %v426_v3, %v426_v3  ;;  %1100 = vmatpush.bf16.msra.mxu0 %v1567_v7  ;;  %v1564_v26 = vld [vmem:[%s2103_s4 + $0x10] sm:$0xff]  ;;  %v1583_v53 = vld [vmem:[%s2103_s4 + $0xa8] sm:$0xff]  ;;  %v1360_v55 = vld [vmem:[%s1890_s10 + $0x4] sm:$0x3]  ;;  %v734_v0 = vunpack.c.l.b16 %v1386_v61 }
  0x28   : > { %v635_v62 = vor.u32 %v634_v59, %v630_v58  ;;  %1114 = vmatpush.bf16.msra.mxu1 %v1575_v8  ;;  %v519_v32 = vpack.c.b16 %v518_v24, %v518_v24  ;;  %1126 = vmatpush.bf16.msra.mxu2 %v1585_v36  ;;  %v1359_v58 = vld [vmem:[%s1890_s10 + $0x4] sm:$0x7] }
  0x29   : > { %v431_v9 = vshll.u32 %v427_v6, 16  ;;  %v429_v13 = vshrl.u32 %v427_v6, 16  ;;  %v1582_v4 = vld [vmem:[%s2103_s4 + $0xa0] sm:$0xff] }
  0x2a   : > { %v523_v40 = vshll.u32 %v519_v32, 16  ;;  %v521_v51 = vshrl.u32 %v519_v32, 16  ;;  %v1590_v5 = vld [vmem:[%s2103_s4 + $0xe0] sm:$0xff] }
  0x2b   : > { %v433_v14 = vrot.slane %v431_v9, 1  ;;  %1101 = vmatpush.bf16.msra.mxu0 %v1566_v11 }
  0x2c   : > { %1115 = vmatpush.bf16.msra.mxu1 %v1574_v12  ;;  %1127 = vmatpush.bf16.msra.mxu2 %v1584_v43  ;;  %v525_v52 = vrot.slane %v523_v40, 1 }
  0x2d   : > { %v434_v21 = vor.u32 %v433_v14, %v429_v13 }
  0x2e   : > { %624 = vrot.lane.b32.xlu1 %v623_v30, %s1740_s23  ;;  %609 = vrot.lane.b32.xlu0 %v608_v31, %s1740_s23  ;;  %v1371_v30 = vld [vmem:[%s1890_s10 + $0x8] sm:$0x7]  ;;  %v703_v31 = vpack.c.b16 %v702_v23, %v702_v23  ;;  %v526_v3 = vor.u32 %v525_v52, %v521_v51  ;;  %v1589_v23 = vld [vmem:[%s2103_s4 + $0xd8] sm:$0xff] }
  0x2f   : > { %542 = vrot.lane.b32.xlu2 %v541_v42, %s1740_s23  ;;  %1102 = vmatpush.bf16.msra.mxu0 %v1565_v16  ;;  %v612_v37 = vunpack.c.l.b16 %v1371_v30  ;;  %v1570_v42 = vld [vmem:[%s2103_s4 + $0x40] sm:$0xff]  ;;  %v1596_v51 = vld [vmem:[%s2103_s4 + $0x110] sm:$0xff] }
  0x30   : > { %1116 = vmatpush.bf16.msra.mxu1 %v1573_v17  ;;  %v707_v39 = vshll.u32 %v703_v31, 16  ;;  %v705_v49 = vshrl.u32 %v703_v31, 16  ;;  %1128 = vmatpush.bf16.msra.mxu2 %v1583_v53  ;;  %v1579_v53 = vld [vmem:[%s2103_s4 + $0x88] sm:$0xff] }
  0x31   : > { %v1956_v44 = vpack.c.b16 %v612_v37, %v612_v37 }
  0x32   : > { %v709_v50 = vrot.slane %v707_v39, 1 }
  0x33   : > { %1103 = vmatpush.bf16.msra.mxu0 %v1564_v26  ;;  %v615_v11 = vshrl.u32 %v1956_v44, 16 }
  0x34   : > { %1117 = vmatpush.bf16.msra.mxu1 %v1572_v27  ;;  %v710_v2 = vor.u32 %v709_v50, %v705_v49  ;;  %1129 = vmatpush.bf16.msra.mxu2 %v1582_v4  ;;  %v1369_v50 = vld [vmem:[%s1890_s10 + $0x8] sm:$0x3]  ;;  %v1364_v4 = vld [vmem:[%s2010_s22 + $0x4] sm:$0x3] }
  0x36   : > { %726 = vrot.lane.b32.xlu1 %v725_v46, %s1740_s23  ;;  %547 = vrot.lane.b32.xlu0 %v546_v45, %s1740_s23  ;;  %v1592_v45 = vld [vmem:[%s2103_s4 + $0xf0] sm:$0xff]  ;;  %v1378_v46 = vld [vmem:[%s1890_s10 + $0xc] sm:$0x3] }
  0x37   : > { %731 = vrot.lane.b32.xlu2 %v730_v54, %s1740_s23  ;;  %1104 = vmatpush.bf16.msra.mxu0 %v1563_v34  ;;  %v1591_v54 = vld [vmem:[%s2103_s4 + $0xe8] sm:$0xff] }
  0x38   : > { %1118 = vmatpush.bf16.msra.mxu1 %v1571_v35  ;;  %1141 = vmatpush.bf16.msra.mxu3 %v1592_v45 }
  0x3b   : > { %1105 = vmatpush.bf16.msra.mxu0 %v1562_v41  ;;  %v1580_v41 = vld [vmem:[%s2103_s4 + $0x90] sm:$0xff] }
  0x3c   : > { %1119 = vmatpush.bf16.msra.mxu1 %v1570_v42  ;;  %1142 = vmatpush.bf16.msra.mxu3 %v1591_v54  ;;  %v1588_v42 = vld [vmem:[%s2103_s4 + $0xd0] sm:$0xff]  ;;  %v1587_v54 = vld [vmem:[%s2103_s4 + $0xc8] sm:$0xff] }
  0x3e   : > { %450 = vrot.lane.b32.xlu0 %v449_v56, %s1740_s23  ;;  %455 = vrot.lane.b32.xlu1 %v454_v57, %s1740_s23  ;;  %v617_v56 = vshll.u32 %v1956_v44, 16  ;;  %v1368_v57 = vld [vmem:[%s1890_s10 + $0x8] sm:$0x7] }
  0x3f   : > { %636 = vrot.lane.b32.xlu2 %v635_v62, %s1740_s23  ;;  %v550_v59 = vunpack.c.l.b16 %v1368_v57  ;;  %v458_v62 = vunpack.c.l.b16 %v1359_v58 }
  0x40   : > { %v619_v12 = vrot.slane %v617_v56, 1  ;;  %1143 = vmatpush.bf16.msra.mxu3 %v1590_v5 }
  0x41   : > { %v551_v6 = vpack.c.b16 %v550_v59, %v550_v59  ;;  %v459_v8 = vpack.c.b16 %v458_v62, %v458_v62 }
  0x42   : > { %v620_v44 = vor.u32 %v619_v12, %v615_v11  ;;  %v1594_v11 = vld [vmem:[%s2103_s4 + $0x100] sm:$0xff] }
  0x43   : > { %v555_v13 = vshll.u32 %v551_v6, 16  ;;  %v463_v16 = vshll.u32 %v459_v8, 16  ;;  %v553_v17 = vshrl.u32 %v551_v6, 16  ;;  %v1384_v6 = vld [vmem:[%s1890_s10 + $0x10] sm:$0x3] }
  0x44   : > { %1144 = vmatpush.bf16.msra.mxu3 %v1589_v23 }
  0x45   : > { %v557_v24 = vrot.slane %v555_v13, 1  ;;  %v465_v30 = vrot.slane %v463_v16, 1  ;;  %v1366_v16 = vld [vmem:[%s1890_s10 + $0x8] sm:$0x3] }
  0x46   : > { %641 = vrot.lane.b32.xlu0 %v640_v63, %s1740_s23  ;;  %v644_v63 = vunpack.c.l.b16 %v1377_v60  ;;  %v1595_v60 = vld [vmem:[%s2103_s4 + $0x108] sm:$0xff]  ;;  %s1201_s23 = sshll.u32 %s1198_s19, 4  ;;  %s1202_s23 = int_to_ptr.hbm [resolvable:$true] %s1201_s23 }
  0x47   : > { %v558_v34 = vor.u32 %v557_v24, %v553_v17 }
  0x48   : > { %v645_v9 = vpack.c.b16 %v644_v63, %v644_v63  ;;  %1145 = vmatpush.bf16.msra.mxu3 %v1588_v42  ;;  %v1373_v42 = vld [vmem:[%s2010_s22 + $0x8] sm:$0x3] }
  0x49   : > { %v579_v43 = vunpack.c.l.b16 %v558_v34 }
  0x4a   : > { %v647_v35 = vshrl.u32 %v645_v9, 16 }
  0x4b   : > { %v582_v52 = vpack.c.b16 %v579_v43, %v579_v43 }
  0x4c   : > { %1146 = vmatpush.bf16.msra.mxu3 %v1587_v54 }
  0x4d   : > { %v585_v61 = vrot.slane %v582_v52, 6 }
  0x4f   : > { %592 = vst.msk [vmem:[#allocation2 + $0x10] sm:$0xc] %vm591_vm2, %v585_v61 }
  0x79   : > { %v424_v10 = vpop.permute.xlu2 %423 }
  0x7a   : > { %v470_v18 = vsel %vm467_vm0, %v409_v15, %v424_v10  ;;  %v735_v10 = vpack.c.b16 %v734_v0, %v734_v0 }
  0x7b   : > { %v484_v22 = vunpack.c.l.b16 %v470_v18  ;;  %v649_v18 = vshll.u32 %v645_v9, 16 }
  0x7c   : > { %v739_v26 = vshll.u32 %v735_v10, 16 }
  0x7d   : > { %v651_v37 = vrot.slane %v649_v18, 1 }
  0x7e   : > { %v741_v38 = vrot.slane %v739_v26, 1 }
  0x81   : > { %v439_v25 = vpop.permute.xlu2 %438 }
  0x82   : > { %v473_v28 = vsel %vm467_vm0, %v434_v21, %v439_v25  ;;  %v737_v25 = vshrl.u32 %v735_v10, 16 }
  0x83   : > { %v485_v29 = vunpack.c.l.b16 %v473_v28 }
  0x85   : > { %v489_v33 = vpack.c.b16 %v485_v29, %v484_v22  ;;  %v1581_v22 = vld [vmem:[%s2103_s4 + $0x98] sm:$0xff]  ;;  %v461_v29 = vshrl.u32 %v459_v8, 16  ;;  %v1586_v8 = vld [vmem:[%s2103_s4 + $0xc0] sm:$0xff] }
  0x86   : > { %1130 = vmatpush.bf16.msra.mxu2 %v1581_v22  ;;  %1147 = vmatpush.bf16.msra.mxu3 %v1586_v8 }
  0x87   : > { %495 = vst [vmem:[#allocation2] sm:$0x33] %v489_v33  ;;  %v1597_v33 = vld [vmem:[%s2103_s4 + $0x118] sm:$0xff]  ;;  %v466_v36 = vor.u32 %v465_v30, %v461_v29 }
  0x88   : > { %1158 = vmatpush.bf16.msrb.mxu0 %v1597_v33 }
  0x89   : > { %v1983_v15 = vpop.permute.xlu2 %542  ;;  %v488_v45 = vunpack.c.l.b16 %v466_v36 }
  0x8a   : > { %1131 = vmatpush.bf16.msra.mxu2 %v1580_v41  ;;  %v567_v12 = vsel %vm467_vm0, %v1364_v4, %v1983_v15 }
  0x8c   : > { %1159 = vmatpush.bf16.msrb.mxu0 %v1596_v51 }
  0x8e   : > { %1132 = vmatpush.bf16.msra.mxu2 %v1579_v53 }
  0x90   : > { %v700_v47 = vpop.permute.xlu1 %699  ;;  %v516_v48 = vpop.permute.xlu0 %515  ;;  %1160 = vmatpush.bf16.msrb.mxu0 %v1595_v60 }
  0x91   : > { %v745_v1 = vsel %vm467_vm0, %v1378_v46, %v700_v47  ;;  %v561_v7 = vsel %vm467_vm0, %v1360_v55, %v516_v48  ;;  %v652_v46 = vor.u32 %v651_v37, %v647_v35  ;;  %v742_v47 = vor.u32 %v741_v38, %v737_v25  ;;  %v732_v5 = vpop.permute.xlu2 %731 }
  0x92   : > { %v759_v14 = vunpack.c.l.b16 %v745_v1  ;;  %v575_v19 = vunpack.c.l.b16 %v561_v7  ;;  %v491_v55 = vpack.c.b16 %v488_v45, %v488_v45  ;;  %v1578_v7 = vld [vmem:[%s2103_s4 + $0x80] sm:$0xff]  ;;  %v754_v13 = vsel %vm467_vm0, %v1384_v6, %v732_v5 }
  0x93   : > { %v673_v56 = vunpack.c.l.b16 %v652_v46  ;;  %v763_v57 = vunpack.c.l.b16 %v742_v47  ;;  %1133 = vmatpush.bf16.msra.mxu2 %v1578_v7  ;;  %v1375_v46 = vld [vmem:[%s1890_s10 + $0xc] sm:$0x3]  ;;  %v1658_v6 = vld [vmem:[%s2104_s5] ss:$0 sm:$0xff] }
  0x94   : > { %498 = vst.msk [vmem:[#allocation2 + $0x10] sm:$0x3] %vm497_vm1, %v491_v55  ;;  %1161 = vmatpush.bf16.msrb.mxu0 %v1594_v11 }
  0x95   : > { %v676_v0 = vpack.c.b16 %v673_v56, %v673_v56  ;;  %v766_v1 = vpack.c.b16 %v763_v57, %v763_v57 }
  0x97   : > { %v769_v9 = vrot.slane %v766_v1, 6  ;;  %682 = vst.msk [vmem:[#allocation2 + $0x24] sm:$0x3] %vm497_vm1, %v676_v0 }
  0x98   : > { %v715_v20 = vpop.permute.xlu1 %714  ;;  %v531_v21 = vpop.permute.xlu0 %530 }
  0x99   : > { %v748_v27 = vsel %vm467_vm0, %v710_v2, %v715_v20  ;;  %v564_v28 = vsel %vm467_vm0, %v526_v3, %v531_v21  ;;  %775 = vst.msk [vmem:[#allocation2 + $0x24] sm:$0xc] %vm591_vm2, %v769_v9  ;;  %v762_v20 = vunpack.c.l.b16 %v754_v13  ;;  %v637_v43 = vpop.permute.xlu2 %636  ;;  %v1659_v9 = vld [vmem:[%s2105_s6] ss:$0 sm:$0xff] }
  0x9a   : > { %v760_v31 = vunpack.c.l.b16 %v748_v27  ;;  %v576_v32 = vunpack.c.l.b16 %v564_v28  ;;  %v661_v45 = vsel %vm467_vm0, %v1373_v42, %v637_v43 }
  0x9c   : > { %v764_v39 = vpack.c.b16 %v760_v31, %v759_v14  ;;  %v580_v40 = vpack.c.b16 %v576_v32, %v575_v19  ;;  %v1382_v14 = vld [vmem:[%s2010_s22 + $0xc] sm:$0x3]  ;;  %v577_v19 = vunpack.c.l.b16 %v567_v12  ;;  %v413_v31 = vld [vmem:[%s2010_s22] sm:$0x3]  ;;  %v1357_v32 = vld [vmem:[%s1890_s10 + $0x4] sm:$0x3] }
  0x9d   : > { %s1674_s10 = sshra.s32 %s1202_s23, 4  ;;  %s1675_s10 = int_to_ptr.hbm [resolvable:$true] %s1674_s10 }
  0x9e   : > { %v767_v48 = vrot.slane %v764_v39, 6  ;;  %v583_v49 = vrot.slane %v580_v40, 6  ;;  %s1676_s22 = scalar_lea.hbm %s1675_s10, 16  ;;  %p1681_p1 = scmp.lt.s32.totalorder %s1675_s10, %s2106_s7 }
  0x9f   : > { %p1677_p12 = scmp.ne.s32.totalorder %s1675_s10, %s1676_s22  ;;  %p1682_p2 = scmp.lt.s32.totalorder %s1680_s16, %s1676_s22 }
  0xa0   : > { %773 = vst [vmem:[#allocation2 + $0x14] sm:$0xcc] %v767_v48  ;;  %v625_v58 = vpop.permute.xlu1 %624  ;;  %v610_v59 = vpop.permute.xlu0 %609  ;;  %v671_v48 = vunpack.c.l.b16 %v661_v45  ;;  %v1561_v51 = vld [vmem:[#allocation2 + $0x20] sm:$0xf0] }
  0xa1   : > { %589 = vst [vmem:[#allocation2] sm:$0xcc] %v583_v49  ;;  %v658_v62 = vsel %vm467_vm0, %v620_v44, %v625_v58  ;;  %v655_v63 = vsel %vm467_vm0, %v1369_v50, %v610_v59  ;;  %v1405_v50 = vld [vmem:[#allocation2 + $0x10] sm:$0xf]  ;;  %p1678_p13 = pnand %p1677_p12, %p1823_p4  ;;  %p1683_p3 = por %p1682_p2, %p1681_p1 }
  0xa2   : > { %v670_v2 = vunpack.c.l.b16 %v658_v62  ;;  %v669_v3 = vunpack.c.l.b16 %v655_v63  ;;  %v1406_v54 = vor.u32 %v1561_v51, %v1405_v50 }
  0xa3   : > { %p1679_p0 = pneg %p1678_p13 }
  0xa4   : > { %v674_v10 = vpack.c.b16 %v670_v2, %v669_v3 }
  0xa5   : > { %p1684_p5 = pnand %p1683_p3, %p1679_p0 }
  0xa6   : > { %680 = vst [vmem:[#allocation2 + $0x14] sm:$0x33] %v674_v10 }
  0xa8   : > { %v727_v17 = vpop.permute.xlu1 %726  ;;  %v548_v18 = vpop.permute.xlu0 %547  ;;  %v1389_v26 = vld [vmem:[#allocation2] sm:$0xf]  ;;  %v1557_v28 = vld [vmem:[#allocation2 + $0x4] sm:$0xf] }
  0xa9   : > { %v751_v21 = vsel %vm467_vm0, %v1382_v14, %v727_v17  ;;  %v570_v15 = vsel %vm467_vm0, %v1366_v16, %v548_v18 }
  0xaa   : > { %v761_v22 = vunpack.c.l.b16 %v751_v21  ;;  %v578_v23 = vunpack.c.l.b16 %v570_v15 }
  0xac   : > { %v581_v24 = vpack.c.b16 %v578_v23, %v577_v19  ;;  %v765_v25 = vpack.c.b16 %v762_v20, %v761_v22 }
  0xad   : > { %v1559_v27 = vld [vmem:[#allocation2 + $0x10] sm:$0xf0]  ;;  %v1391_v29 = vld [vmem:[#allocation2 + $0x14] sm:$0xf0] }
  0xae   : > { %v584_v30 = vrot.slane %v581_v24, 6  ;;  %v768_v33 = vrot.slane %v765_v25, 6  ;;  %v1390_v34 = vor.u32 %v1559_v27, %v1389_v26  ;;  %v1394_v35 = vor.u32 %v1557_v28, %v1391_v29 }
  0xb0   : > { %590 = vst [vmem:[#allocation2 + $0x8] sm:$0xcc] %v584_v30  ;;  %v451_v36 = vpop.permute.xlu0 %450  ;;  %v456_v37 = vpop.permute.xlu1 %455  ;;  %1106 = vmatmul.bf16.vlgmr.msra.gmra.mxu0 %v1390_v34  ;;  %1120 = vmatmul.bf16.vlgmr.msra.gmra.mxu1 %v1394_v35 }
  0xb1   : > { %v476_v38 = vsel %vm467_vm0, %v413_v31, %v451_v36  ;;  %v479_v39 = vsel %vm467_vm0, %v1357_v32, %v456_v37  ;;  %774 = vst [vmem:[#allocation2 + $0x1c] sm:$0xcc] %v768_v33 }
  0xb2   : > { %v486_v40 = vunpack.c.l.b16 %v476_v38  ;;  %v487_v41 = vunpack.c.l.b16 %v479_v39 }
  0xb4   : > { %v490_v44 = vpack.c.b16 %v487_v41, %v486_v40 }
  0xb6   : > { %496 = vst [vmem:[#allocation2 + $0x8] sm:$0x33] %v490_v44 }
  0xb8   : > { %v642_v47 = vpop.permute.xlu0 %641 }
  0xb9   : > { %v664_v49 = vsel %vm467_vm0, %v1375_v46, %v642_v47 }
  0xba   : > { %v672_v52 = vunpack.c.l.b16 %v664_v49 }
  0xbc   : > { %v675_v53 = vpack.c.b16 %v672_v52, %v671_v48 }
  0xbd   : > { %v1397_v55 = vld [vmem:[#allocation2 + $0x8] sm:$0xf]  ;;  %v1558_v57 = vld [vmem:[#allocation2 + $0xc] sm:$0xf] }
  0xbe   : > { %681 = vst [vmem:[#allocation2 + $0x1c] sm:$0x33] %v675_v53 }
  0xc0   : > { %1551 = vmatmul.msk.bf16.vlgmr.msrb.gmra.mxu0 %vm467_vm0, %v1406_v54 }
  0xc5   : > { %v1560_v56 = vld [vmem:[#allocation2 + $0x18] sm:$0xf0]  ;;  %v1399_v58 = vld [vmem:[#allocation2 + $0x1c] sm:$0xf0] }
  0xc6   : > { %v1398_v59 = vor.u32 %v1560_v56, %v1397_v55  ;;  %v1402_v60 = vor.u32 %v1558_v57, %v1399_v58 }
  0xc8   : > { %1134 = vmatmul.bf16.vlgmr.msra.gmra.mxu2 %v1398_v59  ;;  %1148 = vmatmul.bf16.vlgmr.msra.gmra.mxu3 %v1402_v60 }
 0x12d   : > { %v1107_v61 = vpop.f32.mrf.mxu0  ;;  %v1121_v62 = vpop.f32.mrf.mxu1 }
 0x12e   : > { %v1122_v0 = vadd.f32 %v1121_v62, %v1107_v61 }
 0x135   : > { %v1109_v63 = vpop.f32.mrf.mxu0  ;;  %v1123_v7 = vpop.f32.mrf.mxu1 }
 0x136   : > { %v1124_v10 = vadd.f32 %v1123_v7, %v1109_v63 }
 0x13d   : > { %v1163_v4 = vpop.f32.mrf.mxu0 }
 0x145   : > { %v1165_v19 = vpop.f32.mrf.mxu0 }
 0x14b   : > { %v1135_v1 = vpop.f32.mrf.mxu2  ;;  %v1149_v2 = vpop.f32.mrf.mxu3 }
 0x14c   : > { %v1136_v3 = vadd.f32 %v1135_v1, %v1122_v0 }
 0x14e   : > { %v1150_v5 = vadd.f32 %v1149_v2, %v1136_v3 }
 0x150   : > { %v1164_v8 = vadd.f32 %v1163_v4, %v1150_v5 }
 0x152   : > { %v1172_v11 = vmul.f32 %v1658_v6, %v1164_v8 }
 0x153   : > { %v1137_v12 = vpop.f32.mrf.mxu2  ;;  %v1151_v16 = vpop.f32.mrf.mxu3 }
 0x154   : > { %v1178_v13 = vadd.f32 %v1659_v9, %v1172_v11  ;;  %v1138_v14 = vadd.f32 %v1137_v12, %v1124_v10 }
 0x156   : > { %v1180_v17 = vmax.f32 %v1178_v13, 0.0  ;;  %v1152_v18 = vadd.f32 %v1151_v16, %v1138_v14 }
 0x158   : > { %1182 = vst.msk [vmem:[%s370_s20] sm:$0xff] %vm467_vm0, %v1180_v17  ;;  %v1166_v20 = vadd.f32 %v1165_v19, %v1152_v18 }
 0x15a   : > { %v1173_v21 = vmul.f32 %v1658_v6, %v1166_v20 }
 0x15c   : > { %v1179_v15 = vadd.f32 %v1659_v9, %v1173_v21 }
 0x15e   : > { %v1181_v22 = vmax.f32 %v1179_v15, 0.0 }
 0x160   : > { %1183 = vst.msk [vmem:[%s370_s20 + $0x8] sm:$0xff] %vm467_vm0, %v1181_v22 }
 0x161   : > { %1687 = shalt.err (!%p1684_p5)
}
 0x162   : > { %s1741_s30 = smov 128   ;;  %s1742_s18 = smov 8  }
 0x163   : > { %1600 = dma.vmem_to_hbm [thread:$0]  (%p1823_p4), %s1200_s21, 256, %s1202_s23, %s1185_s27, %s1741_s30, %s1741_s30, %s1742_s18  }
 0x164 PF: > { %p1606_p6 = scmp.ge.s32.totalorder %s1738_s29, 2  ;;  %s1216_s19 = sand.u32 1, %s1718_s24  }
 0x165   : > { %s1217_s20 = scalar_lea.sflag [#allocation4], %s1216_s19 }
 0x166   : > { %p1603_p7 = pnand %p1606_p6, %p1830_p8 }
 0x168   : > { %p1604_p9 = pneg %p1603_p7 }
 0x16a   : > { %1713 = dma.done.wait (%p1604_p9), %s1217_s20, 256  }
 0x16b   : > { %1715 = vsyncadd (%p1604_p9), %s1217_s20, 4294967040  ;;  %s20_s29 = sadd.s32 1, %s1738_s29   ;;  %s2109_s24 = smov %s1722_s25 }
 0x16c   : > { %p17_p10 = scmp.ge.s32.totalorder %s20_s29, 4   ;;  %s2110_s25 = smov %s1726_s26 }
 0x16d   : > { %s2111_s26 = smov %s1836_s14  ;;  %s2112_s27 = smov %s1734_s28 }
 0x16e   : > { %s2113_s28 = smov %s2115_s9  ;;  %19 = sbr.rel (!%p17_p10) target bundleno = 4 (0x4), region = 106 }
 0x173   :  { %1223 = vsyncpa [#allocation4], 1 }
 0x174   :  { %1225 = vsyncpa [#allocation4 + $0x1], 1 }

</bundles_post_ra>
